<compile_context>
chip_gen: v7x
topology: tpu7x:2x2x1
jax: 0.10.0
libtpu: 0.0.40
codegen_flags: <defaults>
</compile_context>

<pallas_src>
import functools

import jax
import jax.numpy as jnp
from jax.experimental import pallas as pl
from jax.experimental.pallas import tpu as pltpu


def _guard(W):
    # Zero-guard width: >= W+1 covers every (dy, dx) out-of-image flat offset,
    # rounded up to a full 128-lane tile so guard/middle stores stay lane-aligned.
    return ((W + 1 + 127) // 128) * 128


def _residual_block_kernel(x_ref, w1_ref, t1_ref, w2_ref, t2_ref, o_ref, pad_ref,
                           *, C, H, W, B):
    """B images per grid step: y = conv2bn2(relu(conv1bn1(x))) + x, lane-dense (C, H*W)."""
    HW = H * W
    GP = _guard(W)

    # Zero only the guard columns, every step (cheap: 2*B*C*GP floats); correct even
    # when the batch grid axis is split across TensorCores (no program_id==0 init).
    zg = jnp.zeros((B, C, GP), jnp.float32)
    pad_ref[:, :, 0:GP] = zg
    pad_ref[:, :, GP + HW:GP + HW + GP] = zg

    # dx = -1 / +1 row-wrap masks, built once per step, shape (1, HW) (broadcast over C).
    lane = jax.lax.broadcasted_iota(jnp.int32, (1, HW), 1)
    if (W & (W - 1)) == 0:
        col = jnp.bitwise_and(lane, W - 1)          # power-of-two W: no VPU divide
    else:
        col = lane % W                              # TODO(synk): cheaper col for non-pow2 W
    ok_dx_m1 = col != 0                             # valid outputs for dx == -1
    ok_dx_p1 = col != (W - 1)                       # valid outputs for dx == +1

    def conv3x3_bn(b, w_ref, t_ref, relu):
        # Input for image b already sits in pad_ref[b, :, GP:GP+HW].
        # One MXU matmul per tap, single (C, HW) f32 accumulator.
        acc = jnp.zeros((C, HW), jnp.float32)
        for k in range(9):
            dy, dx = k // 3 - 1, k % 3 - 1
            d = dy * W + dx
            tap = pad_ref[b, :, GP + d:GP + d + HW]          # (Cin, HW) shifted taps
            if dx == -1:
                tap = jnp.where(ok_dx_m1, tap, 0.0)
            elif dx == 1:
                tap = jnp.where(ok_dx_p1, tap, 0.0)
            acc = acc + jnp.dot(w_ref[k], tap,               # (Cout,Cin)@(Cin,HW) on MXU
                                preferred_element_type=jnp.float32,
                                precision=jax.lax.Precision.HIGHEST)
        acc = acc + t_ref[...]                      # (C,1) folded bias + BN shift
        if relu:
            acc = jnp.maximum(acc, 0.0)
        return acc

    for b in range(B):                              # images are independent
        xb = x_ref[b]                               # (C, HW)
        pad_ref[b, :, GP:GP + HW] = xb
        h = conv3x3_bn(b, w1_ref, t1_ref, relu=True)    # conv1 -> bn1 -> relu
        pad_ref[b, :, GP:GP + HW] = h                   # h stays in VMEM scratch
        y = conv3x3_bn(b, w2_ref, t2_ref, relu=False)   # conv2 -> bn2
        o_ref[b] = y + xb                               # residual add, lane-dense store


def _pick_batch_tile(N, C, HW, GP, max_tile=8, vmem_budget_bytes=24 << 20):
    # Per-step VMEM (f32): double-buffered x block + double-buffered out block + padded scratch.
    def step_bytes(b):
        return 4 * (2 * b * C * HW + 2 * b * C * HW + b * C * (HW + 2 * GP))
    for cand in range(min(N, max_tile), 0, -1):
        if N % cand == 0 and step_bytes(cand) <= vmem_budget_bytes:
            return cand
    return 1


def residual_block_pallas(x, params, *, core_parallel=False):
    N, C, H, W = x.shape
    HW = H * W
    GP = _guard(W)
    B_TILE = _pick_batch_tile(N, C, HW, GP)

    x2 = x.reshape(N, C, HW)                        # lane-dense view (no transpose needed)
    kernel = functools.partial(_residual_block_kernel, C=C, H=H, W=W, B=B_TILE)

    flops = 2 * 9 * 2 * C * C * HW * N              # 2 stages x 9 taps x C*C*HW MACs
    bytes_accessed = 4 * (2 * N * C * HW + 2 * (9 * C * C + C))
    sem = (pltpu.CORE_PARALLEL,) if core_parallel else ("parallel",)

    out2 = pl.pallas_call(
        kernel,
        out_shape=jax.ShapeDtypeStruct((N, C, HW), jnp.float32),
        grid_spec=pltpu.PrefetchScalarGridSpec(
            num_scalar_prefetch=0,
            grid=(N // B_TILE,),                    # B_TILE images per grid step
            in_specs=[
                pl.BlockSpec((B_TILE, C, HW), lambda n: (n, 0, 0)),   # x (also residual)
                pl.BlockSpec(memory_space=pltpu.MemorySpace.VMEM),    # folded w1 (9,C,C)
                pl.BlockSpec(memory_space=pltpu.MemorySpace.VMEM),    # folded shift1 (C,1)
                pl.BlockSpec(memory_space=pltpu.MemorySpace.VMEM),    # folded w2 (9,C,C)
                pl.BlockSpec(memory_space=pltpu.MemorySpace.VMEM),    # folded shift2 (C,1)
            ],
            out_specs=pl.BlockSpec((B_TILE, C, HW), lambda n: (n, 0, 0)),
            scratch_shapes=[pltpu.VMEM((B_TILE, C, HW + 2 * GP), jnp.float32)],
        ),
        compiler_params=pltpu.CompilerParams(dimension_semantics=sem),
        cost_estimate=pl.CostEstimate(flops=flops, transcendentals=0,
                                      bytes_accessed=bytes_accessed),
    )(x2, params["w1f"], params["t1f"], params["w2f"], params["t2f"])
    return out2.reshape(N, C, H, W)


residual_block = jax.jit(residual_block_pallas, static_argnames=("core_parallel",))


def make_params(key, in_channels, out_channels, eps=1e-5):
    # nn.Conv2d(in, out, 3): weight generated here as HWIO (3,3,in,out), bias (out,)
    # nn.BatchNorm2d(in): gamma/beta/running_mean/running_var, each (in,)
    assert in_channels == out_channels, \
        "ResidualBlock requires in_channels == out_channels (BN channel count)."
    C = in_channels
    ks = jax.random.split(key, 12)
    raw = dict(
        w1=0.1 * jax.random.normal(ks[0], (3, 3, C, C), jnp.float32),
        b1=0.05 * jax.random.normal(ks[1], (C,), jnp.float32),
        g1=1.0 + 0.1 * jax.random.normal(ks[2], (C,), jnp.float32),
        be1=0.05 * jax.random.normal(ks[3], (C,), jnp.float32),
        m1=0.05 * jax.random.normal(ks[4], (C,), jnp.float32),
        v1=0.5 + jax.random.uniform(ks[5], (C,), jnp.float32),
        w2=0.1 * jax.random.normal(ks[6], (3, 3, C, C), jnp.float32),
        b2=0.05 * jax.random.normal(ks[7], (C,), jnp.float32),
        g2=1.0 + 0.1 * jax.random.normal(ks[8], (C,), jnp.float32),
        be2=0.05 * jax.random.normal(ks[9], (C,), jnp.float32),
        m2=0.05 * jax.random.normal(ks[10], (C,), jnp.float32),
        v2=0.5 + jax.random.uniform(ks[11], (C,), jnp.float32),
    )
    # Fold eval-mode BN and conv bias into the weights/shift:
    #   (conv_raw(x) + b) * s + (beta - mean*s)  ==  conv_{w*s}(x) + (b*s + beta - mean*s)
    s1 = raw["g1"] / jnp.sqrt(raw["v1"] + eps)
    s2 = raw["g2"] / jnp.sqrt(raw["v2"] + eps)

    def fold_w(w_hwio, s):
        # scale output channels, then per-tap (Cout, Cin): (3,3,in,out) -> (9, out, in)
        return jnp.transpose(w_hwio * s[None, None, None, :], (0, 1, 3, 2)).reshape(9, C, C)

    params = dict(
        w1f=fold_w(raw["w1"], s1),
        t1f=(raw["b1"] * s1 + raw["be1"] - raw["m1"] * s1).reshape(C, 1),
        w2f=fold_w(raw["w2"], s2),
        t2f=(raw["b2"] * s2 + raw["be2"] - raw["m2"] * s2).reshape(C, 1),
    )
    return params, raw


def residual_block_ref(x, raw, eps=1e-5):
    """Pure-JAX reference matching the PyTorch forward (eval-mode BN)."""
    def conv(x, w_hwio, b):
        w_oihw = jnp.transpose(w_hwio, (3, 2, 0, 1))
        y = jax.lax.conv_general_dilated(
            x, w_oihw, (1, 1), ((1, 1), (1, 1)),
            dimension_numbers=("NCHW", "OIHW", "NCHW"),
            precision=jax.lax.Precision.HIGHEST)
        return y + b[None, :, None, None]

    def bn(y, g, be, m, v):
        return (y - m[None, :, None, None]) / jnp.sqrt(v[None, :, None, None] + eps) \
               * g[None, :, None, None] + be[None, :, None, None]

    h = jax.nn.relu(bn(conv(x, raw["w1"], raw["b1"]),
                       raw["g1"], raw["be1"], raw["m1"], raw["v1"]))
    y = bn(conv(h, raw["w2"], raw["b2"]),
           raw["g2"], raw["be2"], raw["m2"], raw["v2"])
    return y + x


if __name__ == "__main__":
    N, C, H, W = 2, 8, 16, 16
    key = jax.random.PRNGKey(0)
    kx, kp = jax.random.split(key)
    x = jax.random.normal(kx, (N, C, H, W), jnp.float32)
    params, raw = make_params(kp, in_channels=C, out_channels=C)

    out = jax.block_until_ready(residual_block(x, params))
    ref = jax.block_until_ready(residual_block_ref(x, raw))

    assert out.shape == (N, C, H, W) and out.dtype == jnp.float32
    err = float(jnp.max(jnp.abs(out - ref)))
    # 2e-2 tolerance: the channel mix runs on the MXU; even if the f32 multi-pass
    # path is not taken, bf16-pass rounding over two conv stages stays well below
    # this, while real tap/shift/fold bugs produce O(0.1-1) errors.
    assert jnp.allclose(out, ref, atol=2e-2, rtol=2e-2), f"mismatch: max abs err {err}"

    print("KERNEL_OK")
</pallas_src>

<mosaic_0001>
module attributes {stable_mosaic.version = 11 : i64} {
  func.func @_residual_block_kernel(%arg0: i32, %arg1: memref<2x8x256xf32, #tpu.memory_space<vmem>>, %arg2: memref<9x8x8xf32, #tpu.memory_space<vmem>>, %arg3: memref<8x1xf32, #tpu.memory_space<vmem>>, %arg4: memref<9x8x8xf32, #tpu.memory_space<vmem>>, %arg5: memref<8x1xf32, #tpu.memory_space<vmem>>, %arg6: memref<2x8x256xf32, #tpu.memory_space<vmem>>, %arg7: memref<2x8x512xf32, #tpu.memory_space<vmem>>) attributes {dimension_semantics = [#tpu.dimension_semantics<parallel>], iteration_bounds = array<i64: 1>, scalar_prefetch = 0 : i64, scratch_operands = 1 : i64, tpu.core_type = #tpu.core_type<tc>, window_params = [{transform_indices = @transform_0, window_bounds = array<i64: 2, 8, 256>}, {pipeline_mode = #tpu.pipeline_mode<synchronous>, transform_indices = @transform_1, window_bounds = array<i64: 9, 8, 8>}, {pipeline_mode = #tpu.pipeline_mode<synchronous>, transform_indices = @transform_2, window_bounds = array<i64: 8, 1>}, {pipeline_mode = #tpu.pipeline_mode<synchronous>, transform_indices = @transform_3, window_bounds = array<i64: 9, 8, 8>}, {pipeline_mode = #tpu.pipeline_mode<synchronous>, transform_indices = @transform_4, window_bounds = array<i64: 8, 1>}, {transform_indices = @transform_5, window_bounds = array<i64: 2, 8, 256>}]} {
    %cst = arith.constant 0.000000e+00 : f32
    %0 = vector.broadcast %cst : f32 to vector<2x8x128xf32>
    %c0 = arith.constant 0 : index
    %c0_0 = arith.constant 0 : index
    %c0_1 = arith.constant 0 : index
    %1 = vector.load %arg7[%c0, %c0_0, %c0_1] : memref<2x8x512xf32, #tpu.memory_space<vmem>>, vector<2x8x128xf32>
    tpu.vector_store %arg7[%c0, %c0_0, %c0_1], %0 {strides = array<i32>} : memref<2x8x512xf32, #tpu.memory_space<vmem>>, vector<2x8x128xf32>,
    %c0_2 = arith.constant 0 : index
    %c0_3 = arith.constant 0 : index
    %c384 = arith.constant 384 : index
    %2 = vector.load %arg7[%c0_2, %c0_3, %c384] : memref<2x8x512xf32, #tpu.memory_space<vmem>>, vector<2x8x128xf32>
    tpu.vector_store %arg7[%c0_2, %c0_3, %c384], %0 {strides = array<i32>} : memref<2x8x512xf32, #tpu.memory_space<vmem>>, vector<2x8x128xf32>,
    %3 = tpu.iota {dimensions = array<i32: 1>} : vector<1x256xi32>
    %c15_i32 = arith.constant 15 : i32
    %4 = vector.broadcast %c15_i32 : i32 to vector<1x256xi32>
    %5 = arith.andi %3, %4 : vector<1x256xi32>
    %c0_i32 = arith.constant 0 : i32
    %6 = vector.broadcast %c0_i32 : i32 to vector<1x256xi32>
    %7 = arith.cmpi ne, %5, %6 : vector<1x256xi32>
    %c15_i32_4 = arith.constant 15 : i32
    %8 = vector.broadcast %c15_i32_4 : i32 to vector<1x256xi32>
    %9 = arith.cmpi ne, %5, %8 : vector<1x256xi32>
    %c0_5 = arith.constant 0 : index
    %c0_6 = arith.constant 0 : index
    %c0_7 = arith.constant 0 : index
    %10 = vector.load %arg1[%c0_5, %c0_6, %c0_7] : memref<2x8x256xf32, #tpu.memory_space<vmem>>, vector<1x8x256xf32>
    %11 = vector.shape_cast %10 : vector<1x8x256xf32> to vector<8x256xf32>
    %c0_8 = arith.constant 0 : index
    %c0_9 = arith.constant 0 : index
    %c128 = arith.constant 128 : index
    %12 = vector.load %arg7[%c0_8, %c0_9, %c128] : memref<2x8x512xf32, #tpu.memory_space<vmem>>, vector<1x8x256xf32>
    %13 = vector.shape_cast %12 : vector<1x8x256xf32> to vector<8x256xf32>
    %14 = vector.shape_cast %11 : vector<8x256xf32> to vector<1x8x256xf32>
    tpu.vector_store %arg7[%c0_8, %c0_9, %c128], %14 {strides = array<i32>} : memref<2x8x512xf32, #tpu.memory_space<vmem>>, vector<1x8x256xf32>,
    %cst_10 = arith.constant 0.000000e+00 : f32
    %15 = vector.broadcast %cst_10 : f32 to vector<8x256xf32>
    %c0_11 = arith.constant 0 : index
    %c0_12 = arith.constant 0 : index
    %c111 = arith.constant 111 : index
    %16 = vector.load %arg7[%c0_11, %c0_12, %c111] : memref<2x8x512xf32, #tpu.memory_space<vmem>>, vector<1x8x256xf32>
    %17 = vector.shape_cast %16 : vector<1x8x256xf32> to vector<8x256xf32>
    %cst_13 = arith.constant 0.000000e+00 : f32
    %18 = vector.shape_cast %7 : vector<1x256xi1> to vector<1x256xi1>
    %19 = vector.broadcast %18 : vector<1x256xi1> to vector<8x256xi1>
    %20 = vector.broadcast %cst_13 : f32 to vector<8x256xf32>
    %21 = arith.select %19, %17, %20 : vector<8x256xi1>, vector<8x256xf32>
    %c0_14 = arith.constant 0 : index
    %c0_15 = arith.constant 0 : index
    %c0_16 = arith.constant 0 : index
    %22 = vector.load %arg2[%c0_14, %c0_15, %c0_16] : memref<9x8x8xf32, #tpu.memory_space<vmem>>, vector<1x8x8xf32>
    %23 = vector.shape_cast %22 : vector<1x8x8xf32> to vector<8x8xf32>
    %cst_17 = arith.constant dense<0.000000e+00> : vector<8x256xf32>
    %24 = tpu.matmul %23, %21, %cst_17 {dimension_numbers = #tpu.dot_dimension_numbers<[1], [0], [0], [1], [0, 0, 1, 1], [], []>, precision = #tpu.contract_precision<fp32>} : vector<8x8xf32>, vector<8x256xf32>, vector<8x256xf32> -> vector<8x256xf32>
    %25 = arith.addf %15, %24 : vector<8x256xf32>
    %c0_18 = arith.constant 0 : index
    %c0_19 = arith.constant 0 : index
    %c112 = arith.constant 112 : index
    %26 = vector.load %arg7[%c0_18, %c0_19, %c112] : memref<2x8x512xf32, #tpu.memory_space<vmem>>, vector<1x8x256xf32>
    %27 = vector.shape_cast %26 : vector<1x8x256xf32> to vector<8x256xf32>
    %c1 = arith.constant 1 : index
    %c0_20 = arith.constant 0 : index
    %c0_21 = arith.constant 0 : index
    %28 = vector.load %arg2[%c1, %c0_20, %c0_21] : memref<9x8x8xf32, #tpu.memory_space<vmem>>, vector<1x8x8xf32>
    %29 = vector.shape_cast %28 : vector<1x8x8xf32> to vector<8x8xf32>
    %cst_22 = arith.constant dense<0.000000e+00> : vector<8x256xf32>
    %30 = tpu.matmul %29, %27, %cst_22 {dimension_numbers = #tpu.dot_dimension_numbers<[1], [0], [0], [1], [0, 0, 1, 1], [], []>, precision = #tpu.contract_precision<fp32>} : vector<8x8xf32>, vector<8x256xf32>, vector<8x256xf32> -> vector<8x256xf32>
    %31 = arith.addf %25, %30 : vector<8x256xf32>
    %c0_23 = arith.constant 0 : index
    %c0_24 = arith.constant 0 : index
    %c113 = arith.constant 113 : index
    %32 = vector.load %arg7[%c0_23, %c0_24, %c113] : memref<2x8x512xf32, #tpu.memory_space<vmem>>, vector<1x8x256xf32>
    %33 = vector.shape_cast %32 : vector<1x8x256xf32> to vector<8x256xf32>
    %cst_25 = arith.constant 0.000000e+00 : f32
    %34 = vector.shape_cast %9 : vector<1x256xi1> to vector<1x256xi1>
    %35 = vector.broadcast %34 : vector<1x256xi1> to vector<8x256xi1>
    %36 = vector.broadcast %cst_25 : f32 to vector<8x256xf32>
    %37 = arith.select %35, %33, %36 : vector<8x256xi1>, vector<8x256xf32>
    %c2 = arith.constant 2 : index
    %c0_26 = arith.constant 0 : index
    %c0_27 = arith.constant 0 : index
    %38 = vector.load %arg2[%c2, %c0_26, %c0_27] : memref<9x8x8xf32, #tpu.memory_space<vmem>>, vector<1x8x8xf32>
    %39 = vector.shape_cast %38 : vector<1x8x8xf32> to vector<8x8xf32>
    %cst_28 = arith.constant dense<0.000000e+00> : vector<8x256xf32>
    %40 = tpu.matmul %39, %37, %cst_28 {dimension_numbers = #tpu.dot_dimension_numbers<[1], [0], [0], [1], [0, 0, 1, 1], [], []>, precision = #tpu.contract_precision<fp32>} : vector<8x8xf32>, vector<8x256xf32>, vector<8x256xf32> -> vector<8x256xf32>
    %41 = arith.addf %31, %40 : vector<8x256xf32>
    %c0_29 = arith.constant 0 : index
    %c0_30 = arith.constant 0 : index
    %c127 = arith.constant 127 : index
    %42 = vector.load %arg7[%c0_29, %c0_30, %c127] : memref<2x8x512xf32, #tpu.memory_space<vmem>>, vector<1x8x256xf32>
    %43 = vector.shape_cast %42 : vector<1x8x256xf32> to vector<8x256xf32>
    %cst_31 = arith.constant 0.000000e+00 : f32
    %44 = vector.shape_cast %7 : vector<1x256xi1> to vector<1x256xi1>
    %45 = vector.broadcast %44 : vector<1x256xi1> to vector<8x256xi1>
    %46 = vector.broadcast %cst_31 : f32 to vector<8x256xf32>
    %47 = arith.select %45, %43, %46 : vector<8x256xi1>, vector<8x256xf32>
    %c3 = arith.constant 3 : index
    %c0_32 = arith.constant 0 : index
    %c0_33 = arith.constant 0 : index
    %48 = vector.load %arg2[%c3, %c0_32, %c0_33] : memref<9x8x8xf32, #tpu.memory_space<vmem>>, vector<1x8x8xf32>
    %49 = vector.shape_cast %48 : vector<1x8x8xf32> to vector<8x8xf32>
    %cst_34 = arith.constant dense<0.000000e+00> : vector<8x256xf32>
    %50 = tpu.matmul %49, %47, %cst_34 {dimension_numbers = #tpu.dot_dimension_numbers<[1], [0], [0], [1], [0, 0, 1, 1], [], []>, precision = #tpu.contract_precision<fp32>} : vector<8x8xf32>, vector<8x256xf32>, vector<8x256xf32> -> vector<8x256xf32>
    %51 = arith.addf %41, %50 : vector<8x256xf32>
    %c0_35 = arith.constant 0 : index
    %c0_36 = arith.constant 0 : index
    %c128_37 = arith.constant 128 : index
    %52 = vector.load %arg7[%c0_35, %c0_36, %c128_37] : memref<2x8x512xf32, #tpu.memory_space<vmem>>, vector<1x8x256xf32>
    %53 = vector.shape_cast %52 : vector<1x8x256xf32> to vector<8x256xf32>
    %c4 = arith.constant 4 : index
    %c0_38 = arith.constant 0 : index
    %c0_39 = arith.constant 0 : index
    %54 = vector.load %arg2[%c4, %c0_38, %c0_39] : memref<9x8x8xf32, #tpu.memory_space<vmem>>, vector<1x8x8xf32>
    %55 = vector.shape_cast %54 : vector<1x8x8xf32> to vector<8x8xf32>
    %cst_40 = arith.constant dense<0.000000e+00> : vector<8x256xf32>
    %56 = tpu.matmul %55, %53, %cst_40 {dimension_numbers = #tpu.dot_dimension_numbers<[1], [0], [0], [1], [0, 0, 1, 1], [], []>, precision = #tpu.contract_precision<fp32>} : vector<8x8xf32>, vector<8x256xf32>, vector<8x256xf32> -> vector<8x256xf32>
    %57 = arith.addf %51, %56 : vector<8x256xf32>
    %c0_41 = arith.constant 0 : index
    %c0_42 = arith.constant 0 : index
    %c129 = arith.constant 129 : index
    %58 = vector.load %arg7[%c0_41, %c0_42, %c129] : memref<2x8x512xf32, #tpu.memory_space<vmem>>, vector<1x8x256xf32>
    %59 = vector.shape_cast %58 : vector<1x8x256xf32> to vector<8x256xf32>
    %cst_43 = arith.constant 0.000000e+00 : f32
    %60 = vector.shape_cast %9 : vector<1x256xi1> to vector<1x256xi1>
    %61 = vector.broadcast %60 : vector<1x256xi1> to vector<8x256xi1>
    %62 = vector.broadcast %cst_43 : f32 to vector<8x256xf32>
    %63 = arith.select %61, %59, %62 : vector<8x256xi1>, vector<8x256xf32>
    %c5 = arith.constant 5 : index
    %c0_44 = arith.constant 0 : index
    %c0_45 = arith.constant 0 : index
    %64 = vector.load %arg2[%c5, %c0_44, %c0_45] : memref<9x8x8xf32, #tpu.memory_space<vmem>>, vector<1x8x8xf32>
    %65 = vector.shape_cast %64 : vector<1x8x8xf32> to vector<8x8xf32>
    %cst_46 = arith.constant dense<0.000000e+00> : vector<8x256xf32>
    %66 = tpu.matmul %65, %63, %cst_46 {dimension_numbers = #tpu.dot_dimension_numbers<[1], [0], [0], [1], [0, 0, 1, 1], [], []>, precision = #tpu.contract_precision<fp32>} : vector<8x8xf32>, vector<8x256xf32>, vector<8x256xf32> -> vector<8x256xf32>
    %67 = arith.addf %57, %66 : vector<8x256xf32>
    %c0_47 = arith.constant 0 : index
    %c0_48 = arith.constant 0 : index
    %c143 = arith.constant 143 : index
    %68 = vector.load %arg7[%c0_47, %c0_48, %c143] : memref<2x8x512xf32, #tpu.memory_space<vmem>>, vector<1x8x256xf32>
    %69 = vector.shape_cast %68 : vector<1x8x256xf32> to vector<8x256xf32>
    %cst_49 = arith.constant 0.000000e+00 : f32
    %70 = vector.shape_cast %7 : vector<1x256xi1> to vector<1x256xi1>
    %71 = vector.broadcast %70 : vector<1x256xi1> to vector<8x256xi1>
    %72 = vector.broadcast %cst_49 : f32 to vector<8x256xf32>
    %73 = arith.select %71, %69, %72 : vector<8x256xi1>, vector<8x256xf32>
    %c6 = arith.constant 6 : index
    %c0_50 = arith.constant 0 : index
    %c0_51 = arith.constant 0 : index
    %74 = vector.load %arg2[%c6, %c0_50, %c0_51] : memref<9x8x8xf32, #tpu.memory_space<vmem>>, vector<1x8x8xf32>
    %75 = vector.shape_cast %74 : vector<1x8x8xf32> to vector<8x8xf32>
    %cst_52 = arith.constant dense<0.000000e+00> : vector<8x256xf32>
    %76 = tpu.matmul %75, %73, %cst_52 {dimension_numbers = #tpu.dot_dimension_numbers<[1], [0], [0], [1], [0, 0, 1, 1], [], []>, precision = #tpu.contract_precision<fp32>} : vector<8x8xf32>, vector<8x256xf32>, vector<8x256xf32> -> vector<8x256xf32>
    %77 = arith.addf %67, %76 : vector<8x256xf32>
    %c0_53 = arith.constant 0 : index
    %c0_54 = arith.constant 0 : index
    %c144 = arith.constant 144 : index
    %78 = vector.load %arg7[%c0_53, %c0_54, %c144] : memref<2x8x512xf32, #tpu.memory_space<vmem>>, vector<1x8x256xf32>
    %79 = vector.shape_cast %78 : vector<1x8x256xf32> to vector<8x256xf32>
    %c7 = arith.constant 7 : index
    %c0_55 = arith.constant 0 : index
    %c0_56 = arith.constant 0 : index
    %80 = vector.load %arg2[%c7, %c0_55, %c0_56] : memref<9x8x8xf32, #tpu.memory_space<vmem>>, vector<1x8x8xf32>
    %81 = vector.shape_cast %80 : vector<1x8x8xf32> to vector<8x8xf32>
    %cst_57 = arith.constant dense<0.000000e+00> : vector<8x256xf32>
    %82 = tpu.matmul %81, %79, %cst_57 {dimension_numbers = #tpu.dot_dimension_numbers<[1], [0], [0], [1], [0, 0, 1, 1], [], []>, precision = #tpu.contract_precision<fp32>} : vector<8x8xf32>, vector<8x256xf32>, vector<8x256xf32> -> vector<8x256xf32>
    %83 = arith.addf %77, %82 : vector<8x256xf32>
    %c0_58 = arith.constant 0 : index
    %c0_59 = arith.constant 0 : index
    %c145 = arith.constant 145 : index
    %84 = vector.load %arg7[%c0_58, %c0_59, %c145] : memref<2x8x512xf32, #tpu.memory_space<vmem>>, vector<1x8x256xf32>
    %85 = vector.shape_cast %84 : vector<1x8x256xf32> to vector<8x256xf32>
    %cst_60 = arith.constant 0.000000e+00 : f32
    %86 = vector.shape_cast %9 : vector<1x256xi1> to vector<1x256xi1>
    %87 = vector.broadcast %86 : vector<1x256xi1> to vector<8x256xi1>
    %88 = vector.broadcast %cst_60 : f32 to vector<8x256xf32>
    %89 = arith.select %87, %85, %88 : vector<8x256xi1>, vector<8x256xf32>
    %c8 = arith.constant 8 : index
    %c0_61 = arith.constant 0 : index
    %c0_62 = arith.constant 0 : index
    %90 = vector.load %arg2[%c8, %c0_61, %c0_62] : memref<9x8x8xf32, #tpu.memory_space<vmem>>, vector<1x8x8xf32>
    %91 = vector.shape_cast %90 : vector<1x8x8xf32> to vector<8x8xf32>
    %cst_63 = arith.constant dense<0.000000e+00> : vector<8x256xf32>
    %92 = tpu.matmul %91, %89, %cst_63 {dimension_numbers = #tpu.dot_dimension_numbers<[1], [0], [0], [1], [0, 0, 1, 1], [], []>, precision = #tpu.contract_precision<fp32>} : vector<8x8xf32>, vector<8x256xf32>, vector<8x256xf32> -> vector<8x256xf32>
    %93 = arith.addf %83, %92 : vector<8x256xf32>
    %c0_64 = arith.constant 0 : index
    %c0_65 = arith.constant 0 : index
    %94 = vector.load %arg3[%c0_64, %c0_65] : memref<8x1xf32, #tpu.memory_space<vmem>>, vector<8x1xf32>
    %95 = vector.broadcast %94 : vector<8x1xf32> to vector<8x256xf32>
    %96 = arith.addf %93, %95 : vector<8x256xf32>
    %cst_66 = arith.constant 0.000000e+00 : f32
    %97 = vector.broadcast %cst_66 : f32 to vector<8x256xf32>
    %98 = arith.maximumf %96, %97 : vector<8x256xf32>
    %c0_67 = arith.constant 0 : index
    %c0_68 = arith.constant 0 : index
    %c128_69 = arith.constant 128 : index
    %99 = vector.load %arg7[%c0_67, %c0_68, %c128_69] : memref<2x8x512xf32, #tpu.memory_space<vmem>>, vector<1x8x256xf32>
    %100 = vector.shape_cast %99 : vector<1x8x256xf32> to vector<8x256xf32>
    %101 = vector.shape_cast %98 : vector<8x256xf32> to vector<1x8x256xf32>
    tpu.vector_store %arg7[%c0_67, %c0_68, %c128_69], %101 {strides = array<i32>} : memref<2x8x512xf32, #tpu.memory_space<vmem>>, vector<1x8x256xf32>,
    %cst_70 = arith.constant 0.000000e+00 : f32
    %102 = vector.broadcast %cst_70 : f32 to vector<8x256xf32>
    %c0_71 = arith.constant 0 : index
    %c0_72 = arith.constant 0 : index
    %c111_73 = arith.constant 111 : index
    %103 = vector.load %arg7[%c0_71, %c0_72, %c111_73] : memref<2x8x512xf32, #tpu.memory_space<vmem>>, vector<1x8x256xf32>
    %104 = vector.shape_cast %103 : vector<1x8x256xf32> to vector<8x256xf32>
    %cst_74 = arith.constant 0.000000e+00 : f32
    %105 = vector.shape_cast %7 : vector<1x256xi1> to vector<1x256xi1>
    %106 = vector.broadcast %105 : vector<1x256xi1> to vector<8x256xi1>
    %107 = vector.broadcast %cst_74 : f32 to vector<8x256xf32>
    %108 = arith.select %106, %104, %107 : vector<8x256xi1>, vector<8x256xf32>
    %c0_75 = arith.constant 0 : index
    %c0_76 = arith.constant 0 : index
    %c0_77 = arith.constant 0 : index
    %109 = vector.load %arg4[%c0_75, %c0_76, %c0_77] : memref<9x8x8xf32, #tpu.memory_space<vmem>>, vector<1x8x8xf32>
    %110 = vector.shape_cast %109 : vector<1x8x8xf32> to vector<8x8xf32>
    %cst_78 = arith.constant dense<0.000000e+00> : vector<8x256xf32>
    %111 = tpu.matmul %110, %108, %cst_78 {dimension_numbers = #tpu.dot_dimension_numbers<[1], [0], [0], [1], [0, 0, 1, 1], [], []>, precision = #tpu.contract_precision<fp32>} : vector<8x8xf32>, vector<8x256xf32>, vector<8x256xf32> -> vector<8x256xf32>
    %112 = arith.addf %102, %111 : vector<8x256xf32>
    %c0_79 = arith.constant 0 : index
    %c0_80 = arith.constant 0 : index
    %c112_81 = arith.constant 112 : index
    %113 = vector.load %arg7[%c0_79, %c0_80, %c112_81] : memref<2x8x512xf32, #tpu.memory_space<vmem>>, vector<1x8x256xf32>
    %114 = vector.shape_cast %113 : vector<1x8x256xf32> to vector<8x256xf32>
    %c1_82 = arith.constant 1 : index
    %c0_83 = arith.constant 0 : index
    %c0_84 = arith.constant 0 : index
    %115 = vector.load %arg4[%c1_82, %c0_83, %c0_84] : memref<9x8x8xf32, #tpu.memory_space<vmem>>, vector<1x8x8xf32>
    %116 = vector.shape_cast %115 : vector<1x8x8xf32> to vector<8x8xf32>
    %cst_85 = arith.constant dense<0.000000e+00> : vector<8x256xf32>
    %117 = tpu.matmul %116, %114, %cst_85 {dimension_numbers = #tpu.dot_dimension_numbers<[1], [0], [0], [1], [0, 0, 1, 1], [], []>, precision = #tpu.contract_precision<fp32>} : vector<8x8xf32>, vector<8x256xf32>, vector<8x256xf32> -> vector<8x256xf32>
    %118 = arith.addf %112, %117 : vector<8x256xf32>
    %c0_86 = arith.constant 0 : index
    %c0_87 = arith.constant 0 : index
    %c113_88 = arith.constant 113 : index
    %119 = vector.load %arg7[%c0_86, %c0_87, %c113_88] : memref<2x8x512xf32, #tpu.memory_space<vmem>>, vector<1x8x256xf32>
    %120 = vector.shape_cast %119 : vector<1x8x256xf32> to vector<8x256xf32>
    %cst_89 = arith.constant 0.000000e+00 : f32
    %121 = vector.shape_cast %9 : vector<1x256xi1> to vector<1x256xi1>
    %122 = vector.broadcast %121 : vector<1x256xi1> to vector<8x256xi1>
    %123 = vector.broadcast %cst_89 : f32 to vector<8x256xf32>
    %124 = arith.select %122, %120, %123 : vector<8x256xi1>, vector<8x256xf32>
    %c2_90 = arith.constant 2 : index
    %c0_91 = arith.constant 0 : index
    %c0_92 = arith.constant 0 : index
    %125 = vector.load %arg4[%c2_90, %c0_91, %c0_92] : memref<9x8x8xf32, #tpu.memory_space<vmem>>, vector<1x8x8xf32>
    %126 = vector.shape_cast %125 : vector<1x8x8xf32> to vector<8x8xf32>
    %cst_93 = arith.constant dense<0.000000e+00> : vector<8x256xf32>
    %127 = tpu.matmul %126, %124, %cst_93 {dimension_numbers = #tpu.dot_dimension_numbers<[1], [0], [0], [1], [0, 0, 1, 1], [], []>, precision = #tpu.contract_precision<fp32>} : vector<8x8xf32>, vector<8x256xf32>, vector<8x256xf32> -> vector<8x256xf32>
    %128 = arith.addf %118, %127 : vector<8x256xf32>
    %c0_94 = arith.constant 0 : index
    %c0_95 = arith.constant 0 : index
    %c127_96 = arith.constant 127 : index
    %129 = vector.load %arg7[%c0_94, %c0_95, %c127_96] : memref<2x8x512xf32, #tpu.memory_space<vmem>>, vector<1x8x256xf32>
    %130 = vector.shape_cast %129 : vector<1x8x256xf32> to vector<8x256xf32>
    %cst_97 = arith.constant 0.000000e+00 : f32
    %131 = vector.shape_cast %7 : vector<1x256xi1> to vector<1x256xi1>
    %132 = vector.broadcast %131 : vector<1x256xi1> to vector<8x256xi1>
    %133 = vector.broadcast %cst_97 : f32 to vector<8x256xf32>
    %134 = arith.select %132, %130, %133 : vector<8x256xi1>, vector<8x256xf32>
    %c3_98 = arith.constant 3 : index
    %c0_99 = arith.constant 0 : index
    %c0_100 = arith.constant 0 : index
    %135 = vector.load %arg4[%c3_98, %c0_99, %c0_100] : memref<9x8x8xf32, #tpu.memory_space<vmem>>, vector<1x8x8xf32>
    %136 = vector.shape_cast %135 : vector<1x8x8xf32> to vector<8x8xf32>
    %cst_101 = arith.constant dense<0.000000e+00> : vector<8x256xf32>
    %137 = tpu.matmul %136, %134, %cst_101 {dimension_numbers = #tpu.dot_dimension_numbers<[1], [0], [0], [1], [0, 0, 1, 1], [], []>, precision = #tpu.contract_precision<fp32>} : vector<8x8xf32>, vector<8x256xf32>, vector<8x256xf32> -> vector<8x256xf32>
    %138 = arith.addf %128, %137 : vector<8x256xf32>
    %c0_102 = arith.constant 0 : index
    %c0_103 = arith.constant 0 : index
    %c128_104 = arith.constant 128 : index
    %139 = vector.load %arg7[%c0_102, %c0_103, %c128_104] : memref<2x8x512xf32, #tpu.memory_space<vmem>>, vector<1x8x256xf32>
    %140 = vector.shape_cast %139 : vector<1x8x256xf32> to vector<8x256xf32>
    %c4_105 = arith.constant 4 : index
    %c0_106 = arith.constant 0 : index
    %c0_107 = arith.constant 0 : index
    %141 = vector.load %arg4[%c4_105, %c0_106, %c0_107] : memref<9x8x8xf32, #tpu.memory_space<vmem>>, vector<1x8x8xf32>
    %142 = vector.shape_cast %141 : vector<1x8x8xf32> to vector<8x8xf32>
    %cst_108 = arith.constant dense<0.000000e+00> : vector<8x256xf32>
    %143 = tpu.matmul %142, %140, %cst_108 {dimension_numbers = #tpu.dot_dimension_numbers<[1], [0], [0], [1], [0, 0, 1, 1], [], []>, precision = #tpu.contract_precision<fp32>} : vector<8x8xf32>, vector<8x256xf32>, vector<8x256xf32> -> vector<8x256xf32>
    %144 = arith.addf %138, %143 : vector<8x256xf32>
    %c0_109 = arith.constant 0 : index
    %c0_110 = arith.constant 0 : index
    %c129_111 = arith.constant 129 : index
    %145 = vector.load %arg7[%c0_109, %c0_110, %c129_111] : memref<2x8x512xf32, #tpu.memory_space<vmem>>, vector<1x8x256xf32>
    %146 = vector.shape_cast %145 : vector<1x8x256xf32> to vector<8x256xf32>
    %cst_112 = arith.constant 0.000000e+00 : f32
    %147 = vector.shape_cast %9 : vector<1x256xi1> to vector<1x256xi1>
    %148 = vector.broadcast %147 : vector<1x256xi1> to vector<8x256xi1>
    %149 = vector.broadcast %cst_112 : f32 to vector<8x256xf32>
    %150 = arith.select %148, %146, %149 : vector<8x256xi1>, vector<8x256xf32>
    %c5_113 = arith.constant 5 : index
    %c0_114 = arith.constant 0 : index
    %c0_115 = arith.constant 0 : index
    %151 = vector.load %arg4[%c5_113, %c0_114, %c0_115] : memref<9x8x8xf32, #tpu.memory_space<vmem>>, vector<1x8x8xf32>
    %152 = vector.shape_cast %151 : vector<1x8x8xf32> to vector<8x8xf32>
    %cst_116 = arith.constant dense<0.000000e+00> : vector<8x256xf32>
    %153 = tpu.matmul %152, %150, %cst_116 {dimension_numbers = #tpu.dot_dimension_numbers<[1], [0], [0], [1], [0, 0, 1, 1], [], []>, precision = #tpu.contract_precision<fp32>} : vector<8x8xf32>, vector<8x256xf32>, vector<8x256xf32> -> vector<8x256xf32>
    %154 = arith.addf %144, %153 : vector<8x256xf32>
    %c0_117 = arith.constant 0 : index
    %c0_118 = arith.constant 0 : index
    %c143_119 = arith.constant 143 : index
    %155 = vector.load %arg7[%c0_117, %c0_118, %c143_119] : memref<2x8x512xf32, #tpu.memory_space<vmem>>, vector<1x8x256xf32>
    %156 = vector.shape_cast %155 : vector<1x8x256xf32> to vector<8x256xf32>
    %cst_120 = arith.constant 0.000000e+00 : f32
    %157 = vector.shape_cast %7 : vector<1x256xi1> to vector<1x256xi1>
    %158 = vector.broadcast %157 : vector<1x256xi1> to vector<8x256xi1>
    %159 = vector.broadcast %cst_120 : f32 to vector<8x256xf32>
    %160 = arith.select %158, %156, %159 : vector<8x256xi1>, vector<8x256xf32>
    %c6_121 = arith.constant 6 : index
    %c0_122 = arith.constant 0 : index
    %c0_123 = arith.constant 0 : index
    %161 = vector.load %arg4[%c6_121, %c0_122, %c0_123] : memref<9x8x8xf32, #tpu.memory_space<vmem>>, vector<1x8x8xf32>
    %162 = vector.shape_cast %161 : vector<1x8x8xf32> to vector<8x8xf32>
    %cst_124 = arith.constant dense<0.000000e+00> : vector<8x256xf32>
    %163 = tpu.matmul %162, %160, %cst_124 {dimension_numbers = #tpu.dot_dimension_numbers<[1], [0], [0], [1], [0, 0, 1, 1], [], []>, precision = #tpu.contract_precision<fp32>} : vector<8x8xf32>, vector<8x256xf32>, vector<8x256xf32> -> vector<8x256xf32>
    %164 = arith.addf %154, %163 : vector<8x256xf32>
    %c0_125 = arith.constant 0 : index
    %c0_126 = arith.constant 0 : index
    %c144_127 = arith.constant 144 : index
    %165 = vector.load %arg7[%c0_125, %c0_126, %c144_127] : memref<2x8x512xf32, #tpu.memory_space<vmem>>, vector<1x8x256xf32>
    %166 = vector.shape_cast %165 : vector<1x8x256xf32> to vector<8x256xf32>
    %c7_128 = arith.constant 7 : index
    %c0_129 = arith.constant 0 : index
    %c0_130 = arith.constant 0 : index
    %167 = vector.load %arg4[%c7_128, %c0_129, %c0_130] : memref<9x8x8xf32, #tpu.memory_space<vmem>>, vector<1x8x8xf32>
    %168 = vector.shape_cast %167 : vector<1x8x8xf32> to vector<8x8xf32>
    %cst_131 = arith.constant dense<0.000000e+00> : vector<8x256xf32>
    %169 = tpu.matmul %168, %166, %cst_131 {dimension_numbers = #tpu.dot_dimension_numbers<[1], [0], [0], [1], [0, 0, 1, 1], [], []>, precision = #tpu.contract_precision<fp32>} : vector<8x8xf32>, vector<8x256xf32>, vector<8x256xf32> -> vector<8x256xf32>
    %170 = arith.addf %164, %169 : vector<8x256xf32>
    %c0_132 = arith.constant 0 : index
    %c0_133 = arith.constant 0 : index
    %c145_134 = arith.constant 145 : index
    %171 = vector.load %arg7[%c0_132, %c0_133, %c145_134] : memref<2x8x512xf32, #tpu.memory_space<vmem>>, vector<1x8x256xf32>
    %172 = vector.shape_cast %171 : vector<1x8x256xf32> to vector<8x256xf32>
    %cst_135 = arith.constant 0.000000e+00 : f32
    %173 = vector.shape_cast %9 : vector<1x256xi1> to vector<1x256xi1>
    %174 = vector.broadcast %173 : vector<1x256xi1> to vector<8x256xi1>
    %175 = vector.broadcast %cst_135 : f32 to vector<8x256xf32>
    %176 = arith.select %174, %172, %175 : vector<8x256xi1>, vector<8x256xf32>
    %c8_136 = arith.constant 8 : index
    %c0_137 = arith.constant 0 : index
    %c0_138 = arith.constant 0 : index
    %177 = vector.load %arg4[%c8_136, %c0_137, %c0_138] : memref<9x8x8xf32, #tpu.memory_space<vmem>>, vector<1x8x8xf32>
    %178 = vector.shape_cast %177 : vector<1x8x8xf32> to vector<8x8xf32>
    %cst_139 = arith.constant dense<0.000000e+00> : vector<8x256xf32>
    %179 = tpu.matmul %178, %176, %cst_139 {dimension_numbers = #tpu.dot_dimension_numbers<[1], [0], [0], [1], [0, 0, 1, 1], [], []>, precision = #tpu.contract_precision<fp32>} : vector<8x8xf32>, vector<8x256xf32>, vector<8x256xf32> -> vector<8x256xf32>
    %180 = arith.addf %170, %179 : vector<8x256xf32>
    %c0_140 = arith.constant 0 : index
    %c0_141 = arith.constant 0 : index
    %181 = vector.load %arg5[%c0_140, %c0_141] : memref<8x1xf32, #tpu.memory_space<vmem>>, vector<8x1xf32>
    %182 = vector.broadcast %181 : vector<8x1xf32> to vector<8x256xf32>
    %183 = arith.addf %180, %182 : vector<8x256xf32>
    %184 = arith.addf %183, %11 : vector<8x256xf32>
    %c0_142 = arith.constant 0 : index
    %c0_143 = arith.constant 0 : index
    %c0_144 = arith.constant 0 : index
    %185 = vector.load %arg6[%c0_142, %c0_143, %c0_144] : memref<2x8x256xf32, #tpu.memory_space<vmem>>, vector<1x8x256xf32>
    %186 = vector.shape_cast %185 : vector<1x8x256xf32> to vector<8x256xf32>
    %187 = vector.shape_cast %184 : vector<8x256xf32> to vector<1x8x256xf32>
    tpu.vector_store %arg6[%c0_142, %c0_143, %c0_144], %187 {strides = array<i32>} : memref<2x8x256xf32, #tpu.memory_space<vmem>>, vector<1x8x256xf32>,
    %c1_145 = arith.constant 1 : index
    %c0_146 = arith.constant 0 : index
    %c0_147 = arith.constant 0 : index
    %188 = vector.load %arg1[%c1_145, %c0_146, %c0_147] : memref<2x8x256xf32, #tpu.memory_space<vmem>>, vector<1x8x256xf32>
    %189 = vector.shape_cast %188 : vector<1x8x256xf32> to vector<8x256xf32>
    %c1_148 = arith.constant 1 : index
    %c0_149 = arith.constant 0 : index
    %c128_150 = arith.constant 128 : index
    %190 = vector.load %arg7[%c1_148, %c0_149, %c128_150] : memref<2x8x512xf32, #tpu.memory_space<vmem>>, vector<1x8x256xf32>
    %191 = vector.shape_cast %190 : vector<1x8x256xf32> to vector<8x256xf32>
    %192 = vector.shape_cast %189 : vector<8x256xf32> to vector<1x8x256xf32>
    tpu.vector_store %arg7[%c1_148, %c0_149, %c128_150], %192 {strides = array<i32>} : memref<2x8x512xf32, #tpu.memory_space<vmem>>, vector<1x8x256xf32>,
    %cst_151 = arith.constant 0.000000e+00 : f32
    %193 = vector.broadcast %cst_151 : f32 to vector<8x256xf32>
    %c1_152 = arith.constant 1 : index
    %c0_153 = arith.constant 0 : index
    %c111_154 = arith.constant 111 : index
    %194 = vector.load %arg7[%c1_152, %c0_153, %c111_154] : memref<2x8x512xf32, #tpu.memory_space<vmem>>, vector<1x8x256xf32>
    %195 = vector.shape_cast %194 : vector<1x8x256xf32> to vector<8x256xf32>
    %cst_155 = arith.constant 0.000000e+00 : f32
    %196 = vector.shape_cast %7 : vector<1x256xi1> to vector<1x256xi1>
    %197 = vector.broadcast %196 : vector<1x256xi1> to vector<8x256xi1>
    %198 = vector.broadcast %cst_155 : f32 to vector<8x256xf32>
    %199 = arith.select %197, %195, %198 : vector<8x256xi1>, vector<8x256xf32>
    %c0_156 = arith.constant 0 : index
    %c0_157 = arith.constant 0 : index
    %c0_158 = arith.constant 0 : index
    %200 = vector.load %arg2[%c0_156, %c0_157, %c0_158] : memref<9x8x8xf32, #tpu.memory_space<vmem>>, vector<1x8x8xf32>
    %201 = vector.shape_cast %200 : vector<1x8x8xf32> to vector<8x8xf32>
    %cst_159 = arith.constant dense<0.000000e+00> : vector<8x256xf32>
    %202 = tpu.matmul %201, %199, %cst_159 {dimension_numbers = #tpu.dot_dimension_numbers<[1], [0], [0], [1], [0, 0, 1, 1], [], []>, precision = #tpu.contract_precision<fp32>} : vector<8x8xf32>, vector<8x256xf32>, vector<8x256xf32> -> vector<8x256xf32>
    %203 = arith.addf %193, %202 : vector<8x256xf32>
    %c1_160 = arith.constant 1 : index
    %c0_161 = arith.constant 0 : index
    %c112_162 = arith.constant 112 : index
    %204 = vector.load %arg7[%c1_160, %c0_161, %c112_162] : memref<2x8x512xf32, #tpu.memory_space<vmem>>, vector<1x8x256xf32>
    %205 = vector.shape_cast %204 : vector<1x8x256xf32> to vector<8x256xf32>
    %c1_163 = arith.constant 1 : index
    %c0_164 = arith.constant 0 : index
    %c0_165 = arith.constant 0 : index
    %206 = vector.load %arg2[%c1_163, %c0_164, %c0_165] : memref<9x8x8xf32, #tpu.memory_space<vmem>>, vector<1x8x8xf32>
    %207 = vector.shape_cast %206 : vector<1x8x8xf32> to vector<8x8xf32>
    %cst_166 = arith.constant dense<0.000000e+00> : vector<8x256xf32>
    %208 = tpu.matmul %207, %205, %cst_166 {dimension_numbers = #tpu.dot_dimension_numbers<[1], [0], [0], [1], [0, 0, 1, 1], [], []>, precision = #tpu.contract_precision<fp32>} : vector<8x8xf32>, vector<8x256xf32>, vector<8x256xf32> -> vector<8x256xf32>
    %209 = arith.addf %203, %208 : vector<8x256xf32>
    %c1_167 = arith.constant 1 : index
    %c0_168 = arith.constant 0 : index
    %c113_169 = arith.constant 113 : index
    %210 = vector.load %arg7[%c1_167, %c0_168, %c113_169] : memref<2x8x512xf32, #tpu.memory_space<vmem>>, vector<1x8x256xf32>
    %211 = vector.shape_cast %210 : vector<1x8x256xf32> to vector<8x256xf32>
    %cst_170 = arith.constant 0.000000e+00 : f32
    %212 = vector.shape_cast %9 : vector<1x256xi1> to vector<1x256xi1>
    %213 = vector.broadcast %212 : vector<1x256xi1> to vector<8x256xi1>
    %214 = vector.broadcast %cst_170 : f32 to vector<8x256xf32>
    %215 = arith.select %213, %211, %214 : vector<8x256xi1>, vector<8x256xf32>
    %c2_171 = arith.constant 2 : index
    %c0_172 = arith.constant 0 : index
    %c0_173 = arith.constant 0 : index
    %216 = vector.load %arg2[%c2_171, %c0_172, %c0_173] : memref<9x8x8xf32, #tpu.memory_space<vmem>>, vector<1x8x8xf32>
    %217 = vector.shape_cast %216 : vector<1x8x8xf32> to vector<8x8xf32>
    %cst_174 = arith.constant dense<0.000000e+00> : vector<8x256xf32>
    %218 = tpu.matmul %217, %215, %cst_174 {dimension_numbers = #tpu.dot_dimension_numbers<[1], [0], [0], [1], [0, 0, 1, 1], [], []>, precision = #tpu.contract_precision<fp32>} : vector<8x8xf32>, vector<8x256xf32>, vector<8x256xf32> -> vector<8x256xf32>
    %219 = arith.addf %209, %218 : vector<8x256xf32>
    %c1_175 = arith.constant 1 : index
    %c0_176 = arith.constant 0 : index
    %c127_177 = arith.constant 127 : index
    %220 = vector.load %arg7[%c1_175, %c0_176, %c127_177] : memref<2x8x512xf32, #tpu.memory_space<vmem>>, vector<1x8x256xf32>
    %221 = vector.shape_cast %220 : vector<1x8x256xf32> to vector<8x256xf32>
    %cst_178 = arith.constant 0.000000e+00 : f32
    %222 = vector.shape_cast %7 : vector<1x256xi1> to vector<1x256xi1>
    %223 = vector.broadcast %222 : vector<1x256xi1> to vector<8x256xi1>
    %224 = vector.broadcast %cst_178 : f32 to vector<8x256xf32>
    %225 = arith.select %223, %221, %224 : vector<8x256xi1>, vector<8x256xf32>
    %c3_179 = arith.constant 3 : index
    %c0_180 = arith.constant 0 : index
    %c0_181 = arith.constant 0 : index
    %226 = vector.load %arg2[%c3_179, %c0_180, %c0_181] : memref<9x8x8xf32, #tpu.memory_space<vmem>>, vector<1x8x8xf32>
    %227 = vector.shape_cast %226 : vector<1x8x8xf32> to vector<8x8xf32>
    %cst_182 = arith.constant dense<0.000000e+00> : vector<8x256xf32>
    %228 = tpu.matmul %227, %225, %cst_182 {dimension_numbers = #tpu.dot_dimension_numbers<[1], [0], [0], [1], [0, 0, 1, 1], [], []>, precision = #tpu.contract_precision<fp32>} : vector<8x8xf32>, vector<8x256xf32>, vector<8x256xf32> -> vector<8x256xf32>
    %229 = arith.addf %219, %228 : vector<8x256xf32>
    %c1_183 = arith.constant 1 : index
    %c0_184 = arith.constant 0 : index
    %c128_185 = arith.constant 128 : index
    %230 = vector.load %arg7[%c1_183, %c0_184, %c128_185] : memref<2x8x512xf32, #tpu.memory_space<vmem>>, vector<1x8x256xf32>
    %231 = vector.shape_cast %230 : vector<1x8x256xf32> to vector<8x256xf32>
    %c4_186 = arith.constant 4 : index
    %c0_187 = arith.constant 0 : index
    %c0_188 = arith.constant 0 : index
    %232 = vector.load %arg2[%c4_186, %c0_187, %c0_188] : memref<9x8x8xf32, #tpu.memory_space<vmem>>, vector<1x8x8xf32>
    %233 = vector.shape_cast %232 : vector<1x8x8xf32> to vector<8x8xf32>
    %cst_189 = arith.constant dense<0.000000e+00> : vector<8x256xf32>
    %234 = tpu.matmul %233, %231, %cst_189 {dimension_numbers = #tpu.dot_dimension_numbers<[1], [0], [0], [1], [0, 0, 1, 1], [], []>, precision = #tpu.contract_precision<fp32>} : vector<8x8xf32>, vector<8x256xf32>, vector<8x256xf32> -> vector<8x256xf32>
    %235 = arith.addf %229, %234 : vector<8x256xf32>
    %c1_190 = arith.constant 1 : index
    %c0_191 = arith.constant 0 : index
    %c129_192 = arith.constant 129 : index
    %236 = vector.load %arg7[%c1_190, %c0_191, %c129_192] : memref<2x8x512xf32, #tpu.memory_space<vmem>>, vector<1x8x256xf32>
    %237 = vector.shape_cast %236 : vector<1x8x256xf32> to vector<8x256xf32>
    %cst_193 = arith.constant 0.000000e+00 : f32
    %238 = vector.shape_cast %9 : vector<1x256xi1> to vector<1x256xi1>
    %239 = vector.broadcast %238 : vector<1x256xi1> to vector<8x256xi1>
    %240 = vector.broadcast %cst_193 : f32 to vector<8x256xf32>
    %241 = arith.select %239, %237, %240 : vector<8x256xi1>, vector<8x256xf32>
    %c5_194 = arith.constant 5 : index
    %c0_195 = arith.constant 0 : index
    %c0_196 = arith.constant 0 : index
    %242 = vector.load %arg2[%c5_194, %c0_195, %c0_196] : memref<9x8x8xf32, #tpu.memory_space<vmem>>, vector<1x8x8xf32>
    %243 = vector.shape_cast %242 : vector<1x8x8xf32> to vector<8x8xf32>
    %cst_197 = arith.constant dense<0.000000e+00> : vector<8x256xf32>
    %244 = tpu.matmul %243, %241, %cst_197 {dimension_numbers = #tpu.dot_dimension_numbers<[1], [0], [0], [1], [0, 0, 1, 1], [], []>, precision = #tpu.contract_precision<fp32>} : vector<8x8xf32>, vector<8x256xf32>, vector<8x256xf32> -> vector<8x256xf32>
    %245 = arith.addf %235, %244 : vector<8x256xf32>
    %c1_198 = arith.constant 1 : index
    %c0_199 = arith.constant 0 : index
    %c143_200 = arith.constant 143 : index
    %246 = vector.load %arg7[%c1_198, %c0_199, %c143_200] : memref<2x8x512xf32, #tpu.memory_space<vmem>>, vector<1x8x256xf32>
    %247 = vector.shape_cast %246 : vector<1x8x256xf32> to vector<8x256xf32>
    %cst_201 = arith.constant 0.000000e+00 : f32
    %248 = vector.shape_cast %7 : vector<1x256xi1> to vector<1x256xi1>
    %249 = vector.broadcast %248 : vector<1x256xi1> to vector<8x256xi1>
    %250 = vector.broadcast %cst_201 : f32 to vector<8x256xf32>
    %251 = arith.select %249, %247, %250 : vector<8x256xi1>, vector<8x256xf32>
    %c6_202 = arith.constant 6 : index
    %c0_203 = arith.constant 0 : index
    %c0_204 = arith.constant 0 : index
    %252 = vector.load %arg2[%c6_202, %c0_203, %c0_204] : memref<9x8x8xf32, #tpu.memory_space<vmem>>, vector<1x8x8xf32>
    %253 = vector.shape_cast %252 : vector<1x8x8xf32> to vector<8x8xf32>
    %cst_205 = arith.constant dense<0.000000e+00> : vector<8x256xf32>
    %254 = tpu.matmul %253, %251, %cst_205 {dimension_numbers = #tpu.dot_dimension_numbers<[1], [0], [0], [1], [0, 0, 1, 1], [], []>, precision = #tpu.contract_precision<fp32>} : vector<8x8xf32>, vector<8x256xf32>, vector<8x256xf32> -> vector<8x256xf32>
    %255 = arith.addf %245, %254 : vector<8x256xf32>
    %c1_206 = arith.constant 1 : index
    %c0_207 = arith.constant 0 : index
    %c144_208 = arith.constant 144 : index
    %256 = vector.load %arg7[%c1_206, %c0_207, %c144_208] : memref<2x8x512xf32, #tpu.memory_space<vmem>>, vector<1x8x256xf32>
    %257 = vector.shape_cast %256 : vector<1x8x256xf32> to vector<8x256xf32>
    %c7_209 = arith.constant 7 : index
    %c0_210 = arith.constant 0 : index
    %c0_211 = arith.constant 0 : index
    %258 = vector.load %arg2[%c7_209, %c0_210, %c0_211] : memref<9x8x8xf32, #tpu.memory_space<vmem>>, vector<1x8x8xf32>
    %259 = vector.shape_cast %258 : vector<1x8x8xf32> to vector<8x8xf32>
    %cst_212 = arith.constant dense<0.000000e+00> : vector<8x256xf32>
    %260 = tpu.matmul %259, %257, %cst_212 {dimension_numbers = #tpu.dot_dimension_numbers<[1], [0], [0], [1], [0, 0, 1, 1], [], []>, precision = #tpu.contract_precision<fp32>} : vector<8x8xf32>, vector<8x256xf32>, vector<8x256xf32> -> vector<8x256xf32>
    %261 = arith.addf %255, %260 : vector<8x256xf32>
    %c1_213 = arith.constant 1 : index
    %c0_214 = arith.constant 0 : index
    %c145_215 = arith.constant 145 : index
    %262 = vector.load %arg7[%c1_213, %c0_214, %c145_215] : memref<2x8x512xf32, #tpu.memory_space<vmem>>, vector<1x8x256xf32>
    %263 = vector.shape_cast %262 : vector<1x8x256xf32> to vector<8x256xf32>
    %cst_216 = arith.constant 0.000000e+00 : f32
    %264 = vector.shape_cast %9 : vector<1x256xi1> to vector<1x256xi1>
    %265 = vector.broadcast %264 : vector<1x256xi1> to vector<8x256xi1>
    %266 = vector.broadcast %cst_216 : f32 to vector<8x256xf32>
    %267 = arith.select %265, %263, %266 : vector<8x256xi1>, vector<8x256xf32>
    %c8_217 = arith.constant 8 : index
    %c0_218 = arith.constant 0 : index
    %c0_219 = arith.constant 0 : index
    %268 = vector.load %arg2[%c8_217, %c0_218, %c0_219] : memref<9x8x8xf32, #tpu.memory_space<vmem>>, vector<1x8x8xf32>
    %269 = vector.shape_cast %268 : vector<1x8x8xf32> to vector<8x8xf32>
    %cst_220 = arith.constant dense<0.000000e+00> : vector<8x256xf32>
    %270 = tpu.matmul %269, %267, %cst_220 {dimension_numbers = #tpu.dot_dimension_numbers<[1], [0], [0], [1], [0, 0, 1, 1], [], []>, precision = #tpu.contract_precision<fp32>} : vector<8x8xf32>, vector<8x256xf32>, vector<8x256xf32> -> vector<8x256xf32>
    %271 = arith.addf %261, %270 : vector<8x256xf32>
    %c0_221 = arith.constant 0 : index
    %c0_222 = arith.constant 0 : index
    %272 = vector.load %arg3[%c0_221, %c0_222] : memref<8x1xf32, #tpu.memory_space<vmem>>, vector<8x1xf32>
    %273 = vector.broadcast %272 : vector<8x1xf32> to vector<8x256xf32>
    %274 = arith.addf %271, %273 : vector<8x256xf32>
    %cst_223 = arith.constant 0.000000e+00 : f32
    %275 = vector.broadcast %cst_223 : f32 to vector<8x256xf32>
    %276 = arith.maximumf %274, %275 : vector<8x256xf32>
    %c1_224 = arith.constant 1 : index
    %c0_225 = arith.constant 0 : index
    %c128_226 = arith.constant 128 : index
    %277 = vector.load %arg7[%c1_224, %c0_225, %c128_226] : memref<2x8x512xf32, #tpu.memory_space<vmem>>, vector<1x8x256xf32>
    %278 = vector.shape_cast %277 : vector<1x8x256xf32> to vector<8x256xf32>
    %279 = vector.shape_cast %276 : vector<8x256xf32> to vector<1x8x256xf32>
    tpu.vector_store %arg7[%c1_224, %c0_225, %c128_226], %279 {strides = array<i32>} : memref<2x8x512xf32, #tpu.memory_space<vmem>>, vector<1x8x256xf32>,
    %cst_227 = arith.constant 0.000000e+00 : f32
    %280 = vector.broadcast %cst_227 : f32 to vector<8x256xf32>
    %c1_228 = arith.constant 1 : index
    %c0_229 = arith.constant 0 : index
    %c111_230 = arith.constant 111 : index
    %281 = vector.load %arg7[%c1_228, %c0_229, %c111_230] : memref<2x8x512xf32, #tpu.memory_space<vmem>>, vector<1x8x256xf32>
    %282 = vector.shape_cast %281 : vector<1x8x256xf32> to vector<8x256xf32>
    %cst_231 = arith.constant 0.000000e+00 : f32
    %283 = vector.shape_cast %7 : vector<1x256xi1> to vector<1x256xi1>
    %284 = vector.broadcast %283 : vector<1x256xi1> to vector<8x256xi1>
    %285 = vector.broadcast %cst_231 : f32 to vector<8x256xf32>
    %286 = arith.select %284, %282, %285 : vector<8x256xi1>, vector<8x256xf32>
    %c0_232 = arith.constant 0 : index
    %c0_233 = arith.constant 0 : index
    %c0_234 = arith.constant 0 : index
    %287 = vector.load %arg4[%c0_232, %c0_233, %c0_234] : memref<9x8x8xf32, #tpu.memory_space<vmem>>, vector<1x8x8xf32>
    %288 = vector.shape_cast %287 : vector<1x8x8xf32> to vector<8x8xf32>
    %cst_235 = arith.constant dense<0.000000e+00> : vector<8x256xf32>
    %289 = tpu.matmul %288, %286, %cst_235 {dimension_numbers = #tpu.dot_dimension_numbers<[1], [0], [0], [1], [0, 0, 1, 1], [], []>, precision = #tpu.contract_precision<fp32>} : vector<8x8xf32>, vector<8x256xf32>, vector<8x256xf32> -> vector<8x256xf32>
    %290 = arith.addf %280, %289 : vector<8x256xf32>
    %c1_236 = arith.constant 1 : index
    %c0_237 = arith.constant 0 : index
    %c112_238 = arith.constant 112 : index
    %291 = vector.load %arg7[%c1_236, %c0_237, %c112_238] : memref<2x8x512xf32, #tpu.memory_space<vmem>>, vector<1x8x256xf32>
    %292 = vector.shape_cast %291 : vector<1x8x256xf32> to vector<8x256xf32>
    %c1_239 = arith.constant 1 : index
    %c0_240 = arith.constant 0 : index
    %c0_241 = arith.constant 0 : index
    %293 = vector.load %arg4[%c1_239, %c0_240, %c0_241] : memref<9x8x8xf32, #tpu.memory_space<vmem>>, vector<1x8x8xf32>
    %294 = vector.shape_cast %293 : vector<1x8x8xf32> to vector<8x8xf32>
    %cst_242 = arith.constant dense<0.000000e+00> : vector<8x256xf32>
    %295 = tpu.matmul %294, %292, %cst_242 {dimension_numbers = #tpu.dot_dimension_numbers<[1], [0], [0], [1], [0, 0, 1, 1], [], []>, precision = #tpu.contract_precision<fp32>} : vector<8x8xf32>, vector<8x256xf32>, vector<8x256xf32> -> vector<8x256xf32>
    %296 = arith.addf %290, %295 : vector<8x256xf32>
    %c1_243 = arith.constant 1 : index
    %c0_244 = arith.constant 0 : index
    %c113_245 = arith.constant 113 : index
    %297 = vector.load %arg7[%c1_243, %c0_244, %c113_245] : memref<2x8x512xf32, #tpu.memory_space<vmem>>, vector<1x8x256xf32>
    %298 = vector.shape_cast %297 : vector<1x8x256xf32> to vector<8x256xf32>
    %cst_246 = arith.constant 0.000000e+00 : f32
    %299 = vector.shape_cast %9 : vector<1x256xi1> to vector<1x256xi1>
    %300 = vector.broadcast %299 : vector<1x256xi1> to vector<8x256xi1>
    %301 = vector.broadcast %cst_246 : f32 to vector<8x256xf32>
    %302 = arith.select %300, %298, %301 : vector<8x256xi1>, vector<8x256xf32>
    %c2_247 = arith.constant 2 : index
    %c0_248 = arith.constant 0 : index
    %c0_249 = arith.constant 0 : index
    %303 = vector.load %arg4[%c2_247, %c0_248, %c0_249] : memref<9x8x8xf32, #tpu.memory_space<vmem>>, vector<1x8x8xf32>
    %304 = vector.shape_cast %303 : vector<1x8x8xf32> to vector<8x8xf32>
    %cst_250 = arith.constant dense<0.000000e+00> : vector<8x256xf32>
    %305 = tpu.matmul %304, %302, %cst_250 {dimension_numbers = #tpu.dot_dimension_numbers<[1], [0], [0], [1], [0, 0, 1, 1], [], []>, precision = #tpu.contract_precision<fp32>} : vector<8x8xf32>, vector<8x256xf32>, vector<8x256xf32> -> vector<8x256xf32>
    %306 = arith.addf %296, %305 : vector<8x256xf32>
    %c1_251 = arith.constant 1 : index
    %c0_252 = arith.constant 0 : index
    %c127_253 = arith.constant 127 : index
    %307 = vector.load %arg7[%c1_251, %c0_252, %c127_253] : memref<2x8x512xf32, #tpu.memory_space<vmem>>, vector<1x8x256xf32>
    %308 = vector.shape_cast %307 : vector<1x8x256xf32> to vector<8x256xf32>
    %cst_254 = arith.constant 0.000000e+00 : f32
    %309 = vector.shape_cast %7 : vector<1x256xi1> to vector<1x256xi1>
    %310 = vector.broadcast %309 : vector<1x256xi1> to vector<8x256xi1>
    %311 = vector.broadcast %cst_254 : f32 to vector<8x256xf32>
    %312 = arith.select %310, %308, %311 : vector<8x256xi1>, vector<8x256xf32>
    %c3_255 = arith.constant 3 : index
    %c0_256 = arith.constant 0 : index
    %c0_257 = arith.constant 0 : index
    %313 = vector.load %arg4[%c3_255, %c0_256, %c0_257] : memref<9x8x8xf32, #tpu.memory_space<vmem>>, vector<1x8x8xf32>
    %314 = vector.shape_cast %313 : vector<1x8x8xf32> to vector<8x8xf32>
    %cst_258 = arith.constant dense<0.000000e+00> : vector<8x256xf32>
    %315 = tpu.matmul %314, %312, %cst_258 {dimension_numbers = #tpu.dot_dimension_numbers<[1], [0], [0], [1], [0, 0, 1, 1], [], []>, precision = #tpu.contract_precision<fp32>} : vector<8x8xf32>, vector<8x256xf32>, vector<8x256xf32> -> vector<8x256xf32>
    %316 = arith.addf %306, %315 : vector<8x256xf32>
    %c1_259 = arith.constant 1 : index
    %c0_260 = arith.constant 0 : index
    %c128_261 = arith.constant 128 : index
    %317 = vector.load %arg7[%c1_259, %c0_260, %c128_261] : memref<2x8x512xf32, #tpu.memory_space<vmem>>, vector<1x8x256xf32>
    %318 = vector.shape_cast %317 : vector<1x8x256xf32> to vector<8x256xf32>
    %c4_262 = arith.constant 4 : index
    %c0_263 = arith.constant 0 : index
    %c0_264 = arith.constant 0 : index
    %319 = vector.load %arg4[%c4_262, %c0_263, %c0_264] : memref<9x8x8xf32, #tpu.memory_space<vmem>>, vector<1x8x8xf32>
    %320 = vector.shape_cast %319 : vector<1x8x8xf32> to vector<8x8xf32>
    %cst_265 = arith.constant dense<0.000000e+00> : vector<8x256xf32>
    %321 = tpu.matmul %320, %318, %cst_265 {dimension_numbers = #tpu.dot_dimension_numbers<[1], [0], [0], [1], [0, 0, 1, 1], [], []>, precision = #tpu.contract_precision<fp32>} : vector<8x8xf32>, vector<8x256xf32>, vector<8x256xf32> -> vector<8x256xf32>
    %322 = arith.addf %316, %321 : vector<8x256xf32>
    %c1_266 = arith.constant 1 : index
    %c0_267 = arith.constant 0 : index
    %c129_268 = arith.constant 129 : index
    %323 = vector.load %arg7[%c1_266, %c0_267, %c129_268] : memref<2x8x512xf32, #tpu.memory_space<vmem>>, vector<1x8x256xf32>
    %324 = vector.shape_cast %323 : vector<1x8x256xf32> to vector<8x256xf32>
    %cst_269 = arith.constant 0.000000e+00 : f32
    %325 = vector.shape_cast %9 : vector<1x256xi1> to vector<1x256xi1>
    %326 = vector.broadcast %325 : vector<1x256xi1> to vector<8x256xi1>
    %327 = vector.broadcast %cst_269 : f32 to vector<8x256xf32>
    %328 = arith.select %326, %324, %327 : vector<8x256xi1>, vector<8x256xf32>
    %c5_270 = arith.constant 5 : index
    %c0_271 = arith.constant 0 : index
    %c0_272 = arith.constant 0 : index
    %329 = vector.load %arg4[%c5_270, %c0_271, %c0_272] : memref<9x8x8xf32, #tpu.memory_space<vmem>>, vector<1x8x8xf32>
    %330 = vector.shape_cast %329 : vector<1x8x8xf32> to vector<8x8xf32>
    %cst_273 = arith.constant dense<0.000000e+00> : vector<8x256xf32>
    %331 = tpu.matmul %330, %328, %cst_273 {dimension_numbers = #tpu.dot_dimension_numbers<[1], [0], [0], [1], [0, 0, 1, 1], [], []>, precision = #tpu.contract_precision<fp32>} : vector<8x8xf32>, vector<8x256xf32>, vector<8x256xf32> -> vector<8x256xf32>
    %332 = arith.addf %322, %331 : vector<8x256xf32>
    %c1_274 = arith.constant 1 : index
    %c0_275 = arith.constant 0 : index
    %c143_276 = arith.constant 143 : index
    %333 = vector.load %arg7[%c1_274, %c0_275, %c143_276] : memref<2x8x512xf32, #tpu.memory_space<vmem>>, vector<1x8x256xf32>
    %334 = vector.shape_cast %333 : vector<1x8x256xf32> to vector<8x256xf32>
    %cst_277 = arith.constant 0.000000e+00 : f32
    %335 = vector.shape_cast %7 : vector<1x256xi1> to vector<1x256xi1>
    %336 = vector.broadcast %335 : vector<1x256xi1> to vector<8x256xi1>
    %337 = vector.broadcast %cst_277 : f32 to vector<8x256xf32>
    %338 = arith.select %336, %334, %337 : vector<8x256xi1>, vector<8x256xf32>
    %c6_278 = arith.constant 6 : index
    %c0_279 = arith.constant 0 : index
    %c0_280 = arith.constant 0 : index
    %339 = vector.load %arg4[%c6_278, %c0_279, %c0_280] : memref<9x8x8xf32, #tpu.memory_space<vmem>>, vector<1x8x8xf32>
    %340 = vector.shape_cast %339 : vector<1x8x8xf32> to vector<8x8xf32>
    %cst_281 = arith.constant dense<0.000000e+00> : vector<8x256xf32>
    %341 = tpu.matmul %340, %338, %cst_281 {dimension_numbers = #tpu.dot_dimension_numbers<[1], [0], [0], [1], [0, 0, 1, 1], [], []>, precision = #tpu.contract_precision<fp32>} : vector<8x8xf32>, vector<8x256xf32>, vector<8x256xf32> -> vector<8x256xf32>
    %342 = arith.addf %332, %341 : vector<8x256xf32>
    %c1_282 = arith.constant 1 : index
    %c0_283 = arith.constant 0 : index
    %c144_284 = arith.constant 144 : index
    %343 = vector.load %arg7[%c1_282, %c0_283, %c144_284] : memref<2x8x512xf32, #tpu.memory_space<vmem>>, vector<1x8x256xf32>
    %344 = vector.shape_cast %343 : vector<1x8x256xf32> to vector<8x256xf32>
    %c7_285 = arith.constant 7 : index
    %c0_286 = arith.constant 0 : index
    %c0_287 = arith.constant 0 : index
    %345 = vector.load %arg4[%c7_285, %c0_286, %c0_287] : memref<9x8x8xf32, #tpu.memory_space<vmem>>, vector<1x8x8xf32>
    %346 = vector.shape_cast %345 : vector<1x8x8xf32> to vector<8x8xf32>
    %cst_288 = arith.constant dense<0.000000e+00> : vector<8x256xf32>
    %347 = tpu.matmul %346, %344, %cst_288 {dimension_numbers = #tpu.dot_dimension_numbers<[1], [0], [0], [1], [0, 0, 1, 1], [], []>, precision = #tpu.contract_precision<fp32>} : vector<8x8xf32>, vector<8x256xf32>, vector<8x256xf32> -> vector<8x256xf32>
    %348 = arith.addf %342, %347 : vector<8x256xf32>
    %c1_289 = arith.constant 1 : index
    %c0_290 = arith.constant 0 : index
    %c145_291 = arith.constant 145 : index
    %349 = vector.load %arg7[%c1_289, %c0_290, %c145_291] : memref<2x8x512xf32, #tpu.memory_space<vmem>>, vector<1x8x256xf32>
    %350 = vector.shape_cast %349 : vector<1x8x256xf32> to vector<8x256xf32>
    %cst_292 = arith.constant 0.000000e+00 : f32
    %351 = vector.shape_cast %9 : vector<1x256xi1> to vector<1x256xi1>
    %352 = vector.broadcast %351 : vector<1x256xi1> to vector<8x256xi1>
    %353 = vector.broadcast %cst_292 : f32 to vector<8x256xf32>
    %354 = arith.select %352, %350, %353 : vector<8x256xi1>, vector<8x256xf32>
    %c8_293 = arith.constant 8 : index
    %c0_294 = arith.constant 0 : index
    %c0_295 = arith.constant 0 : index
    %355 = vector.load %arg4[%c8_293, %c0_294, %c0_295] : memref<9x8x8xf32, #tpu.memory_space<vmem>>, vector<1x8x8xf32>
    %356 = vector.shape_cast %355 : vector<1x8x8xf32> to vector<8x8xf32>
    %cst_296 = arith.constant dense<0.000000e+00> : vector<8x256xf32>
    %357 = tpu.matmul %356, %354, %cst_296 {dimension_numbers = #tpu.dot_dimension_numbers<[1], [0], [0], [1], [0, 0, 1, 1], [], []>, precision = #tpu.contract_precision<fp32>} : vector<8x8xf32>, vector<8x256xf32>, vector<8x256xf32> -> vector<8x256xf32>
    %358 = arith.addf %348, %357 : vector<8x256xf32>
    %c0_297 = arith.constant 0 : index
    %c0_298 = arith.constant 0 : index
    %359 = vector.load %arg5[%c0_297, %c0_298] : memref<8x1xf32, #tpu.memory_space<vmem>>, vector<8x1xf32>
    %360 = vector.broadcast %359 : vector<8x1xf32> to vector<8x256xf32>
    %361 = arith.addf %358, %360 : vector<8x256xf32>
    %362 = arith.addf %361, %189 : vector<8x256xf32>
    %c1_299 = arith.constant 1 : index
    %c0_300 = arith.constant 0 : index
    %c0_301 = arith.constant 0 : index
    %363 = vector.load %arg6[%c1_299, %c0_300, %c0_301] : memref<2x8x256xf32, #tpu.memory_space<vmem>>, vector<1x8x256xf32>
    %364 = vector.shape_cast %363 : vector<1x8x256xf32> to vector<8x256xf32>
    %365 = vector.shape_cast %362 : vector<8x256xf32> to vector<1x8x256xf32>
    tpu.vector_store %arg6[%c1_299, %c0_300, %c0_301], %365 {strides = array<i32>} : memref<2x8x256xf32, #tpu.memory_space<vmem>>, vector<1x8x256xf32>,
    return
  }
  func.func @transform_0(%arg0: i32) -> (i32, i32, i32) {
    %c0_i32 = arith.constant 0 : i32
    %c0_i32_0 = arith.constant 0 : i32
    %c0_i32_1 = arith.constant 0 : i32
    return %arg0, %c0_i32, %c0_i32_0 : i32, i32, i32
  }
  func.func @transform_1(%arg0: i32) -> (i32, i32, i32) {
    %c0_i32 = arith.constant 0 : i32
    %c0_i32_0 = arith.constant 0 : i32
    %c0_i32_1 = arith.constant 0 : i32
    %c0_i32_2 = arith.constant 0 : i32
    return %c0_i32, %c0_i32_0, %c0_i32_1 : i32, i32, i32
  }
  func.func @transform_2(%arg0: i32) -> (i32, i32) {
    %c0_i32 = arith.constant 0 : i32
    %c0_i32_0 = arith.constant 0 : i32
    %c0_i32_1 = arith.constant 0 : i32
    return %c0_i32, %c0_i32_0 : i32, i32
  }
  func.func @transform_3(%arg0: i32) -> (i32, i32, i32) {
    %c0_i32 = arith.constant 0 : i32
    %c0_i32_0 = arith.constant 0 : i32
    %c0_i32_1 = arith.constant 0 : i32
    %c0_i32_2 = arith.constant 0 : i32
    return %c0_i32, %c0_i32_0, %c0_i32_1 : i32, i32, i32
  }
  func.func @transform_4(%arg0: i32) -> (i32, i32) {
    %c0_i32 = arith.constant 0 : i32
    %c0_i32_0 = arith.constant 0 : i32
    %c0_i32_1 = arith.constant 0 : i32
    return %c0_i32, %c0_i32_0 : i32, i32
  }
  func.func @transform_5(%arg0: i32) -> (i32, i32, i32) {
    %c0_i32 = arith.constant 0 : i32
    %c0_i32_0 = arith.constant 0 : i32
    %c0_i32_1 = arith.constant 0 : i32
    return %arg0, %c0_i32, %c0_i32_0 : i32, i32, i32
  }
}

</mosaic_0001>

<bundles_post_ra>
// kernel: residual_block_pallas.1
= control target key start
LH: loop header
LB: loop body
LE: loop exit
PB: predicated region body
PF: predicated region fallthrough
CT: control target
= control target key end

     0   :  { %v17961_v0 = vmov 0.0   ;;  %s17962_s18 = smov 16   ;;  %s17963_s23 = smov 17   ;;  %vm74_vm0 = vcmask 64512   ;;  %vm69_vm1 = vcmask 130048   ;;  %v24_v21 = vlaneseq  ;;  %s19355_s0 = inlined_call_operand.vmem [shape: f32[2,8,256], index: 0, kind: input, shape index: {}]   ;;  %s19356_s1 = inlined_call_operand.vmem [shape: f32[9,8,8], index: 1, kind: input, shape index: {}]   ;;  %s19357_s2 = inlined_call_operand.vmem [shape: f32[8,1], index: 2, kind: input, shape index: {}]   ;;  %s19358_s3 = inlined_call_operand.vmem [shape: f32[9,8,8], index: 3, kind: input, shape index: {}]   ;;  %s19359_s4 = inlined_call_operand.vmem [shape: f32[8,1], index: 4, kind: input, shape index: {}]   ;;  %s19360_s5 = inlined_call_operand.vmem [shape: f32[2,8,256], index: 5, kind: output, shape index: {}]  }
   0x1   :  { %63 = vrot.lane.b32.xlu1 %v17961_v0, %s17962_s18  ;;  %v18006_v1 = vld [vmem:[%s19355_s0] sm:$0xff]  ;;  %144 = vmatprep.mubr.f32.mxu0 %v17961_v0  ;;  %v18015_v2 = vld [vmem:[%s19355_s0 + $0x8] sm:$0xff]  ;;  %s17964_s24 = smov 15   ;;  %s17965_s25 = smov 1   ;;  %vm53_vm2 = vcmask 138240   ;;  %vm1021_vm5 = vcmask 121856  }
   0x2   :  { %65 = vrot.lane.b32.xlu0 %v18006_v1, %s17962_s18  ;;  %4513 = vmatprep.mubr.f32.mxu1 %v17961_v0  ;;  %v17485_v3 = vld [vmem:[%s19356_s1 + $0x8] sm:$0xff]  ;;  %s17966_s28 = smov 127   ;;  %v18063_v25 = vand.u32 127, %v24_v21  ;;  %v60_v37 = vld [vmem:[%s19356_s1] sm:$0xff]  ;;  %s17967_s6 = smov 113   ;;  %v17486_v63 = vld [vmem:[%s19356_s1 + $0x10] sm:$0xff] }
   0x3   :  { %v76_v4 = vsel %vm74_vm0, %v17485_v3, 0  ;;  %v544_v40 = vsel %vm74_vm0, %v60_v37, 0  ;;  %s17968_s9 = smov 112   ;;  %vm1506_vm8 = vcmask 7168   ;;  %s17969_s12 = smov 111   ;;  %vm2469_vm9 = vcmask 1039360  }
   0x4   :  { %v18045_v5 = vand.u32 4294901760, %v76_v4  ;;  %v18067_v27 = vadd.s32 128, %v18063_v25  ;;  %v27_v33 = vand.u32 15, %v18063_v25  ;;  %v18101_v43 = vand.u32 4294901760, %v544_v40 }
   0x5   :  { %49 = vrot.lane.b32.xlu1 %v18006_v1, %s17963_s23  ;;  %vm2954_vm10 = vcmask 924672   ;;  %vm3441_vm11 = vcmask 916480   ;;  %vm3922_vm12 = vcmask 908288  }
   0x6   :  { %67 = vrot.lane.b32.xlu0 %v18015_v2, %s17962_s18  ;;  %v18050_v6 = vsub.f32 %v76_v4, %v18045_v5  ;;  %v28_v28 = vand.u32 15, %v18067_v27  ;;  %vm18086_vm4 = vcmp.ne.s32.totalorder %v27_v33, 0  ;;  %v18107_v46 = vsub.f32 %v544_v40, %v18101_v43 }
   0x7   :  { %vm18137_vm7 = vcmp.ne.s32.totalorder %v27_v33, 15 }
   0x8   :  { %v18053_v7 = vand.u32 4294901760, %v18050_v6  ;;  %vm18072_vm3 = vcmp.ne.s32.totalorder %v28_v28, 0  ;;  %v18112_v49 = vand.u32 4294901760, %v18107_v46  ;;  %vm18126_vm6 = vcmp.ne.s32.totalorder %v28_v28, 15 }
   0x9   :  { %47 = vrot.lane.b32.xlu1 %v17961_v0, %s17963_s23 }
   0xa   :  { %51 = vrot.lane.b32.xlu0 %v18015_v2, %s17963_s23  ;;  %v148_v12 = vsub.f32 %v18050_v6, %v18053_v7  ;;  %v616_v52 = vsub.f32 %v18107_v46, %v18112_v49 }
   0xc   :  { %v18059_v17 = vand.u32 4294901760, %v148_v12  ;;  %v18118_v54 = vand.u32 4294901760, %v616_v52 }
   0xd   :  { %1019 = vrot.lane.b32.xlu1 %v18015_v2, %s17964_s24 }
   0xe   :  { %1017 = vrot.lane.b32.xlu0 %v18006_v1, %s17964_s24 }
  0x11   :  { %1502 = vrot.lane.b32.xlu1 %v18006_v1, %s17965_s25 }
  0x12   :  { %1015 = vrot.lane.b32.xlu0 %v17961_v0, %s17964_s24 }
  0x15   :  { %1500 = vrot.lane.b32.xlu1 %v17961_v0, %s17965_s25 }
  0x16   :  { %1504 = vrot.lane.b32.xlu0 %v18015_v2, %s17965_s25 }
  0x19   :  { %2467 = vrot.lane.b32.xlu1 %v17961_v0, %s17966_s28 }
  0x1a   :  { %2465 = vrot.lane.b32.xlu0 %v18015_v2, %s17966_s28 }
  0x1d   :  { %2950 = vrot.lane.b32.xlu1 %v18015_v2, %s17967_s6 }
  0x1e   :  { %2463 = vrot.lane.b32.xlu0 %v18006_v1, %s17966_s28 }
  0x21   :  { %2948 = vrot.lane.b32.xlu1 %v18006_v1, %s17967_s6 }
  0x22   :  { %2952 = vrot.lane.b32.xlu0 %v17961_v0, %s17967_s6 }
  0x25   :  { %3439 = vrot.lane.b32.xlu1 %v17961_v0, %s17968_s9 }
  0x26   :  { %3437 = vrot.lane.b32.xlu0 %v18015_v2, %s17968_s9 }
  0x29   :  { %3918 = vrot.lane.b32.xlu1 %v18015_v2, %s17969_s12 }
  0x2a   :  { %3435 = vrot.lane.b32.xlu0 %v18006_v1, %s17968_s9 }
  0x2d   :  { %3916 = vrot.lane.b32.xlu1 %v18006_v1, %s17969_s12 }
  0x2e   :  { %3920 = vrot.lane.b32.xlu0 %v17961_v0, %s17969_s12 }
  0x73   :  { %v64_v8 = vpop.permute.xlu1 %63 }
  0x74   :  { %v66_v9 = vpop.permute.xlu0 %65 }
  0x75   :  { %v70_v10 = vsel %vm69_vm1, %v64_v8, %v66_v9  ;;  %v1031_v8 = vsel %vm74_vm0, %v17486_v63, 0 }
  0x76   :  { %v80_v11 = vand.u32 4294901760, %v70_v10 }
  0x77   :  { %v50_v30 = vpop.permute.xlu1 %49 }
  0x78   :  { %v163_v13 = vsub.f32 %v70_v10, %v80_v11  ;;  %v68_v14 = vpop.permute.xlu0 %67 }
  0x79   :  { %v71_v15 = vsel %vm69_vm1, %v66_v9, %v68_v14 }
  0x7a   :  { %v78_v16 = vand.u32 4294901760, %v71_v15  ;;  %v164_v18 = vand.u32 4294901760, %v163_v13 }
  0x7b   :  { %v48_v35 = vpop.permute.xlu1 %47 }
  0x7c   :  { %v157_v19 = vsub.f32 %v71_v15, %v78_v16  ;;  %79 = vmatprep.subr.mxu0 %v78_v16  ;;  %v165_v22 = vsub.f32 %v163_v13, %v164_v18  ;;  %v52_v29 = vpop.permute.xlu0 %51  ;;  %v54_v39 = vsel %vm53_vm2, %v48_v35, %v50_v30 }
  0x7d   :  { %81 = vmatpush1.msra.mxu0 %v80_v11  ;;  %v55_v32 = vsel %vm53_vm2, %v50_v30, %v52_v29  ;;  %v58_v41 = vsel %vm18086_vm4, %v54_v39, 0.0 }
  0x7e   :  { %150 = vmatmul.mubr.f32.vlgmr.msra.gmra.mrb[0].mxu0 %v18059_v17  ;;  %v158_v20 = vand.u32 4294901760, %v157_v19  ;;  %v166_v26 = vand.u32 4294901760, %v165_v22  ;;  %v59_v34 = vsel %vm18072_vm3, %v55_v32, 0.0  ;;  %v548_v44 = vand.u32 4294901760, %v58_v41  ;;  %v17487_v32 = vld [vmem:[%s19356_s1 + $0x18] sm:$0xff] }
  0x7f   :  { %230 = vmatprep.mubr.f32.mxu0 %v17961_v0  ;;  %v18081_v36 = vand.u32 4294901760, %v59_v34  ;;  %v1020_v56 = vpop.permute.xlu1 %1019 }
  0x80   :  { %v159_v23 = vsub.f32 %v157_v19, %v158_v20  ;;  %v631_v47 = vsub.f32 %v58_v41, %v548_v44  ;;  %v1018_v57 = vpop.permute.xlu0 %1017 }
  0x81   :  { %v625_v42 = vsub.f32 %v59_v34, %v18081_v36  ;;  %v1023_v59 = vsel %vm1021_vm5, %v1018_v57, %v1020_v56  ;;  %v1516_v34 = vsel %vm74_vm0, %v17487_v32, 0  ;;  %v17488_v56 = vld [vmem:[%s19356_s1 + $0x20] sm:$0xff] }
  0x82   :  { %v160_v24 = vand.u32 4294901760, %v159_v23  ;;  %v632_v50 = vand.u32 4294901760, %v631_v47  ;;  %v1027_v60 = vsel %vm18126_vm6, %v1023_v59, 0.0  ;;  %v18192_v37 = vand.u32 4294901760, %v1516_v34 }
  0x83   :  { %v626_v45 = vand.u32 4294901760, %v625_v42  ;;  %v1033_v62 = vand.u32 4294901760, %v1027_v60 }
  0x84   :  { %161 = vmatprep.subr.mxu0 %v160_v24  ;;  %v633_v53 = vsub.f32 %v631_v47, %v632_v50  ;;  %v1016_v61 = vpop.permute.xlu0 %1015  ;;  %v18198_v41 = vsub.f32 %v1516_v34, %v18192_v37 }
  0x85   :  { %167 = vmatpush1.msra.mxu0 %v166_v26  ;;  %v627_v48 = vsub.f32 %v625_v42, %v626_v45  ;;  %v1022_v4 = vsel %vm1021_vm5, %v1016_v61, %v1018_v57  ;;  %v1112_v9 = vsub.f32 %v1027_v60, %v1033_v62  ;;  %v1503_v26 = vpop.permute.xlu1 %1502  ;;  %v1988_v57 = vsel %vm74_vm0, %v17488_v56, 0 }
  0x86   :  { %232 = vmatmul.mubr.f32.vlgmr.msra.gmra.mrb[0].mxu0 %v18045_v5  ;;  %240 = vmatprep.subr.mxu0 %v157_v19  ;;  %v634_v55 = vand.u32 4294901760, %v633_v53  ;;  %v1026_v10 = vsel %vm18137_vm7, %v1022_v4, 0.0  ;;  %v18227_v60 = vand.u32 4294901760, %v1988_v57  ;;  %v18230_v61 = vand.u32 4294901760, %v18006_v1 }
  0x87   :  { %243 = vmatpush1.msra.mxu0 %v163_v13  ;;  %306 = vmatprep.mubr.f32.mxu0 %v17961_v0  ;;  %v628_v51 = vand.u32 4294901760, %v627_v48  ;;  %v1035_v12 = vand.u32 4294901760, %v1026_v10  ;;  %v1113_v13 = vand.u32 4294901760, %v1112_v9 }
  0x88   :  { %316 = vmatprep.subr.mxu0 %v78_v16  ;;  %v1505_v25 = vpop.permute.xlu0 %1504  ;;  %v18234_v63 = vsub.f32 %v1988_v57, %v18227_v60  ;;  %v2075_v4 = vsub.f32 %v18006_v1, %v18230_v61  ;;  %v18251_v1 = vld [vmem:[%s19355_s0 + $0x10] sm:$0xff] }
  0x89   :  { %v1118_v15 = vsub.f32 %v1026_v10, %v1035_v12  ;;  %v1508_v27 = vsel %vm1506_vm8, %v1503_v26, %v1505_v25  ;;  %v1501_v29 = vpop.permute.xlu1 %1500  ;;  %8800 = vrot.lane.b32.xlu0 %v18251_v1, %s17962_s18 }
  0x8a   :  { %v1512_v28 = vsel %vm18072_vm3, %v1508_v27, 0.0  ;;  %v1507_v33 = vsel %vm1506_vm8, %v1501_v29, %v1503_v26  ;;  %v17489_v27 = vld [vmem:[%s19356_s1 + $0x28] sm:$0xff] }
  0x8b   :  { %v1119_v19 = vand.u32 4294901760, %v1118_v15  ;;  %v1518_v30 = vand.u32 4294901760, %v1512_v28  ;;  %v1511_v35 = vsel %vm18086_vm4, %v1507_v33, 0.0  ;;  %v2479_v29 = vsel %vm74_vm0, %v17489_v27, 0 }
  0x8c   :  { %v1520_v39 = vand.u32 4294901760, %v1511_v35  ;;  %v18307_v33 = vand.u32 4294901760, %v2479_v29 }
  0x8d   :  { %v1120_v22 = vsub.f32 %v1118_v15, %v1119_v19  ;;  %8798 = vrot.lane.b32.xlu0 %v17961_v0, %s17962_s18 }
  0x8e   :  { %309 = vmatmul.mubr.f32.vlgmr.msra.gmra.mrb[0].mxu0 %v18050_v6 }
  0x8f   :  { %318 = vmatpush1.msra.mxu0 %v80_v11  ;;  %381 = vmatprep.mubr.f32.mxu0 %v17961_v0  ;;  %v1121_v24 = vand.u32 4294901760, %v1120_v22 }
  0x90   :  { %394 = vmatprep.subr.mxu0 %v158_v20 }
  0x96   :  { %385 = vmatmul.mubr.f32.vlgmr.msra.gmra.mrb[0].mxu0 %v18053_v7 }
  0x97   :  { %398 = vmatpush1.msra.mxu0 %v164_v18  ;;  %461 = vmatprep.mubr.f32.mxu0 %v17961_v0 }
  0x98   :  { %470 = vmatprep.subr.mxu0 %v78_v16  ;;  %v1114_v16 = vsub.f32 %v1112_v9, %v1113_v13 }
  0x9a   :  { %v1115_v20 = vand.u32 4294901760, %v1114_v16 }
  0x9e   :  { %463 = vmatmul.mubr.f32.vlgmr.msra.gmra.mrb[0].mxu0 %v18045_v5 }
  0x9f   :  { %472 = vmatpush1.msra.mxu0 %v80_v11  ;;  %535 = vmatprep.mubr.f32.mxu0 %v17961_v0  ;;  %v18152_v11 = vand.u32 4294901760, %v1031_v8 }
  0xa0   :  { %547 = vmatprep.subr.mxu0 %v18081_v36 }
  0xa1   :  { %v18158_v14 = vsub.f32 %v1031_v8, %v18152_v11  ;;  %v18241_v8 = vand.u32 4294901760, %v18234_v63 }
  0xa3   :  { %v18162_v18 = vand.u32 4294901760, %v18158_v14 }
  0xa5   :  { %v1103_v21 = vsub.f32 %v18158_v14, %v18162_v18 }
  0xa6   :  { %537 = vmatmul.mubr.f32.vlgmr.msra.gmra.mrb[0].mxu0 %v18045_v5 }
  0xa7   :  { %549 = vmatpush1.msra.mxu0 %v548_v44  ;;  %612 = vmatprep.mubr.f32.mxu0 %v17961_v0  ;;  %v18168_v23 = vand.u32 4294901760, %v1103_v21  ;;  %v2466_v21 = vpop.permute.xlu0 %2465 }
  0xa8   :  { %629 = vmatprep.subr.mxu0 %v628_v51 }
  0xab   :  { %v2464_v25 = vpop.permute.xlu0 %2463 }
  0xae   :  { %618 = vmatmul.mubr.f32.vlgmr.msra.gmra.mrb[0].mxu0 %v18118_v54 }
  0xaf   :  { %635 = vmatpush1.msra.mxu0 %v634_v55  ;;  %698 = vmatprep.mubr.f32.mxu0 %v17961_v0  ;;  %v18217_v55 = vand.u32 4294901760, %v18015_v2 }
  0xb0   :  { %708 = vmatprep.subr.mxu0 %v625_v42  ;;  %v1603_v42 = vsub.f32 %v1511_v35, %v1520_v39 }
  0xb1   :  { %v2069_v59 = vsub.f32 %v18015_v2, %v18217_v55 }
  0xb6   :  { %700 = vmatmul.mubr.f32.vlgmr.msra.gmra.mrb[0].mxu0 %v18101_v43 }
  0xb7   :  { %711 = vmatpush1.msra.mxu0 %v631_v47  ;;  %774 = vmatprep.mubr.f32.mxu0 %v17961_v0  ;;  %v1604_v47 = vand.u32 4294901760, %v1603_v42 }
  0xb8   :  { %784 = vmatprep.subr.mxu0 %v18081_v36 }
  0xb9   :  { %v1605_v51 = vsub.f32 %v1603_v42, %v1604_v47 }
  0xbb   :  { %v1606_v53 = vand.u32 4294901760, %v1605_v51 }
  0xbe   :  { %777 = vmatmul.mubr.f32.vlgmr.msra.gmra.mrb[0].mxu0 %v18107_v46 }
  0xbf   :  { %786 = vmatpush1.msra.mxu0 %v548_v44  ;;  %849 = vmatprep.mubr.f32.mxu0 %v17961_v0 }
  0xc0   :  { %862 = vmatprep.subr.mxu0 %v626_v45  ;;  %v18202_v45 = vand.u32 4294901760, %v18198_v41 }
  0xc6   :  { %853 = vmatmul.mubr.f32.vlgmr.msra.gmra.mrb[0].mxu0 %v18112_v49 }
  0xc7   :  { %866 = vmatpush1.msra.mxu0 %v632_v50  ;;  %929 = vmatprep.mubr.f32.mxu0 %v17961_v0  ;;  %v1588_v50 = vsub.f32 %v18198_v41, %v18202_v45 }
  0xc8   :  { %938 = vmatprep.subr.mxu0 %v18081_v36  ;;  %v1597_v36 = vsub.f32 %v1512_v28, %v1518_v30  ;;  %v2470_v28 = vsel %vm2469_vm9, %v2464_v25, %v2466_v21 }
  0xc9   :  { %v18208_v52 = vand.u32 4294901760, %v1588_v50  ;;  %v2474_v32 = vsel %vm18137_vm7, %v2470_v28, 0.0 }
  0xca   :  { %v1598_v40 = vand.u32 4294901760, %v1597_v36  ;;  %v2483_v34 = vand.u32 4294901760, %v2474_v32 }
  0xce   :  { %931 = vmatmul.mubr.f32.vlgmr.msra.gmra.mrb[0].mxu0 %v18101_v43 }
  0xcf   :  { %940 = vmatpush1.msra.mxu0 %v548_v44  ;;  %1003 = vmatprep.mubr.f32.mxu0 %v17961_v0  ;;  %v1599_v44 = vsub.f32 %v1597_v36, %v1598_v40 }
  0xd0   :  { %1034 = vmatprep.subr.mxu0 %v1033_v62 }
  0xd1   :  { %v1600_v48 = vand.u32 4294901760, %v1599_v44 }
  0xd6   :  { %1005 = vmatmul.mubr.f32.vlgmr.msra.gmra.mrb[0].mxu0 %v18101_v43 }
  0xd7   :  { %1036 = vmatpush1.msra.mxu0 %v1035_v12  ;;  %1099 = vmatprep.mubr.f32.mxu0 %v17961_v0 }
  0xd8   :  { %1116 = vmatprep.subr.mxu0 %v1115_v20  ;;  %v2468_v20 = vpop.permute.xlu1 %2467 }
  0xd9   :  { %v2471_v22 = vsel %vm2469_vm9, %v2466_v21, %v2468_v20 }
  0xdc   :  { %v2951_v56 = vpop.permute.xlu1 %2950 }
  0xde   :  { %1105 = vmatmul.mubr.f32.vlgmr.msra.gmra.mrb[0].mxu0 %v18168_v23 }
  0xdf   :  { %1122 = vmatpush1.msra.mxu0 %v1121_v24  ;;  %1185 = vmatprep.mubr.f32.mxu0 %v17961_v0  ;;  %v2475_v24 = vsel %vm18126_vm6, %v2471_v22, 0.0 }
  0xe0   :  { %1195 = vmatprep.subr.mxu0 %v1112_v9  ;;  %v2076_v9 = vand.u32 4294901760, %v2075_v4  ;;  %v2481_v26 = vand.u32 4294901760, %v2475_v24 }
  0xe6   :  { %1187 = vmatmul.mubr.f32.vlgmr.msra.gmra.mrb[0].mxu0 %v18152_v11 }
  0xe7   :  { %1198 = vmatpush1.msra.mxu0 %v1118_v15  ;;  %1261 = vmatprep.mubr.f32.mxu0 %v17961_v0 }
  0xe8   :  { %1271 = vmatprep.subr.mxu0 %v1033_v62 }
  0xee   :  { %1264 = vmatmul.mubr.f32.vlgmr.msra.gmra.mrb[0].mxu0 %v18158_v14 }
  0xef   :  { %1273 = vmatpush1.msra.mxu0 %v1035_v12  ;;  %1336 = vmatprep.mubr.f32.mxu0 %v17961_v0 }
  0xf0   :  { %1349 = vmatprep.subr.mxu0 %v1113_v13  ;;  %v2077_v13 = vsub.f32 %v2075_v4, %v2076_v9 }
  0xf2   :  { %v2078_v16 = vand.u32 4294901760, %v2077_v13 }
  0xf6   :  { %1340 = vmatmul.mubr.f32.vlgmr.msra.gmra.mrb[0].mxu0 %v18162_v18 }
  0xf7   :  { %1353 = vmatpush1.msra.mxu0 %v1119_v19  ;;  %1416 = vmatprep.mubr.f32.mxu0 %v17961_v0  ;;  %v18264_v19 = vld [vmem:[%s19355_s0 + $0x18] sm:$0xff] }
  0xf8   :  { %1425 = vmatprep.subr.mxu0 %v1033_v62  ;;  %v2070_v62 = vand.u32 4294901760, %v2069_v59  ;;  %8802 = vrot.lane.b32.xlu1 %v18264_v19, %s17962_s18 }
  0xf9   :  { %8788 = vrot.lane.b32.xlu0 %v18264_v19, %s17963_s23 }
  0xfa   :  { %v2071_v2 = vsub.f32 %v2069_v59, %v2070_v62 }
  0xfc   :  { %v2072_v10 = vand.u32 4294901760, %v2071_v2  ;;  %8786 = vrot.lane.b32.xlu1 %v18251_v1, %s17963_s23 }
  0xfd   :  { %9746 = vrot.lane.b32.xlu0 %v18251_v1, %s17964_s24 }
  0xfe   :  { %1418 = vmatmul.mubr.f32.vlgmr.msra.gmra.mrb[0].mxu0 %v18152_v11 }
  0xff   :  { %1427 = vmatpush1.msra.mxu0 %v1035_v12  ;;  %1490 = vmatprep.mubr.f32.mxu0 %v17961_v0  ;;  %v2060_v12 = vsub.f32 %v18234_v63, %v18241_v8 }
 0x100   :  { %1519 = vmatprep.subr.mxu0 %v1518_v30  ;;  %8784 = vrot.lane.b32.xlu1 %v17961_v0, %s17963_s23 }
 0x101   :  { %v18255_v15 = vand.u32 4294901760, %v2060_v12  ;;  %9744 = vrot.lane.b32.xlu0 %v17961_v0, %s17964_s24 }
 0x104   :  { %9748 = vrot.lane.b32.xlu1 %v18264_v19, %s17964_s24 }
 0x105   :  { %10231 = vrot.lane.b32.xlu0 %v18264_v19, %s17965_s25 }
 0x106   :  { %1492 = vmatmul.mubr.f32.vlgmr.msra.gmra.mrb[0].mxu0 %v18152_v11 }
 0x107   :  { %1521 = vmatpush1.msra.mxu0 %v1520_v39  ;;  %1584 = vmatprep.mubr.f32.mxu0 %v17961_v0 }
 0x108   :  { %1601 = vmatprep.subr.mxu0 %v1600_v48  ;;  %10229 = vrot.lane.b32.xlu1 %v18251_v1, %s17965_s25 }
 0x10c   :  { %10227 = vrot.lane.b32.xlu1 %v17961_v0, %s17965_s25 }
 0x10e   :  { %1590 = vmatmul.mubr.f32.vlgmr.msra.gmra.mrb[0].mxu0 %v18208_v52 }
 0x10f   :  { %1607 = vmatpush1.msra.mxu0 %v1606_v53  ;;  %1670 = vmatprep.mubr.f32.mxu0 %v17961_v0 }
 0x110   :  { %1680 = vmatprep.subr.mxu0 %v1597_v36  ;;  %11189 = vrot.lane.b32.xlu1 %v18264_v19, %s17966_s28  ;;  %v18313_v36 = vsub.f32 %v2479_v29, %v18307_v33 }
 0x114   :  { %11191 = vrot.lane.b32.xlu1 %v17961_v0, %s17966_s28 }
 0x116   :  { %1672 = vmatmul.mubr.f32.vlgmr.msra.gmra.mrb[0].mxu0 %v18192_v37 }
 0x117   :  { %1683 = vmatpush1.msra.mxu0 %v1603_v42  ;;  %1746 = vmatprep.mubr.f32.mxu0 %v17961_v0  ;;  %v18318_v42 = vand.u32 4294901760, %v18313_v36 }
 0x118   :  { %1756 = vmatprep.subr.mxu0 %v1518_v30 }
 0x119   :  { %v2551_v48 = vsub.f32 %v18313_v36, %v18318_v42 }
 0x11b   :  { %v18324_v51 = vand.u32 4294901760, %v2551_v48 }
 0x11e   :  { %1749 = vmatmul.mubr.f32.vlgmr.msra.gmra.mrb[0].mxu0 %v18198_v41 }
 0x11f   :  { %1758 = vmatpush1.msra.mxu0 %v1520_v39  ;;  %1821 = vmatprep.mubr.f32.mxu0 %v17961_v0 }
 0x120   :  { %1834 = vmatprep.subr.mxu0 %v1598_v40 }
 0x126   :  { %1825 = vmatmul.mubr.f32.vlgmr.msra.gmra.mrb[0].mxu0 %v18202_v45 }
 0x127   :  { %1838 = vmatpush1.msra.mxu0 %v1604_v47  ;;  %1901 = vmatprep.mubr.f32.mxu0 %v17961_v0 }
 0x128   :  { %1910 = vmatprep.subr.mxu0 %v1518_v30  ;;  %v2560_v30 = vsub.f32 %v2475_v24, %v2481_v26 }
 0x12a   :  { %v2561_v35 = vand.u32 4294901760, %v2560_v30 }
 0x12c   :  { %v2562_v40 = vsub.f32 %v2560_v30, %v2561_v35 }
 0x12e   :  { %1903 = vmatmul.mubr.f32.vlgmr.msra.gmra.mrb[0].mxu0 %v18192_v37  ;;  %v2563_v47 = vand.u32 4294901760, %v2562_v40 }
 0x12f   :  { %1912 = vmatpush1.msra.mxu0 %v1520_v39  ;;  %1975 = vmatprep.mubr.f32.mxu0 %v17961_v0  ;;  %v2566_v39 = vsub.f32 %v2474_v32, %v2483_v34 }
 0x130   :  { %1991 = vmatprep.subr.mxu0 %v18217_v55 }
 0x131   :  { %v2567_v44 = vand.u32 4294901760, %v2566_v39 }
 0x133   :  { %v2568_v50 = vsub.f32 %v2566_v39, %v2567_v44 }
 0x135   :  { %v2569_v53 = vand.u32 4294901760, %v2568_v50 }
 0x136   :  { %1977 = vmatmul.mubr.f32.vlgmr.msra.gmra.mrb[0].mxu0 %v18192_v37 }
 0x137   :  { %1993 = vmatpush1.msra.mxu0 %v18230_v61  ;;  %2056 = vmatprep.mubr.f32.mxu0 %v17961_v0 }
 0x138   :  { %2073 = vmatprep.subr.mxu0 %v2072_v10 }
 0x13e   :  { %2062 = vmatmul.mubr.f32.vlgmr.msra.gmra.mrb[0].mxu0 %v18255_v15 }
 0x13f   :  { %2079 = vmatpush1.msra.mxu0 %v2078_v16  ;;  %2142 = vmatprep.mubr.f32.mxu0 %v17961_v0 }
 0x140   :  { %2152 = vmatprep.subr.mxu0 %v2069_v59 }
 0x146   :  { %2144 = vmatmul.mubr.f32.vlgmr.msra.gmra.mrb[0].mxu0 %v18227_v60 }
 0x147   :  { %2155 = vmatpush1.msra.mxu0 %v2075_v4  ;;  %2218 = vmatprep.mubr.f32.mxu0 %v17961_v0  ;;  %v17490_v4 = vld [vmem:[%s19356_s1 + $0x30] sm:$0xff] }
 0x148   :  { %2228 = vmatprep.subr.mxu0 %v18217_v55 }
 0x14e   :  { %2221 = vmatmul.mubr.f32.vlgmr.msra.gmra.mrb[0].mxu0 %v18234_v63 }
 0x14f   :  { %2230 = vmatpush1.msra.mxu0 %v18230_v61  ;;  %2293 = vmatprep.mubr.f32.mxu0 %v17961_v0 }
 0x150   :  { %2306 = vmatprep.subr.mxu0 %v2070_v62 }
 0x156   :  { %2297 = vmatmul.mubr.f32.vlgmr.msra.gmra.mrb[0].mxu0 %v18241_v8 }
 0x157   :  { %2310 = vmatpush1.msra.mxu0 %v2076_v9  ;;  %2373 = vmatprep.mubr.f32.mxu0 %v17961_v0  ;;  %v2964_v9 = vsel %vm74_vm0, %v17490_v4, 0 }
 0x158   :  { %2382 = vmatprep.subr.mxu0 %v18217_v55  ;;  %v2953_v55 = vpop.permute.xlu0 %2952  ;;  %v3033_v13 = vand.u32 4294901760, %v2964_v9 }
 0x159   :  { %v2956_v57 = vsel %vm2954_vm10, %v2951_v56, %v2953_v55 }
 0x15a   :  { %v2960_v59 = vsel %vm18072_vm3, %v2956_v57, 0.0  ;;  %v3034_v21 = vsub.f32 %v2964_v9, %v3033_v13 }
 0x15b   :  { %v2966_v62 = vand.u32 4294901760, %v2960_v59 }
 0x15c   :  { %v3035_v25 = vand.u32 4294901760, %v3034_v21 }
 0x15d   :  { %v3045_v12 = vsub.f32 %v2960_v59, %v2966_v62 }
 0x15e   :  { %2375 = vmatmul.mubr.f32.vlgmr.msra.gmra.mrb[0].mxu0 %v18227_v60 }
 0x15f   :  { %2384 = vmatpush1.msra.mxu0 %v18230_v61  ;;  %2447 = vmatprep.mubr.f32.mxu0 %v17961_v0  ;;  %v2949_v61 = vpop.permute.xlu1 %2948  ;;  %v3046_v20 = vand.u32 4294901760, %v3045_v12 }
 0x160   :  { %2482 = vmatprep.subr.mxu0 %v2481_v26  ;;  %v2955_v2 = vsel %vm2954_vm10, %v2949_v61, %v2951_v56 }
 0x161   :  { %v2959_v10 = vsel %vm18086_vm4, %v2955_v2, 0.0  ;;  %v3047_v24 = vsub.f32 %v3045_v12, %v3046_v20 }
 0x162   :  { %v2968_v16 = vand.u32 4294901760, %v2959_v10 }
 0x163   :  { %v3048_v28 = vand.u32 4294901760, %v3047_v24 }
 0x164   :  { %v3051_v22 = vsub.f32 %v2959_v10, %v2968_v16 }
 0x166   :  { %2449 = vmatmul.mubr.f32.vlgmr.msra.gmra.mrb[0].mxu0 %v18227_v60  ;;  %v3052_v27 = vand.u32 4294901760, %v3051_v22 }
 0x167   :  { %2484 = vmatpush1.msra.mxu0 %v2483_v34  ;;  %2547 = vmatprep.mubr.f32.mxu0 %v17961_v0 }
 0x168   :  { %2564 = vmatprep.subr.mxu0 %v2563_v47  ;;  %v3053_v29 = vsub.f32 %v3051_v22, %v3052_v27 }
 0x16a   :  { %v3054_v32 = vand.u32 4294901760, %v3053_v29 }
 0x16e   :  { %2553 = vmatmul.mubr.f32.vlgmr.msra.gmra.mrb[0].mxu0 %v18324_v51 }
 0x16f   :  { %2570 = vmatpush1.msra.mxu0 %v2569_v53  ;;  %2633 = vmatprep.mubr.f32.mxu0 %v17961_v0 }
 0x170   :  { %2643 = vmatprep.subr.mxu0 %v2560_v30 }
 0x176   :  { %2635 = vmatmul.mubr.f32.vlgmr.msra.gmra.mrb[0].mxu0 %v18307_v33 }
 0x177   :  { %2646 = vmatpush1.msra.mxu0 %v2566_v39  ;;  %2709 = vmatprep.mubr.f32.mxu0 %v17961_v0 }
 0x178   :  { %2719 = vmatprep.subr.mxu0 %v2481_v26 }
 0x17e   :  { %2712 = vmatmul.mubr.f32.vlgmr.msra.gmra.mrb[0].mxu0 %v18313_v36 }
 0x17f   :  { %2721 = vmatpush1.msra.mxu0 %v2483_v34  ;;  %2784 = vmatprep.mubr.f32.mxu0 %v17961_v0 }
 0x180   :  { %2797 = vmatprep.subr.mxu0 %v2561_v35  ;;  %v3438_v35 = vpop.permute.xlu0 %3437 }
 0x184   :  { %v3436_v47 = vpop.permute.xlu0 %3435 }
 0x185   :  { %v3442_v53 = vsel %vm3441_vm11, %v3436_v47, %v3438_v35 }
 0x186   :  { %2788 = vmatmul.mubr.f32.vlgmr.msra.gmra.mrb[0].mxu0 %v18318_v42  ;;  %v3451_v56 = vand.u32 4294901760, %v3442_v53 }
 0x187   :  { %2801 = vmatpush1.msra.mxu0 %v2567_v44  ;;  %2864 = vmatprep.mubr.f32.mxu0 %v17961_v0  ;;  %v17491_v44 = vld [vmem:[%s19356_s1 + $0x38] sm:$0xff] }
 0x188   :  { %2873 = vmatprep.subr.mxu0 %v2481_v26  ;;  %v3036_v26 = vsub.f32 %v3034_v21, %v3035_v25  ;;  %v3447_v48 = vsel %vm74_vm0, %v17491_v44, 0  ;;  %v3534_v61 = vsub.f32 %v3442_v53, %v3451_v56  ;;  %v18381_v44 = vld [vmem:[%s19357_s2] sm:$0xff] }
 0x189   :  { %v18358_v55 = vand.u32 4294901760, %v3447_v48 }
 0x18a   :  { %v3037_v30 = vand.u32 4294901760, %v3036_v26  ;;  %v3535_v9 = vand.u32 4294901760, %v3534_v61  ;;  %v17970_v26 = vmov 0  }
 0x18b   :  { %v3517_v59 = vsub.f32 %v3447_v48, %v18358_v55  ;;  %17955 = vset.pattern.permute.xlu0 %v17970_v26  ;;  %17956 = vset.pattern.permute.xlu1 %v17970_v26 }
 0x18c   :  { %4404 = vperm.xlu0 %17955, %v18381_v44  }
 0x18d   :  { %v3518_v2 = vand.u32 4294901760, %v3517_v59 }
 0x18e   :  { %2866 = vmatmul.mubr.f32.vlgmr.msra.gmra.mrb[0].mxu0 %v18307_v33 }
 0x18f   :  { %2875 = vmatpush1.msra.mxu0 %v2483_v34  ;;  %2938 = vmatprep.mubr.f32.mxu0 %v17961_v0  ;;  %v3440_v34 = vpop.permute.xlu1 %3439 }
 0x190   :  { %2967 = vmatprep.subr.mxu0 %v2966_v62  ;;  %v3443_v39 = vsel %vm3441_vm11, %v3438_v35, %v3440_v34  ;;  %11187 = vrot.lane.b32.xlu0 %v18251_v1, %s17966_s28 }
 0x191   :  { %v3449_v40 = vand.u32 4294901760, %v3443_v39 }
 0x193   :  { %v3528_v50 = vsub.f32 %v3443_v39, %v3449_v40 }
 0x195   :  { %v3529_v57 = vand.u32 4294901760, %v3528_v50 }
 0x196   :  { %2940 = vmatmul.mubr.f32.vlgmr.msra.gmra.mrb[0].mxu0 %v18307_v33 }
 0x197   :  { %2969 = vmatpush1.msra.mxu0 %v2968_v16  ;;  %3032 = vmatprep.mubr.f32.mxu0 %v17961_v0  ;;  %v3530_v4 = vsub.f32 %v3528_v50, %v3529_v57 }
 0x198   :  { %3049 = vmatprep.subr.mxu0 %v3048_v28  ;;  %v17492_v28 = vld [vmem:[%s19356_s1 + $0x40] sm:$0xff] }
 0x199   :  { %v3531_v10 = vand.u32 4294901760, %v3530_v4 }
 0x19e   :  { %3038 = vmatmul.mubr.f32.vlgmr.msra.gmra.mrb[0].mxu0 %v3037_v30  ;;  %v3932_v30 = vsel %vm74_vm0, %v17492_v28, 0 }
 0x19f   :  { %3055 = vmatpush1.msra.mxu0 %v3054_v32  ;;  %3118 = vmatprep.mubr.f32.mxu0 %v17961_v0  ;;  %v4001_v35 = vand.u32 4294901760, %v3932_v30 }
 0x1a0   :  { %3128 = vmatprep.subr.mxu0 %v3045_v12  ;;  %v3536_v12 = vsub.f32 %v3534_v61, %v3535_v9 }
 0x1a1   :  { %v4002_v48 = vsub.f32 %v3932_v30, %v4001_v35 }
 0x1a3   :  { %v4003_v53 = vand.u32 4294901760, %v4002_v48 }
 0x1a6   :  { %3120 = vmatmul.mubr.f32.vlgmr.msra.gmra.mrb[0].mxu0 %v3033_v13 }
 0x1a7   :  { %3131 = vmatpush1.msra.mxu0 %v3051_v22  ;;  %3194 = vmatprep.mubr.f32.mxu0 %v17961_v0 }
 0x1a8   :  { %3204 = vmatprep.subr.mxu0 %v2966_v62 }
 0x1ae   :  { %3197 = vmatmul.mubr.f32.vlgmr.msra.gmra.mrb[0].mxu0 %v3034_v21  ;;  %v3537_v21 = vand.u32 4294901760, %v3536_v12 }
 0x1af   :  { %3206 = vmatpush1.msra.mxu0 %v2968_v16  ;;  %3269 = vmatprep.mubr.f32.mxu0 %v17961_v0 }
 0x1b0   :  { %3282 = vmatprep.subr.mxu0 %v3046_v20 }
 0x1b6   :  { %3273 = vmatmul.mubr.f32.vlgmr.msra.gmra.mrb[0].mxu0 %v3035_v25 }
 0x1b7   :  { %3286 = vmatpush1.msra.mxu0 %v3052_v27  ;;  %3349 = vmatprep.mubr.f32.mxu0 %v17961_v0 }
 0x1b8   :  { %3358 = vmatprep.subr.mxu0 %v2966_v62  ;;  %v3519_v62 = vsub.f32 %v3517_v59, %v3518_v2 }
 0x1ba   :  { %v3520_v20 = vand.u32 4294901760, %v3519_v62 }
 0x1be   :  { %3351 = vmatmul.mubr.f32.vlgmr.msra.gmra.mrb[0].mxu0 %v3033_v13 }
 0x1bf   :  { %3360 = vmatpush1.msra.mxu0 %v2968_v16  ;;  %3423 = vmatprep.mubr.f32.mxu0 %v17961_v0  ;;  %v3919_v16 = vpop.permute.xlu1 %3918 }
 0x1c0   :  { %3450 = vmatprep.subr.mxu0 %v3449_v40 }
 0x1c3   :  { %v3917_v25 = vpop.permute.xlu1 %3916 }
 0x1c4   :  { %v3923_v29 = vsel %vm3922_vm12, %v3917_v25, %v3919_v16 }
 0x1c5   :  { %v3927_v32 = vsel %vm18137_vm7, %v3923_v29, 0.0 }
 0x1c6   :  { %3425 = vmatmul.mubr.f32.vlgmr.msra.gmra.mrb[0].mxu0 %v3033_v13  ;;  %v3921_v13 = vpop.permute.xlu0 %3920  ;;  %v3936_v39 = vand.u32 4294901760, %v3927_v32 }
 0x1c7   :  { %3452 = vmatpush1.msra.mxu0 %v3451_v56  ;;  %3515 = vmatprep.mubr.f32.mxu0 %v17961_v0  ;;  %v3924_v22 = vsel %vm3922_vm12, %v3919_v16, %v3921_v13 }
 0x1c8   :  { %3532 = vmatprep.subr.mxu0 %v3531_v10  ;;  %v3928_v24 = vsel %vm18126_vm6, %v3924_v22, 0.0 }
 0x1c9   :  { %v3934_v27 = vand.u32 4294901760, %v3928_v24 }
 0x1cb   :  { %v4013_v34 = vsub.f32 %v3928_v24, %v3934_v27 }
 0x1cd   :  { %v4014_v47 = vand.u32 4294901760, %v4013_v34 }
 0x1ce   :  { %3521 = vmatmul.mubr.f32.vlgmr.msra.gmra.mrb[0].mxu0 %v3520_v20 }
 0x1cf   :  { %3538 = vmatpush1.msra.mxu0 %v3537_v21  ;;  %3601 = vmatprep.mubr.f32.mxu0 %v17961_v0 }
 0x1d0   :  { %3611 = vmatprep.subr.mxu0 %v3528_v50  ;;  %v4019_v50 = vsub.f32 %v3927_v32, %v3936_v39 }
 0x1d6   :  { %3603 = vmatmul.mubr.f32.vlgmr.msra.gmra.mrb[0].mxu0 %v18358_v55 }
 0x1d7   :  { %3614 = vmatpush1.msra.mxu0 %v3534_v61  ;;  %3677 = vmatprep.mubr.f32.mxu0 %v17961_v0  ;;  %v4004_v61 = vsub.f32 %v4002_v48, %v4003_v53 }
 0x1d8   :  { %3687 = vmatprep.subr.mxu0 %v3449_v40 }
 0x1de   :  { %3680 = vmatmul.mubr.f32.vlgmr.msra.gmra.mrb[0].mxu0 %v3517_v59 }
 0x1df   :  { %3689 = vmatpush1.msra.mxu0 %v3451_v56  ;;  %3752 = vmatprep.mubr.f32.mxu0 %v17961_v0 }
 0x1e0   :  { %3765 = vmatprep.subr.mxu0 %v3529_v57  ;;  %v4020_v57 = vand.u32 4294901760, %v4019_v50 }
 0x1e2   :  { %v4021_v4 = vsub.f32 %v4019_v50, %v4020_v57 }
 0x1e6   :  { %3756 = vmatmul.mubr.f32.vlgmr.msra.gmra.mrb[0].mxu0 %v3518_v2  ;;  %v4022_v2 = vand.u32 4294901760, %v4021_v4 }
 0x1e7   :  { %3769 = vmatpush1.msra.mxu0 %v3535_v9  ;;  %3832 = vmatprep.mubr.f32.mxu0 %v17961_v0  ;;  %v8801_v9 = vpop.permute.xlu0 %8800 }
 0x1e8   :  { %3841 = vmatprep.subr.mxu0 %v3449_v40  ;;  %v4015_v40 = vsub.f32 %v4013_v34, %v4014_v47 }
 0x1ea   :  { %v4016_v59 = vand.u32 4294901760, %v4015_v40 }
 0x1eb   :  { %v8799_v62 = vpop.permute.xlu0 %8798 }
 0x1ec   :  { %v8804_v20 = vsel %vm69_vm1, %v8799_v62, %v8801_v9 }
 0x1ed   :  { %v8813_v21 = vand.u32 4294901760, %v8804_v20 }
 0x1ee   :  { %3834 = vmatmul.mubr.f32.vlgmr.msra.gmra.mrb[0].mxu0 %v18358_v55 }
 0x1ef   :  { %3843 = vmatpush1.msra.mxu0 %v3451_v56  ;;  %3906 = vmatprep.mubr.f32.mxu0 %v17961_v0  ;;  %v4005_v56 = vand.u32 4294901760, %v4004_v61  ;;  %v8896_v16 = vsub.f32 %v8804_v20, %v8813_v21 }
 0x1f0   :  { %3935 = vmatprep.subr.mxu0 %v3934_v27 }
 0x1f1   :  { %v8897_v24 = vand.u32 4294901760, %v8896_v16 }
 0x1f3   :  { %v8898_v28 = vsub.f32 %v8896_v16, %v8897_v24 }
 0x1f5   :  { %v8899_v29 = vand.u32 4294901760, %v8898_v28 }
 0x1f6   :  { %3908 = vmatmul.mubr.f32.vlgmr.msra.gmra.mrb[0].mxu0 %v18358_v55  ;;  %v8803_v55 = vpop.permute.xlu1 %8802 }
 0x1f7   :  { %3937 = vmatpush1.msra.mxu0 %v3936_v39  ;;  %4000 = vmatprep.mubr.f32.mxu0 %v17961_v0  ;;  %v8805_v10 = vsel %vm69_vm1, %v8801_v9, %v8803_v55 }
 0x1f8   :  { %4017 = vmatprep.subr.mxu0 %v4016_v59  ;;  %v8811_v12 = vand.u32 4294901760, %v8805_v10 }
 0x1fa   :  { %v8890_v13 = vsub.f32 %v8805_v10, %v8811_v12  ;;  %v8787_v30 = vpop.permute.xlu1 %8786 }
 0x1fc   :  { %v8891_v22 = vand.u32 4294901760, %v8890_v13 }
 0x1fe   :  { %4006 = vmatmul.mubr.f32.vlgmr.msra.gmra.mrb[0].mxu0 %v4005_v56  ;;  %v8892_v25 = vsub.f32 %v8890_v13, %v8891_v22 }
 0x1ff   :  { %4023 = vmatpush1.msra.mxu0 %v4022_v2  ;;  %4086 = vmatprep.mubr.f32.mxu0 %v17961_v0 }
 0x200   :  { %4096 = vmatprep.subr.mxu0 %v4013_v34  ;;  %v8893_v26 = vand.u32 4294901760, %v8892_v25  ;;  %v8785_v34 = vpop.permute.xlu1 %8784 }
 0x204   :  { %v9749_v4 = vpop.permute.xlu1 %9748 }
 0x206   :  { %4088 = vmatmul.mubr.f32.vlgmr.msra.gmra.mrb[0].mxu0 %v4001_v35 }
 0x207   :  { %4099 = vmatpush1.msra.mxu0 %v4019_v50  ;;  %4162 = vmatprep.mubr.f32.mxu0 %v17961_v0 }
 0x208   :  { %4172 = vmatprep.subr.mxu0 %v3934_v27 }
 0x20e   :  { %4165 = vmatmul.mubr.f32.vlgmr.msra.gmra.mrb[0].mxu0 %v4002_v48 }
 0x20f   :  { %4174 = vmatpush1.msra.mxu0 %v3936_v39  ;;  %4237 = vmatprep.mubr.f32.mxu0 %v17961_v0 }
 0x210   :  { %4250 = vmatprep.subr.mxu0 %v4014_v47 }
 0x216   :  { %4241 = vmatmul.mubr.f32.vlgmr.msra.gmra.mrb[0].mxu0 %v4003_v53 }
 0x217   :  { %4254 = vmatpush1.msra.mxu0 %v4020_v57  ;;  %4317 = vmatprep.mubr.f32.mxu0 %v17961_v0 }
 0x218   :  { %4326 = vmatprep.subr.mxu0 %v3934_v27  ;;  %v8789_v27 = vpop.permute.xlu0 %8788 }
 0x219   :  { %v8791_v32 = vsel %vm53_vm2, %v8787_v30, %v8789_v27 }
 0x21e   :  { %4319 = vmatmul.mubr.f32.vlgmr.msra.gmra.mrb[0].mxu0 %v4001_v35 }
 0x21f   :  { %4328 = vmatpush1.msra.mxu0 %v3936_v39  ;;  %4391 = vmatprep.mubr.f32.mxu0 %v17961_v0  ;;  %v8790_v39 = vsel %vm53_vm2, %v8785_v34, %v8787_v30 }
 0x220   :  { %8812 = vmatprep.subr.mxu0 %v8811_v12  ;;  %v8794_v47 = vsel %vm18086_vm4, %v8790_v39, 0.0 }
 0x221   :  { %v9281_v48 = vand.u32 4294901760, %v8794_v47 }
 0x223   :  { %v9364_v40 = vsub.f32 %v8794_v47, %v9281_v48  ;;  %v10716_v47 = vand.u32 4294901760, %v18251_v1 }
 0x225   :  { %v9365_v57 = vand.u32 4294901760, %v9364_v40 }
 0x226   :  { %4393 = vmatmul.mubr.f32.vlgmr.msra.gmra.mrb[0].mxu0 %v4001_v35 }
 0x227   :  { %8814 = vmatpush1.msra.mxu0 %v8813_v21  ;;  %8877 = vmatprep.mubr.f32.mxu0 %v17961_v0  ;;  %v9366_v59 = vsub.f32 %v9364_v40, %v9365_v57 }
 0x228   :  { %8894 = vmatprep.subr.mxu0 %v8893_v26 }
 0x229   :  { %v9367_v61 = vand.u32 4294901760, %v9366_v59 }
 0x22a   :  { %8883 = vmatmul.mubr.f32.vlgmr.msra.gmra.mrb[2].mxu0 %v18059_v17  ;;  %v8795_v17 = vsel %vm18072_vm3, %v8791_v32, 0.0 }
 0x22b   :  { %8900 = vmatpush1.msra.mxu0 %v8899_v29  ;;  %8963 = vmatprep.mubr.f32.mxu0 %v17961_v0  ;;  %v9279_v35 = vand.u32 4294901760, %v8795_v17 }
 0x22c   :  { %8973 = vmatprep.subr.mxu0 %v8890_v13 }
 0x232   :  { %8965 = vmatmul.mubr.f32.vlgmr.msra.gmra.mrb[2].mxu0 %v18045_v5 }
 0x233   :  { %8976 = vmatpush1.msra.mxu0 %v8896_v16  ;;  %9039 = vmatprep.mubr.f32.mxu0 %v17961_v0 }
 0x234   :  { %9049 = vmatprep.subr.mxu0 %v8811_v12 }
 0x23a   :  { %9042 = vmatmul.mubr.f32.vlgmr.msra.gmra.mrb[2].mxu0 %v18050_v6  ;;  %v9358_v6 = vsub.f32 %v8795_v17, %v9279_v35 }
 0x23b   :  { %9051 = vmatpush1.msra.mxu0 %v8813_v21  ;;  %9114 = vmatprep.mubr.f32.mxu0 %v17961_v0 }
 0x23c   :  { %9127 = vmatprep.subr.mxu0 %v8891_v22  ;;  %v9359_v50 = vand.u32 4294901760, %v9358_v6 }
 0x23e   :  { %v9360_v53 = vsub.f32 %v9358_v6, %v9359_v50 }
 0x242   :  { %9118 = vmatmul.mubr.f32.vlgmr.msra.gmra.mrb[2].mxu0 %v18053_v7  ;;  %v9361_v7 = vand.u32 4294901760, %v9360_v53 }
 0x243   :  { %9131 = vmatpush1.msra.mxu0 %v8897_v24  ;;  %9194 = vmatprep.mubr.f32.mxu0 %v17961_v0 }
 0x244   :  { %9203 = vmatprep.subr.mxu0 %v8811_v12 }
 0x24a   :  { %9196 = vmatmul.mubr.f32.vlgmr.msra.gmra.mrb[2].mxu0 %v18045_v5 }
 0x24b   :  { %9205 = vmatpush1.msra.mxu0 %v8813_v21  ;;  %9268 = vmatprep.mubr.f32.mxu0 %v17961_v0 }
 0x24c   :  { %9280 = vmatprep.subr.mxu0 %v9279_v35 }
 0x252   :  { %9270 = vmatmul.mubr.f32.vlgmr.msra.gmra.mrb[2].mxu0 %v18045_v5  ;;  %v9747_v5 = vpop.permute.xlu0 %9746 }
 0x253   :  { %9282 = vmatpush1.msra.mxu0 %v9281_v48  ;;  %9345 = vmatprep.mubr.f32.mxu0 %v17961_v0  ;;  %v9751_v56 = vsel %vm1021_vm5, %v9747_v5, %v9749_v4 }
 0x254   :  { %9362 = vmatprep.subr.mxu0 %v9361_v7 }
 0x256   :  { %v9745_v2 = vpop.permute.xlu0 %9744 }
 0x257   :  { %v9750_v55 = vsel %vm1021_vm5, %v9745_v2, %v9747_v5 }
 0x258   :  { %v9754_v10 = vsel %vm18137_vm7, %v9750_v55, 0.0 }
 0x259   :  { %v9762_v62 = vand.u32 4294901760, %v9754_v10 }
 0x25a   :  { %9351 = vmatmul.mubr.f32.vlgmr.msra.gmra.mrb[2].mxu0 %v18118_v54  ;;  %v9755_v54 = vsel %vm18126_vm6, %v9751_v56, 0.0  ;;  %v10232_v24 = vpop.permute.xlu0 %10231 }
 0x25b   :  { %9368 = vmatpush1.msra.mxu0 %v9367_v61  ;;  %9431 = vmatprep.mubr.f32.mxu0 %v17961_v0  ;;  %v9760_v9 = vand.u32 4294901760, %v9755_v54  ;;  %v9845_v20 = vsub.f32 %v9754_v10, %v9762_v62 }
 0x25c   :  { %9441 = vmatprep.subr.mxu0 %v9358_v6 }
 0x25d   :  { %v9846_v13 = vand.u32 4294901760, %v9845_v20 }
 0x25f   :  { %v9847_v16 = vsub.f32 %v9845_v20, %v9846_v13 }
 0x261   :  { %v9848_v22 = vand.u32 4294901760, %v9847_v16 }
 0x262   :  { %9433 = vmatmul.mubr.f32.vlgmr.msra.gmra.mrb[2].mxu0 %v18101_v43 }
 0x263   :  { %9444 = vmatpush1.msra.mxu0 %v9364_v40  ;;  %9507 = vmatprep.mubr.f32.mxu0 %v17961_v0 }
 0x264   :  { %9517 = vmatprep.subr.mxu0 %v9279_v35 }
 0x26a   :  { %9510 = vmatmul.mubr.f32.vlgmr.msra.gmra.mrb[2].mxu0 %v18107_v46  ;;  %v9839_v46 = vsub.f32 %v9755_v54, %v9760_v9 }
 0x26b   :  { %9519 = vmatpush1.msra.mxu0 %v9281_v48  ;;  %9582 = vmatprep.mubr.f32.mxu0 %v17961_v0 }
 0x26c   :  { %9595 = vmatprep.subr.mxu0 %v9359_v50  ;;  %v9840_v12 = vand.u32 4294901760, %v9839_v46 }
 0x26e   :  { %v9841_v21 = vsub.f32 %v9839_v46, %v9840_v12 }
 0x272   :  { %9586 = vmatmul.mubr.f32.vlgmr.msra.gmra.mrb[2].mxu0 %v18112_v49  ;;  %v9842_v49 = vand.u32 4294901760, %v9841_v21 }
 0x273   :  { %9599 = vmatpush1.msra.mxu0 %v9365_v57  ;;  %9662 = vmatprep.mubr.f32.mxu0 %v17961_v0 }
 0x274   :  { %9671 = vmatprep.subr.mxu0 %v9279_v35 }
 0x27a   :  { %9664 = vmatmul.mubr.f32.vlgmr.msra.gmra.mrb[2].mxu0 %v18101_v43 }
 0x27b   :  { %9673 = vmatpush1.msra.mxu0 %v9281_v48  ;;  %9736 = vmatprep.mubr.f32.mxu0 %v17961_v0 }
 0x27c   :  { %9761 = vmatprep.subr.mxu0 %v9760_v9 }
 0x282   :  { %9738 = vmatmul.mubr.f32.vlgmr.msra.gmra.mrb[2].mxu0 %v18101_v43  ;;  %v10230_v43 = vpop.permute.xlu1 %10229 }
 0x283   :  { %9763 = vmatpush1.msra.mxu0 %v9762_v62  ;;  %9826 = vmatprep.mubr.f32.mxu0 %v17961_v0  ;;  %v10234_v25 = vsel %vm1506_vm8, %v10230_v43, %v10232_v24 }
 0x284   :  { %9843 = vmatprep.subr.mxu0 %v9842_v49 }
 0x286   :  { %v10228_v28 = vpop.permute.xlu1 %10227 }
 0x287   :  { %v10233_v29 = vsel %vm1506_vm8, %v10228_v28, %v10230_v43 }
 0x288   :  { %v10237_v27 = vsel %vm18086_vm4, %v10233_v29, 0.0 }
 0x289   :  { %v10245_v30 = vand.u32 4294901760, %v10237_v27 }
 0x28a   :  { %9832 = vmatmul.mubr.f32.vlgmr.msra.gmra.mrb[2].mxu0 %v18168_v23  ;;  %v10238_v23 = vsel %vm18072_vm3, %v10234_v25, 0.0  ;;  %v11190_v7 = vpop.permute.xlu1 %11189 }
 0x28b   :  { %9849 = vmatpush1.msra.mxu0 %v9848_v22  ;;  %9912 = vmatprep.mubr.f32.mxu0 %v17961_v0  ;;  %v10243_v26 = vand.u32 4294901760, %v10238_v23  ;;  %v10328_v17 = vsub.f32 %v10237_v27, %v10245_v30 }
 0x28c   :  { %9922 = vmatprep.subr.mxu0 %v9839_v46 }
 0x28d   :  { %v10329_v35 = vand.u32 4294901760, %v10328_v17 }
 0x28e   :  { %v11192_v59 = vpop.permute.xlu1 %11191 }
 0x28f   :  { %v10330_v39 = vsub.f32 %v10328_v17, %v10329_v35 }
 0x291   :  { %v10331_v6 = vand.u32 4294901760, %v10330_v39 }
 0x292   :  { %9914 = vmatmul.mubr.f32.vlgmr.msra.gmra.mrb[2].mxu0 %v18152_v11 }
 0x293   :  { %9925 = vmatpush1.msra.mxu0 %v9845_v20  ;;  %9988 = vmatprep.mubr.f32.mxu0 %v17961_v0 }
 0x294   :  { %9998 = vmatprep.subr.mxu0 %v9760_v9 }
 0x29a   :  { %9991 = vmatmul.mubr.f32.vlgmr.msra.gmra.mrb[2].mxu0 %v18158_v14  ;;  %v10322_v14 = vsub.f32 %v10238_v23, %v10243_v26 }
 0x29b   :  { %10000 = vmatpush1.msra.mxu0 %v9762_v62  ;;  %10063 = vmatprep.mubr.f32.mxu0 %v17961_v0 }
 0x29c   :  { %10076 = vmatprep.subr.mxu0 %v9840_v12  ;;  %v10323_v32 = vand.u32 4294901760, %v10322_v14 }
 0x29e   :  { %v10324_v34 = vsub.f32 %v10322_v14, %v10323_v32 }
 0x2a2   :  { %10067 = vmatmul.mubr.f32.vlgmr.msra.gmra.mrb[2].mxu0 %v18162_v18  ;;  %v10325_v18 = vand.u32 4294901760, %v10324_v34 }
 0x2a3   :  { %10080 = vmatpush1.msra.mxu0 %v9846_v13  ;;  %10143 = vmatprep.mubr.f32.mxu0 %v17961_v0 }
 0x2a4   :  { %10152 = vmatprep.subr.mxu0 %v9760_v9 }
 0x2aa   :  { %10145 = vmatmul.mubr.f32.vlgmr.msra.gmra.mrb[2].mxu0 %v18152_v11 }
 0x2ab   :  { %10154 = vmatpush1.msra.mxu0 %v9762_v62  ;;  %10217 = vmatprep.mubr.f32.mxu0 %v17961_v0 }
 0x2ac   :  { %10244 = vmatprep.subr.mxu0 %v10243_v26 }
 0x2b2   :  { %10219 = vmatmul.mubr.f32.vlgmr.msra.gmra.mrb[2].mxu0 %v18152_v11  ;;  %v10714_v11 = vand.u32 4294901760, %v18264_v19 }
 0x2b3   :  { %10246 = vmatpush1.msra.mxu0 %v10245_v30  ;;  %10309 = vmatprep.mubr.f32.mxu0 %v17961_v0 }
 0x2b4   :  { %10326 = vmatprep.subr.mxu0 %v10325_v18 }
 0x2ba   :  { %10315 = vmatmul.mubr.f32.vlgmr.msra.gmra.mrb[2].mxu0 %v18208_v52  ;;  %v10793_v52 = vsub.f32 %v18264_v19, %v10714_v11 }
 0x2bb   :  { %10332 = vmatpush1.msra.mxu0 %v10331_v6  ;;  %10395 = vmatprep.mubr.f32.mxu0 %v17961_v0 }
 0x2bc   :  { %10405 = vmatprep.subr.mxu0 %v10322_v14  ;;  %v10794_v48 = vand.u32 4294901760, %v10793_v52 }
 0x2be   :  { %v10795_v50 = vsub.f32 %v10793_v52, %v10794_v48 }
 0x2c2   :  { %10397 = vmatmul.mubr.f32.vlgmr.msra.gmra.mrb[2].mxu0 %v18192_v37 }
 0x2c3   :  { %10408 = vmatpush1.msra.mxu0 %v10328_v17  ;;  %10471 = vmatprep.mubr.f32.mxu0 %v17961_v0 }
 0x2c4   :  { %10481 = vmatprep.subr.mxu0 %v10243_v26 }
 0x2ca   :  { %10474 = vmatmul.mubr.f32.vlgmr.msra.gmra.mrb[2].mxu0 %v18198_v41  ;;  %v10799_v41 = vsub.f32 %v18251_v1, %v10716_v47 }
 0x2cb   :  { %10483 = vmatpush1.msra.mxu0 %v10245_v30  ;;  %10546 = vmatprep.mubr.f32.mxu0 %v17961_v0 }
 0x2cc   :  { %10559 = vmatprep.subr.mxu0 %v10323_v32  ;;  %v10800_v40 = vand.u32 4294901760, %v10799_v41 }
 0x2ce   :  { %v10801_v53 = vsub.f32 %v10799_v41, %v10800_v40 }
 0x2d0   :  { %v10802_v57 = vand.u32 4294901760, %v10801_v53 }
 0x2d2   :  { %10550 = vmatmul.mubr.f32.vlgmr.msra.gmra.mrb[2].mxu0 %v18202_v45  ;;  %v10796_v45 = vand.u32 4294901760, %v10795_v50 }
 0x2d3   :  { %10563 = vmatpush1.msra.mxu0 %v10329_v35  ;;  %10626 = vmatprep.mubr.f32.mxu0 %v17961_v0 }
 0x2d4   :  { %10635 = vmatprep.subr.mxu0 %v10243_v26 }
 0x2da   :  { %10628 = vmatmul.mubr.f32.vlgmr.msra.gmra.mrb[2].mxu0 %v18192_v37 }
 0x2db   :  { %10637 = vmatpush1.msra.mxu0 %v10245_v30  ;;  %10700 = vmatprep.mubr.f32.mxu0 %v17961_v0 }
 0x2dc   :  { %10715 = vmatprep.subr.mxu0 %v10714_v11 }
 0x2e2   :  { %10702 = vmatmul.mubr.f32.vlgmr.msra.gmra.mrb[2].mxu0 %v18192_v37  ;;  %v4405_v37 = vpop.permute.xlu0 %4404 }
 0x2e3   :  { %10717 = vmatpush1.msra.mxu0 %v10716_v47  ;;  %10780 = vmatprep.mubr.f32.mxu0 %v17961_v0 }
 0x2e4   :  { %10797 = vmatprep.subr.mxu0 %v10796_v45 }
 0x2e6   :  { %v11188_v55 = vpop.permute.xlu0 %11187 }
 0x2e7   :  { %v11193_v46 = vsel %vm2469_vm9, %v11188_v55, %v11190_v7 }
 0x2e8   :  { %v11197_v62 = vsel %vm18137_vm7, %v11193_v46, 0.0 }
 0x2e9   :  { %v11205_v12 = vand.u32 4294901760, %v11197_v62 }
 0x2ea   :  { %10786 = vmatmul.mubr.f32.vlgmr.msra.gmra.mrb[2].mxu0 %v18255_v15  ;;  %v11194_v15 = vsel %vm2469_vm9, %v11190_v7, %v11192_v59 }
 0x2eb   :  { %10803 = vmatpush1.msra.mxu0 %v10802_v57  ;;  %10866 = vmatprep.mubr.f32.mxu0 %v17961_v0  ;;  %v11198_v9 = vsel %vm18126_vm6, %v11194_v15, 0.0  ;;  %v11288_v20 = vsub.f32 %v11197_v62, %v11205_v12 }
 0x2ec   :  { %10876 = vmatprep.subr.mxu0 %v10793_v52 }
 0x2ed   :  { %v11289_v13 = vand.u32 4294901760, %v11288_v20 }
 0x2ef   :  { %v11290_v16 = vsub.f32 %v11288_v20, %v11289_v13 }
 0x2f1   :  { %v11291_v22 = vand.u32 4294901760, %v11290_v16 }
 0x2f2   :  { %10868 = vmatmul.mubr.f32.vlgmr.msra.gmra.mrb[2].mxu0 %v18227_v60 }
 0x2f3   :  { %10879 = vmatpush1.msra.mxu0 %v10799_v41  ;;  %10942 = vmatprep.mubr.f32.mxu0 %v17961_v0 }
 0x2f4   :  { %10952 = vmatprep.subr.mxu0 %v10714_v11 }
 0x2f9   :  { %v4394_v61 = vpop.f32.mrb[0].mxu0 }
 0x2fa   :  { %v4407_v4 = vadd.f32 %v4405_v37, %v4394_v61  ;;  %v4396_v5 = vpop.f32.mrb[1].mxu0  ;;  %10945 = vmatmul.mubr.f32.vlgmr.msra.gmra.mrb[2].mxu0 %v18234_v63  ;;  %v18485_v63 = vand.u32 4294901760, %v11198_v9 }
 0x2fb   :  { %v4408_v56 = vadd.f32 %v4405_v37, %v4396_v5  ;;  %10954 = vmatpush1.msra.mxu0 %v10716_v47  ;;  %11017 = vmatprep.mubr.f32.mxu0 %v17961_v0 }
 0x2fc   :  { %v18475_v54 = vmax.f32 %v4407_v4, 0.0  ;;  %11030 = vmatprep.subr.mxu0 %v10794_v48  ;;  %v11282_v10 = vsub.f32 %v11198_v9, %v18485_v63 }
 0x2fd   :  { %v18477_v2 = vmax.f32 %v4408_v56, 0.0 }
 0x2fe   :  { %4436 = vrot.lane.b32.xlu1 %v18475_v54, %s17962_s18 }
 0x2ff   :  { %4438 = vrot.lane.b32.xlu0 %v18477_v2, %s17962_s18 }
 0x302   :  { %4434 = vrot.lane.b32.xlu1 %v17961_v0, %s17962_s18  ;;  %11021 = vmatmul.mubr.f32.vlgmr.msra.gmra.mrb[2].mxu0 %v18241_v8  ;;  %v11283_v8 = vand.u32 4294901760, %v11282_v10 }
 0x303   :  { %11672 = vrot.lane.b32.xlu0 %v18264_v19, %s17967_s6  ;;  %11034 = vmatpush1.msra.mxu0 %v10800_v40 }
 0x304   :  { %11097 = vmatprep.mubr.f32.mxu0 %v17961_v0  ;;  %11106 = vmatprep.subr.mxu0 %v10714_v11  ;;  %v11284_v21 = vsub.f32 %v11282_v10, %v11283_v8 }
 0x306   :  { %11674 = vrot.lane.b32.xlu1 %v17961_v0, %s17967_s6  ;;  %v11285_v49 = vand.u32 4294901760, %v11284_v21 }
 0x307   :  { %11670 = vrot.lane.b32.xlu0 %v18251_v1, %s17967_s6 }
 0x30a   :  { %4421 = vrot.lane.b32.xlu1 %v18475_v54, %s17963_s23  ;;  %11099 = vmatmul.mubr.f32.vlgmr.msra.gmra.mrb[2].mxu0 %v18227_v60 }
 0x30b   :  { %4423 = vrot.lane.b32.xlu0 %v18477_v2, %s17963_s23  ;;  %11108 = vmatpush1.msra.mxu0 %v10716_v47 }
 0x30c   :  { %11171 = vmatprep.mubr.f32.mxu0 %v17961_v0  ;;  %11204 = vmatprep.subr.mxu0 %v18485_v63 }
 0x30e   :  { %4419 = vrot.lane.b32.xlu1 %v17961_v0, %s17963_s23 }
 0x30f   :  { %12156 = vrot.lane.b32.xlu0 %v18264_v19, %s17968_s9 }
 0x312   :  { %12158 = vrot.lane.b32.xlu1 %v17961_v0, %s17968_s9  ;;  %11173 = vmatmul.mubr.f32.vlgmr.msra.gmra.mrb[2].mxu0 %v18227_v60  ;;  %v17493_v60 = vld [vmem:[%s19358_s3 + $0x8] sm:$0xff] }
 0x313   :  { %12154 = vrot.lane.b32.xlu0 %v18251_v1, %s17968_s9  ;;  %11206 = vmatpush1.msra.mxu0 %v11205_v12 }
 0x314   :  { %11269 = vmatprep.mubr.f32.mxu0 %v17961_v0  ;;  %11286 = vmatprep.subr.mxu0 %v11285_v49 }
 0x316   :  { %5382 = vrot.lane.b32.xlu1 %v18475_v54, %s17964_s24 }
 0x317   :  { %5384 = vrot.lane.b32.xlu0 %v18477_v2, %s17964_s24 }
 0x31a   :  { %5380 = vrot.lane.b32.xlu1 %v17961_v0, %s17964_s24  ;;  %11275 = vmatmul.mubr.f32.vlgmr.msra.gmra.mrb[2].mxu0 %v18324_v51 }
 0x31b   :  { %12636 = vrot.lane.b32.xlu0 %v18264_v19, %s17969_s12  ;;  %11292 = vmatpush1.msra.mxu0 %v11291_v22 }
 0x31c   :  { %11355 = vmatprep.mubr.f32.mxu0 %v17961_v0  ;;  %11365 = vmatprep.subr.mxu0 %v11282_v10 }
 0x31e   :  { %12638 = vrot.lane.b32.xlu1 %v17961_v0, %s17969_s12 }
 0x31f   :  { %12634 = vrot.lane.b32.xlu0 %v18251_v1, %s17969_s12  ;;  %v4445_v1 = vsel %vm74_vm0, %v17493_v60, 0 }
 0x320   :  { %v18579_v19 = vand.u32 4294901760, %v4445_v1 }
 0x322   :  { %5866 = vrot.lane.b32.xlu1 %v18475_v54, %s17965_s25  ;;  %11357 = vmatmul.mubr.f32.vlgmr.msra.gmra.mrb[2].mxu0 %v18307_v33  ;;  %v18586_v51 = vsub.f32 %v4445_v1, %v18579_v19 }
 0x323   :  { %5868 = vrot.lane.b32.xlu0 %v18477_v2, %s17965_s25  ;;  %11368 = vmatpush1.msra.mxu0 %v11288_v20  ;;  %v4431_v20 = vld [vmem:[%s19358_s3] sm:$0xff] }
 0x324   :  { %11431 = vmatprep.mubr.f32.mxu0 %v17961_v0  ;;  %11441 = vmatprep.subr.mxu0 %v18485_v63  ;;  %v4913_v60 = vsel %vm74_vm0, %v4431_v20, 0 }
 0x326   :  { %5864 = vrot.lane.b32.xlu1 %v17961_v0, %s17965_s25 }
 0x327   :  { %6828 = vrot.lane.b32.xlu0 %v18477_v2, %s17966_s28 }
 0x32a   :  { %6830 = vrot.lane.b32.xlu1 %v17961_v0, %s17966_s28  ;;  %11434 = vmatmul.mubr.f32.vlgmr.msra.gmra.mrb[2].mxu0 %v18313_v36  ;;  %v17508_v36 = vld [vmem:[%s19356_s1 + $0x30] sm:$0xff] }
 0x32b   :  { %6826 = vrot.lane.b32.xlu0 %v18475_v54, %s17966_s28  ;;  %11443 = vmatpush1.msra.mxu0 %v11205_v12 }
 0x32c   :  { %11506 = vmatprep.mubr.f32.mxu0 %v17961_v0  ;;  %11519 = vmatprep.subr.mxu0 %v11283_v8 }
 0x32e   :  { %7312 = vrot.lane.b32.xlu1 %v18477_v2, %s17967_s6 }
 0x32f   :  { %7314 = vrot.lane.b32.xlu0 %v17961_v0, %s17967_s6 }
 0x332   :  { %7310 = vrot.lane.b32.xlu1 %v18475_v54, %s17967_s6  ;;  %11510 = vmatmul.mubr.f32.vlgmr.msra.gmra.mrb[2].mxu0 %v18318_v42  ;;  %v11684_v42 = vsel %vm74_vm0, %v17508_v36, 0 }
 0x333   :  { %7798 = vrot.lane.b32.xlu0 %v18477_v2, %s17968_s9  ;;  %11523 = vmatpush1.msra.mxu0 %v11289_v13 }
 0x334   :  { %11586 = vmatprep.mubr.f32.mxu0 %v17961_v0  ;;  %11595 = vmatprep.subr.mxu0 %v18485_v63 }
 0x336   :  { %7800 = vrot.lane.b32.xlu1 %v17961_v0, %s17968_s9 }
 0x337   :  { %7796 = vrot.lane.b32.xlu0 %v18475_v54, %s17968_s9 }
 0x33a   :  { %13120 = vperm.xlu1 %17956, %v18381_v44   ;;  %11588 = vmatmul.mubr.f32.vlgmr.msra.gmra.mrb[2].mxu0 %v18307_v33  ;;  %v4516_v44 = vand.u32 4294901760, %v18586_v51 }
 0x33b   :  { %8278 = vrot.lane.b32.xlu0 %v18477_v2, %s17969_s12  ;;  %11597 = vmatpush1.msra.mxu0 %v11205_v12 }
 0x33c   :  { %11660 = vmatprep.mubr.f32.mxu0 %v17961_v0  ;;  %v4517_v23 = vsub.f32 %v18586_v51, %v4516_v44 }
 0x33e   :  { %8280 = vrot.lane.b32.xlu1 %v17961_v0, %s17969_s12  ;;  %v4518_v17 = vand.u32 4294901760, %v4517_v23 }
 0x33f   :  { %8276 = vrot.lane.b32.xlu0 %v18475_v54, %s17969_s12 }
 0x342   :  { %11662 = vmatmul.mubr.f32.vlgmr.msra.gmra.mrb[2].mxu0 %v18307_v33  ;;  %v18588_v33 = vand.u32 4294901760, %v11684_v42 }
 0x343   :  { %11752 = vmatprep.mubr.f32.mxu0 %v17961_v0 }
 0x344   :  { %v18592_v24 = vsub.f32 %v11684_v42, %v18588_v33 }
 0x346   :  { %v11755_v29 = vand.u32 4294901760, %v18592_v24 }
 0x348   :  { %v11756_v18 = vsub.f32 %v18592_v24, %v11755_v29 }
 0x34a   :  { %v11757_v57 = vand.u32 4294901760, %v11756_v18 }
 0x370   :  { %v4437_v43 = vpop.permute.xlu1 %4436 }
 0x371   :  { %v4439_v25 = vpop.permute.xlu0 %4438 }
 0x372   :  { %v4441_v28 = vsel %vm69_vm1, %v4437_v43, %v4439_v25 }
 0x373   :  { %v18598_v26 = vand.u32 4294901760, %v4441_v28 }
 0x374   :  { %v4435_v14 = vpop.permute.xlu1 %4434 }
 0x375   :  { %v4526_v27 = vsub.f32 %v4441_v28, %v18598_v26  ;;  %v4440_v30 = vsel %vm69_vm1, %v4435_v14, %v4437_v43  ;;  %4448 = vmatprep.subr.mxu1 %v18598_v26  ;;  %v11673_v32 = vpop.permute.xlu0 %11672 }
 0x376   :  { %v18604_v34 = vand.u32 4294901760, %v4440_v30 }
 0x377   :  { %v4527_v35 = vand.u32 4294901760, %v4526_v27 }
 0x378   :  { %v18610_v39 = vsub.f32 %v4440_v30, %v18604_v34  ;;  %v11675_v6 = vpop.permute.xlu1 %11674  ;;  %4450 = vmatpush1.msra.mxu1 %v18604_v34 }
 0x379   :  { %v11677_v11 = vsel %vm2954_vm10, %v11673_v32, %v11675_v6  ;;  %4519 = vmatmul.mubr.f32.vlgmr.msra.gmra.mrb[0].mxu1 %v4518_v17  ;;  %v11671_v52 = vpop.permute.xlu0 %11670  ;;  %v4528_v47 = vsub.f32 %v4526_v27, %v4527_v35 }
 0x37a   :  { %v4533_v48 = vand.u32 4294901760, %v18610_v39  ;;  %v11681_v41 = vsel %vm18072_vm3, %v11677_v11, 0.0  ;;  %v11676_v50 = vsel %vm2954_vm10, %v11671_v52, %v11673_v32  ;;  %4599 = vmatprep.mubr.f32.mxu1 %v17961_v0 }
 0x37b   :  { %v18619_v40 = vand.u32 4294901760, %v11681_v41  ;;  %v11680_v45 = vsel %vm18086_vm4, %v11676_v50, 0.0  ;;  %v4529_v53 = vand.u32 4294901760, %v4528_v47 }
 0x37c   :  { %v4534_v7 = vsub.f32 %v18610_v39, %v4533_v48  ;;  %v18624_v37 = vand.u32 4294901760, %v11680_v45  ;;  %v4422_v46 = vpop.permute.xlu1 %4421 }
 0x37d   :  { %v11765_v59 = vsub.f32 %v11681_v41, %v18619_v40  ;;  %4530 = vmatprep.subr.mxu1 %v4529_v53  ;;  %11687 = vmatprep.subr.mxu0 %v18619_v40  ;;  %v4424_v10 = vpop.permute.xlu0 %4423 }
 0x37e   :  { %v11771_v61 = vsub.f32 %v11680_v45, %v18624_v37  ;;  %11689 = vmatpush1.msra.mxu0 %v18624_v37  ;;  %v4535_v4 = vand.u32 4294901760, %v4534_v7  ;;  %v4426_v62 = vsel %vm53_vm2, %v4422_v46, %v4424_v10 }
 0x37f   :  { %11758 = vmatmul.mubr.f32.vlgmr.msra.gmra.mrb[2].mxu0 %v11757_v57  ;;  %v11766_v5 = vand.u32 4294901760, %v11765_v59  ;;  %v4430_v8 = vsel %vm18072_vm3, %v4426_v62, 0.0 }
 0x380   :  { %v11772_v15 = vand.u32 4294901760, %v11771_v61  ;;  %4536 = vmatpush1.msra.mxu1 %v4535_v4  ;;  %11838 = vmatprep.mubr.f32.mxu0 %v17961_v0  ;;  %v4420_v12 = vpop.permute.xlu1 %4419  ;;  %v18650_v21 = vand.u32 4294901760, %v4430_v8 }
 0x381   :  { %4601 = vmatmul.mubr.f32.vlgmr.msra.gmra.mrb[0].mxu1 %v18579_v19  ;;  %4609 = vmatprep.subr.mxu1 %v4526_v27  ;;  %v11767_v56 = vsub.f32 %v11765_v59, %v11766_v5  ;;  %v12157_v13 = vpop.permute.xlu0 %12156  ;;  %v4425_v16 = vsel %vm53_vm2, %v4420_v12, %v4422_v46 }
 0x382   :  { %4612 = vmatpush1.msra.mxu1 %v18610_v39  ;;  %v11773_v9 = vsub.f32 %v11771_v61, %v11772_v15  ;;  %4675 = vmatprep.mubr.f32.mxu1 %v17961_v0  ;;  %v18660_v1 = vsub.f32 %v4430_v8, %v18650_v21  ;;  %v4429_v36 = vsel %vm18086_vm4, %v4425_v16, 0.0 }
 0x383   :  { %4685 = vmatprep.subr.mxu1 %v18598_v26  ;;  %v11768_v55 = vand.u32 4294901760, %v11767_v56  ;;  %v18673_v43 = vand.u32 4294901760, %v4429_v36 }
 0x384   :  { %v11774_v63 = vand.u32 4294901760, %v11773_v9  ;;  %v12159_v49 = vpop.permute.xlu1 %12158  ;;  %v17494_v9 = vld [vmem:[%s19358_s3 + $0x10] sm:$0xff] }
 0x385   :  { %11769 = vmatprep.subr.mxu0 %v11768_v55  ;;  %v12161_v22 = vsel %vm3441_vm11, %v12157_v13, %v12159_v49  ;;  %v12155_v25 = vpop.permute.xlu0 %12154  ;;  %v18693_v27 = vsub.f32 %v4429_v36, %v18673_v43  ;;  %v5395_v10 = vsel %vm74_vm0, %v17494_v9, 0  ;;  %v17510_v49 = vld [vmem:[%s19356_s1 + $0x40] sm:$0xff] }
 0x386   :  { %11775 = vmatpush1.msra.mxu0 %v11774_v63  ;;  %v18664_v42 = vand.u32 4294901760, %v12161_v22 }
 0x387   :  { %11840 = vmatmul.mubr.f32.vlgmr.msra.gmra.mrb[2].mxu0 %v18588_v33  ;;  %11848 = vmatprep.subr.mxu0 %v11765_v59  ;;  %v5001_v18 = vand.u32 4294901760, %v18693_v27 }
 0x388   :  { %11851 = vmatpush1.msra.mxu0 %v11771_v61  ;;  %11914 = vmatprep.mubr.f32.mxu0 %v17961_v0  ;;  %v18678_v28 = vsub.f32 %v12161_v22, %v18664_v42  ;;  %v5383_v7 = vpop.permute.xlu1 %5382  ;;  %v12648_v22 = vsel %vm74_vm0, %v17510_v49, 0 }
 0x389   :  { %4678 = vmatmul.mubr.f32.vlgmr.msra.gmra.mrb[0].mxu1 %v18586_v51  ;;  %11924 = vmatprep.subr.mxu0 %v18619_v40  ;;  %v18666_v51 = vand.u32 4294901760, %v4913_v60 }
 0x38a   :  { %4687 = vmatpush1.msra.mxu1 %v18604_v34  ;;  %4750 = vmatprep.mubr.f32.mxu1 %v17961_v0 }
 0x38b   :  { %4763 = vmatprep.subr.mxu1 %v4527_v35  ;;  %v12247_v35 = vand.u32 4294901760, %v18678_v28 }
 0x38c   :  { %v5381_v59 = vpop.permute.xlu1 %5380 }
 0x38d   :  { %v12248_v52 = vsub.f32 %v18678_v28, %v12247_v35  ;;  %v5386_v63 = vsel %vm1021_vm5, %v5381_v59, %v5383_v7 }
 0x38e   :  { %v5390_v12 = vsel %vm18137_vm7, %v5386_v63, 0.0 }
 0x38f   :  { %11917 = vmatmul.mubr.f32.vlgmr.msra.gmra.mrb[2].mxu0 %v18592_v24  ;;  %v4995_v24 = vand.u32 4294901760, %v18660_v1  ;;  %v12249_v50 = vand.u32 4294901760, %v12248_v52 }
 0x390   :  { %11926 = vmatpush1.msra.mxu0 %v18624_v37  ;;  %11989 = vmatprep.mubr.f32.mxu0 %v17961_v0 }
 0x391   :  { %12002 = vmatprep.subr.mxu0 %v11766_v5  ;;  %4754 = vmatmul.mubr.f32.vlgmr.msra.gmra.mrb[0].mxu1 %v4516_v44  ;;  %v17509_v44 = vld [vmem:[%s19356_s1 + $0x38] sm:$0xff]  ;;  %v4996_v32 = vsub.f32 %v18660_v1, %v4995_v24 }
 0x392   :  { %4767 = vmatpush1.msra.mxu1 %v4533_v48  ;;  %4830 = vmatprep.mubr.f32.mxu1 %v17961_v0  ;;  %v12165_v23 = vsel %vm74_vm0, %v17509_v44, 0 }
 0x393   :  { %4839 = vmatprep.subr.mxu1 %v18598_v26  ;;  %v12160_v26 = vsel %vm3441_vm11, %v12155_v25, %v12157_v13  ;;  %v18690_v14 = vand.u32 4294901760, %v12165_v23  ;;  %v4997_v6 = vand.u32 4294901760, %v4996_v32  ;;  %v18778_v13 = vand.u32 4294901760, %v5395_v10 }
 0x394   :  { %v18695_v30 = vand.u32 4294901760, %v12160_v26  ;;  %v18804_v25 = vand.u32 4294901760, %v12648_v22 }
 0x395   :  { %v18799_v44 = vsub.f32 %v5395_v10, %v18778_v13 }
 0x396   :  { %v18708_v39 = vsub.f32 %v12160_v26, %v18695_v30 }
 0x397   :  { %11993 = vmatmul.mubr.f32.vlgmr.msra.gmra.mrb[2].mxu0 %v11755_v29  ;;  %v18685_v29 = vsub.f32 %v4913_v60, %v18666_v51  ;;  %v18813_v26 = vand.u32 4294901760, %v18799_v44 }
 0x398   :  { %12006 = vmatpush1.msra.mxu0 %v11772_v15  ;;  %12069 = vmatprep.mubr.f32.mxu0 %v17961_v0  ;;  %v12253_v48 = vand.u32 4294901760, %v18708_v39  ;;  %v12639_v15 = vpop.permute.xlu1 %12638 }
 0x399   :  { %12078 = vmatprep.subr.mxu0 %v18619_v40  ;;  %4832 = vmatmul.mubr.f32.vlgmr.msra.gmra.mrb[0].mxu1 %v18579_v19  ;;  %v4984_v17 = vand.u32 4294901760, %v18685_v29 }
 0x39a   :  { %4841 = vmatpush1.msra.mxu1 %v18604_v34  ;;  %4904 = vmatprep.mubr.f32.mxu1 %v17961_v0  ;;  %v18704_v34 = vsub.f32 %v12165_v23, %v18690_v14  ;;  %v12254_v45 = vsub.f32 %v18708_v39, %v12253_v48 }
 0x39b   :  { %4916 = vmatprep.subr.mxu1 %v18650_v21  ;;  %v4985_v11 = vsub.f32 %v18685_v29, %v4984_v17 }
 0x39c   :  { %v12236_v47 = vand.u32 4294901760, %v18704_v34 }
 0x39d   :  { %v4986_v41 = vand.u32 4294901760, %v4985_v11 }
 0x39e   :  { %v12237_v40 = vsub.f32 %v18704_v34, %v12236_v47 }
 0x39f   :  { %12071 = vmatmul.mubr.f32.vlgmr.msra.gmra.mrb[2].mxu0 %v18588_v33 }
 0x3a0   :  { %12080 = vmatpush1.msra.mxu0 %v18624_v37  ;;  %12143 = vmatprep.mubr.f32.mxu0 %v17961_v0  ;;  %v12238_v57 = vand.u32 4294901760, %v12237_v40  ;;  %v5385_v37 = vpop.permute.xlu0 %5384 }
 0x3a1   :  { %4906 = vmatmul.mubr.f32.vlgmr.msra.gmra.mrb[0].mxu1 %v18579_v19  ;;  %12168 = vmatprep.subr.mxu0 %v18664_v42  ;;  %v5002_v19 = vsub.f32 %v18693_v27, %v5001_v18  ;;  %v5387_v61 = vsel %vm1021_vm5, %v5383_v7, %v5385_v37 }
 0x3a2   :  { %4918 = vmatpush1.msra.mxu1 %v18673_v43  ;;  %4981 = vmatprep.mubr.f32.mxu1 %v17961_v0  ;;  %v5391_v4 = vsel %vm18126_vm6, %v5387_v61, 0.0 }
 0x3a3   :  { %4998 = vmatprep.subr.mxu1 %v4997_v6  ;;  %v5003_v53 = vand.u32 4294901760, %v5002_v19  ;;  %v18759_v55 = vand.u32 4294901760, %v5391_v4 }
 0x3a4   :  { %v12637_v5 = vpop.permute.xlu0 %12636 }
 0x3a5   :  { %v12641_v56 = vsel %vm3922_vm12, %v12637_v5, %v12639_v15  ;;  %v18772_v62 = vsub.f32 %v5391_v4, %v18759_v55 }
 0x3a6   :  { %v12645_v46 = vsel %vm18126_vm6, %v12641_v56, 0.0 }
 0x3a7   :  { %12145 = vmatmul.mubr.f32.vlgmr.msra.gmra.mrb[2].mxu0 %v18588_v33  ;;  %v12255_v33 = vand.u32 4294901760, %v12254_v45  ;;  %v18776_v8 = vand.u32 4294901760, %v12645_v46  ;;  %v5477_v36 = vand.u32 4294901760, %v18772_v62  ;;  %v17495_v45 = vld [vmem:[%s19358_s3 + $0x18] sm:$0xff] }
 0x3a8   :  { %12170 = vmatpush1.msra.mxu0 %v18695_v30  ;;  %12233 = vmatprep.mubr.f32.mxu0 %v17961_v0  ;;  %v12635_v20 = vpop.permute.xlu0 %12634 }
 0x3a9   :  { %4987 = vmatmul.mubr.f32.vlgmr.msra.gmra.mrb[0].mxu1 %v4986_v41  ;;  %12250 = vmatprep.subr.mxu0 %v12249_v50  ;;  %v12640_v16 = vsel %vm3922_vm12, %v12635_v20, %v12637_v5  ;;  %v18791_v60 = vsub.f32 %v12645_v46, %v18776_v8  ;;  %v6353_v20 = vand.u32 4294901760, %v18477_v2 }
 0x3aa   :  { %5004 = vmatpush1.msra.mxu1 %v5003_v53  ;;  %5067 = vmatprep.mubr.f32.mxu1 %v17961_v0 }
 0x3ab   :  { %5077 = vmatprep.subr.mxu1 %v18660_v1  ;;  %v12644_v1 = vsel %vm18137_vm7, %v12640_v16, 0.0  ;;  %v6432_v16 = vsub.f32 %v18477_v2, %v6353_v20 }
 0x3ac   :  { %v5869_v19 = vpop.permute.xlu0 %5868 }
 0x3af   :  { %12239 = vmatmul.mubr.f32.vlgmr.msra.gmra.mrb[2].mxu0 %v12238_v57 }
 0x3b0   :  { %12256 = vmatpush1.msra.mxu0 %v12255_v33  ;;  %12319 = vmatprep.mubr.f32.mxu0 %v17961_v0  ;;  %v5879_v33 = vsel %vm74_vm0, %v17495_v45, 0 }
 0x3b1   :  { %12329 = vmatprep.subr.mxu0 %v18678_v28  ;;  %5069 = vmatmul.mubr.f32.vlgmr.msra.gmra.mrb[0].mxu1 %v18666_v51  ;;  %v18809_v28 = vand.u32 4294901760, %v12644_v1  ;;  %v18875_v59 = vand.u32 4294901760, %v5879_v33 }
 0x3b2   :  { %5080 = vmatpush1.msra.mxu1 %v18693_v27  ;;  %5143 = vmatprep.mubr.f32.mxu1 %v17961_v0 }
 0x3b3   :  { %5153 = vmatprep.subr.mxu1 %v18650_v21  ;;  %v18822_v27 = vsub.f32 %v12644_v1, %v18809_v28  ;;  %v18881_v5 = vsub.f32 %v5879_v33, %v18875_v59 }
 0x3b5   :  { %v18886_v9 = vand.u32 4294901760, %v18881_v5 }
 0x3b7   :  { %12321 = vmatmul.mubr.f32.vlgmr.msra.gmra.mrb[2].mxu0 %v18690_v14  ;;  %v5951_v46 = vsub.f32 %v18881_v5, %v18886_v9 }
 0x3b8   :  { %12332 = vmatpush1.msra.mxu0 %v18708_v39  ;;  %12395 = vmatprep.mubr.f32.mxu0 %v17961_v0 }
 0x3b9   :  { %12405 = vmatprep.subr.mxu0 %v18664_v42  ;;  %5146 = vmatmul.mubr.f32.vlgmr.msra.gmra.mrb[0].mxu1 %v18685_v29 }
 0x3ba   :  { %5155 = vmatpush1.msra.mxu1 %v18673_v43  ;;  %5218 = vmatprep.mubr.f32.mxu1 %v17961_v0 }
 0x3bb   :  { %5231 = vmatprep.subr.mxu1 %v4995_v24  ;;  %v12730_v24 = vand.u32 4294901760, %v18791_v60 }
 0x3bf   :  { %12398 = vmatmul.mubr.f32.vlgmr.msra.gmra.mrb[2].mxu0 %v18704_v34 }
 0x3c0   :  { %12407 = vmatpush1.msra.mxu0 %v18695_v30  ;;  %12470 = vmatprep.mubr.f32.mxu0 %v17961_v0 }
 0x3c1   :  { %12483 = vmatprep.subr.mxu0 %v12247_v35  ;;  %5222 = vmatmul.mubr.f32.vlgmr.msra.gmra.mrb[0].mxu1 %v4984_v17  ;;  %v5467_v17 = vsub.f32 %v18799_v44, %v18813_v26  ;;  %v12731_v35 = vsub.f32 %v18791_v60, %v12730_v24 }
 0x3c2   :  { %5235 = vmatpush1.msra.mxu1 %v5001_v18  ;;  %5298 = vmatprep.mubr.f32.mxu1 %v17961_v0 }
 0x3c3   :  { %5307 = vmatprep.subr.mxu1 %v18650_v21  ;;  %v18786_v21 = vand.u32 4294901760, %v5390_v12  ;;  %v12732_v39 = vand.u32 4294901760, %v12731_v35 }
 0x3c5   :  { %v18807_v23 = vsub.f32 %v5390_v12, %v18786_v21 }
 0x3c7   :  { %12474 = vmatmul.mubr.f32.vlgmr.msra.gmra.mrb[2].mxu0 %v12236_v47  ;;  %v5483_v29 = vand.u32 4294901760, %v18807_v23 }
 0x3c8   :  { %12487 = vmatpush1.msra.mxu0 %v12253_v48  ;;  %12550 = vmatprep.mubr.f32.mxu0 %v17961_v0 }
 0x3c9   :  { %12559 = vmatprep.subr.mxu0 %v18664_v42  ;;  %5300 = vmatmul.mubr.f32.vlgmr.msra.gmra.mrb[0].mxu1 %v18666_v51  ;;  %v5478_v42 = vsub.f32 %v18772_v62, %v5477_v36  ;;  %v5484_v18 = vsub.f32 %v18807_v23, %v5483_v29 }
 0x3ca   :  { %5309 = vmatpush1.msra.mxu1 %v18673_v43  ;;  %5372 = vmatprep.mubr.f32.mxu1 %v17961_v0  ;;  %v18818_v43 = vsub.f32 %v12648_v22, %v18804_v25  ;;  %v6355_v22 = vand.u32 4294901760, %v18475_v54 }
 0x3cb   :  { %5398 = vmatprep.subr.mxu1 %v18759_v55  ;;  %v5479_v32 = vand.u32 4294901760, %v5478_v42  ;;  %v5485_v11 = vand.u32 4294901760, %v5484_v18 }
 0x3cc   :  { %v12719_v34 = vand.u32 4294901760, %v18818_v43 }
 0x3ce   :  { %v12720_v6 = vsub.f32 %v18818_v43, %v12719_v34 }
 0x3cf   :  { %12552 = vmatmul.mubr.f32.vlgmr.msra.gmra.mrb[2].mxu0 %v18690_v14 }
 0x3d0   :  { %12561 = vmatpush1.msra.mxu0 %v18695_v30  ;;  %12624 = vmatprep.mubr.f32.mxu0 %v17961_v0  ;;  %v12736_v30 = vand.u32 4294901760, %v18822_v27  ;;  %v12721_v47 = vand.u32 4294901760, %v12720_v6 }
 0x3d1   :  { %5374 = vmatmul.mubr.f32.vlgmr.msra.gmra.mrb[0].mxu1 %v18666_v51  ;;  %12651 = vmatprep.subr.mxu0 %v18776_v8  ;;  %v18836_v51 = vand.u32 4294901760, %v5467_v17 }
 0x3d2   :  { %5400 = vmatpush1.msra.mxu1 %v18786_v21  ;;  %5463 = vmatprep.mubr.f32.mxu1 %v17961_v0  ;;  %v12737_v52 = vsub.f32 %v18822_v27, %v12736_v30 }
 0x3d3   :  { %5480 = vmatprep.subr.mxu1 %v5479_v32 }
 0x3d4   :  { %v12738_v48 = vand.u32 4294901760, %v12737_v52 }
 0x3d7   :  { %12626 = vmatmul.mubr.f32.vlgmr.msra.gmra.mrb[2].mxu0 %v18690_v14  ;;  %v5867_v14 = vpop.permute.xlu1 %5866 }
 0x3d8   :  { %12653 = vmatpush1.msra.mxu0 %v18809_v28  ;;  %12716 = vmatprep.mubr.f32.mxu0 %v17961_v0  ;;  %v5871_v41 = vsel %vm1506_vm8, %v5867_v14, %v5869_v19 }
 0x3d9   :  { %5469 = vmatmul.mubr.f32.vlgmr.msra.gmra.mrb[0].mxu1 %v18836_v51  ;;  %12733 = vmatprep.subr.mxu0 %v12732_v39  ;;  %v5875_v50 = vsel %vm18072_vm3, %v5871_v41, 0.0 }
 0x3da   :  { %5486 = vmatpush1.msra.mxu1 %v5485_v11  ;;  %5549 = vmatprep.mubr.f32.mxu1 %v17961_v0  ;;  %v5881_v53 = vand.u32 4294901760, %v5875_v50 }
 0x3db   :  { %5559 = vmatprep.subr.mxu1 %v18772_v62  ;;  %v5865_v40 = vpop.permute.xlu1 %5864  ;;  %v18895_v62 = vand.u32 4294901760, %v5951_v46 }
 0x3dc   :  { %v5870_v57 = vsel %vm1506_vm8, %v5865_v40, %v5867_v14  ;;  %v5960_v7 = vsub.f32 %v5875_v50, %v5881_v53 }
 0x3dd   :  { %v5874_v37 = vsel %vm18086_vm4, %v5870_v57, 0.0 }
 0x3de   :  { %v5883_v61 = vand.u32 4294901760, %v5874_v37  ;;  %v5961_v4 = vand.u32 4294901760, %v5960_v7 }
 0x3df   :  { %12722 = vmatmul.mubr.f32.vlgmr.msra.gmra.mrb[2].mxu0 %v12721_v47 }
 0x3e0   :  { %12739 = vmatpush1.msra.mxu0 %v12738_v48  ;;  %12802 = vmatprep.mubr.f32.mxu0 %v17961_v0  ;;  %v5966_v15 = vsub.f32 %v5874_v37, %v5883_v61  ;;  %v5962_v56 = vsub.f32 %v5960_v7, %v5961_v4 }
 0x3e1   :  { %12812 = vmatprep.subr.mxu0 %v18791_v60  ;;  %5551 = vmatmul.mubr.f32.vlgmr.msra.gmra.mrb[0].mxu1 %v18778_v13  ;;  %v6433_v60 = vand.u32 4294901760, %v6432_v16 }
 0x3e2   :  { %5562 = vmatpush1.msra.mxu1 %v18807_v23  ;;  %5625 = vmatprep.mubr.f32.mxu1 %v17961_v0  ;;  %v5963_v63 = vand.u32 4294901760, %v5962_v56 }
 0x3e3   :  { %5635 = vmatprep.subr.mxu1 %v18759_v55 }
 0x3e7   :  { %12804 = vmatmul.mubr.f32.vlgmr.msra.gmra.mrb[2].mxu0 %v18804_v25 }
 0x3e8   :  { %12815 = vmatpush1.msra.mxu0 %v18822_v27  ;;  %12878 = vmatprep.mubr.f32.mxu0 %v17961_v0  ;;  %v6829_v27 = vpop.permute.xlu0 %6828 }
 0x3e9   :  { %12888 = vmatprep.subr.mxu0 %v18776_v8  ;;  %5628 = vmatmul.mubr.f32.vlgmr.msra.gmra.mrb[0].mxu1 %v18799_v44 }
 0x3ea   :  { %5637 = vmatpush1.msra.mxu1 %v18786_v21  ;;  %5700 = vmatprep.mubr.f32.mxu1 %v17961_v0 }
 0x3eb   :  { %5713 = vmatprep.subr.mxu1 %v5477_v36  ;;  %v6438_v36 = vsub.f32 %v18475_v54, %v6355_v22  ;;  %v6831_v54 = vpop.permute.xlu1 %6830 }
 0x3ec   :  { %v6833_v32 = vsel %vm2469_vm9, %v6829_v27, %v6831_v54  ;;  %v6827_v35 = vpop.permute.xlu0 %6826 }
 0x3ed   :  { %v6439_v2 = vand.u32 4294901760, %v6438_v36  ;;  %v6837_v17 = vsel %vm18126_vm6, %v6833_v32, 0.0  ;;  %v6832_v18 = vsel %vm2469_vm9, %v6827_v35, %v6829_v27  ;;  %v17499_v35 = vld [vmem:[%s19358_s3 + $0x38] sm:$0xff] }
 0x3ee   :  { %v6836_v11 = vsel %vm18137_vm7, %v6832_v18, 0.0  ;;  %v7807_v18 = vsel %vm74_vm0, %v17499_v35, 0 }
 0x3ef   :  { %12881 = vmatmul.mubr.f32.vlgmr.msra.gmra.mrb[2].mxu0 %v18818_v43  ;;  %v6845_v47 = vand.u32 4294901760, %v6836_v11  ;;  %v7313_v37 = vpop.permute.xlu1 %7312 }
 0x3f0   :  { %12890 = vmatpush1.msra.mxu0 %v18809_v28  ;;  %12953 = vmatprep.mubr.f32.mxu0 %v17961_v0 }
 0x3f1   :  { %12966 = vmatprep.subr.mxu0 %v12730_v24  ;;  %5704 = vmatmul.mubr.f32.vlgmr.msra.gmra.mrb[0].mxu1 %v18813_v26  ;;  %v6440_v24 = vsub.f32 %v6438_v36, %v6439_v2  ;;  %v6928_v19 = vsub.f32 %v6836_v11, %v6845_v47  ;;  %v19015_v11 = vand.u32 4294901760, %v7807_v18 }
 0x3f2   :  { %5717 = vmatpush1.msra.mxu1 %v5483_v29  ;;  %5780 = vmatprep.mubr.f32.mxu1 %v17961_v0 }
 0x3f3   :  { %5789 = vmatprep.subr.mxu1 %v18759_v55  ;;  %v5967_v55 = vand.u32 4294901760, %v5966_v15  ;;  %v6441_v29 = vand.u32 4294901760, %v6440_v24  ;;  %v6929_v40 = vand.u32 4294901760, %v6928_v19  ;;  %v7311_v56 = vpop.permute.xlu1 %7310 }
 0x3f4   :  { %v7316_v46 = vsel %vm2954_vm10, %v7311_v56, %v7313_v37 }
 0x3f5   :  { %v5968_v10 = vsub.f32 %v5966_v15, %v5967_v55  ;;  %v6930_v57 = vsub.f32 %v6928_v19, %v6929_v40 }
 0x3f7   :  { %12957 = vmatmul.mubr.f32.vlgmr.msra.gmra.mrb[2].mxu0 %v12719_v34  ;;  %v5969_v12 = vand.u32 4294901760, %v5968_v10  ;;  %v17497_v34 = vld [vmem:[%s19358_s3 + $0x28] sm:$0xff]  ;;  %v7801_v27 = vpop.permute.xlu1 %7800 }
 0x3f8   :  { %12970 = vmatpush1.msra.mxu0 %v12736_v30  ;;  %13033 = vmatprep.mubr.f32.mxu0 %v17961_v0  ;;  %v6843_v30 = vand.u32 4294901760, %v6837_v17  ;;  %v6841_v39 = vsel %vm74_vm0, %v17497_v34, 0 }
 0x3f9   :  { %13042 = vmatprep.subr.mxu0 %v18776_v8  ;;  %5782 = vmatmul.mubr.f32.vlgmr.msra.gmra.mrb[0].mxu1 %v18778_v13  ;;  %v17496_v8 = vld [vmem:[%s19358_s3 + $0x20] sm:$0xff]  ;;  %v18948_v52 = vand.u32 4294901760, %v6841_v39 }
 0x3fa   :  { %5791 = vmatpush1.msra.mxu1 %v18786_v21  ;;  %5854 = vmatprep.mubr.f32.mxu1 %v17961_v0  ;;  %v6351_v49 = vsel %vm74_vm0, %v17496_v8, 0  ;;  %v6922_v6 = vsub.f32 %v6837_v17, %v6843_v30  ;;  %v7320_v8 = vsel %vm18086_vm4, %v7316_v46, 0.0 }
 0x3fb   :  { %5882 = vmatprep.subr.mxu1 %v5881_v53  ;;  %v18912_v21 = vand.u32 4294901760, %v6351_v49  ;;  %v18952_v14 = vsub.f32 %v6841_v39, %v18948_v52 }
 0x3fc   :  { %v6923_v48 = vand.u32 4294901760, %v6922_v6 }
 0x3fd   :  { %v18917_v1 = vsub.f32 %v6351_v49, %v18912_v21  ;;  %v18956_v50 = vand.u32 4294901760, %v18952_v14  ;;  %v7329_v49 = vand.u32 4294901760, %v7320_v8 }
 0x3fe   :  { %v6924_v41 = vsub.f32 %v6922_v6, %v6923_v48 }
 0x3ff   :  { %13035 = vmatmul.mubr.f32.vlgmr.msra.gmra.mrb[2].mxu0 %v18804_v25  ;;  %v18922_v23 = vand.u32 4294901760, %v18917_v1 }
 0x400   :  { %13044 = vmatpush1.msra.mxu0 %v18809_v28  ;;  %13107 = vmatprep.mubr.f32.mxu0 %v17961_v0  ;;  %v6925_v45 = vand.u32 4294901760, %v6924_v41 }
 0x401   :  { %5856 = vmatmul.mubr.f32.vlgmr.msra.gmra.mrb[0].mxu1 %v18778_v13  ;;  %v6423_v42 = vsub.f32 %v18917_v1, %v18922_v23 }
 0x402   :  { %5884 = vmatpush1.msra.mxu1 %v5883_v61  ;;  %5947 = vmatprep.mubr.f32.mxu1 %v17961_v0 }
 0x403   :  { %5964 = vmatprep.subr.mxu1 %v5963_v63  ;;  %v18928_v43 = vand.u32 4294901760, %v6423_v42 }
 0x407   :  { %13109 = vmatmul.mubr.f32.vlgmr.msra.gmra.mrb[2].mxu0 %v18804_v25  ;;  %v6434_v25 = vsub.f32 %v6432_v16, %v6433_v60 }
 0x409   :  { %5953 = vmatmul.mubr.f32.vlgmr.msra.gmra.mrb[0].mxu1 %v18895_v62  ;;  %v6435_v28 = vand.u32 4294901760, %v6434_v25 }
 0x40a   :  { %5970 = vmatpush1.msra.mxu1 %v5969_v12  ;;  %6033 = vmatprep.mubr.f32.mxu1 %v17961_v0 }
 0x40b   :  { %6043 = vmatprep.subr.mxu1 %v5960_v7  ;;  %v6931_v7 = vand.u32 4294901760, %v6930_v57 }
 0x411   :  { %6035 = vmatmul.mubr.f32.vlgmr.msra.gmra.mrb[0].mxu1 %v18875_v59 }
 0x412   :  { %6046 = vmatpush1.msra.mxu1 %v5966_v15  ;;  %6109 = vmatprep.mubr.f32.mxu1 %v17961_v0 }
 0x413   :  { %6119 = vmatprep.subr.mxu1 %v5881_v53 }
 0x419   :  { %6112 = vmatmul.mubr.f32.vlgmr.msra.gmra.mrb[0].mxu1 %v18881_v5 }
 0x41a   :  { %6121 = vmatpush1.msra.mxu1 %v5883_v61  ;;  %6184 = vmatprep.mubr.f32.mxu1 %v17961_v0 }
 0x41b   :  { %6197 = vmatprep.subr.mxu1 %v5961_v4 }
 0x421   :  { %6188 = vmatmul.mubr.f32.vlgmr.msra.gmra.mrb[0].mxu1 %v18886_v9 }
 0x422   :  { %6201 = vmatpush1.msra.mxu1 %v5967_v55  ;;  %6264 = vmatprep.mubr.f32.mxu1 %v17961_v0  ;;  %v17498_v55 = vld [vmem:[%s19358_s3 + $0x30] sm:$0xff] }
 0x423   :  { %6273 = vmatprep.subr.mxu1 %v5881_v53  ;;  %v6913_v53 = vsub.f32 %v18952_v14, %v18956_v50  ;;  %v7325_v10 = vsel %vm74_vm0, %v17498_v55, 0 }
 0x425   :  { %v18962_v33 = vand.u32 4294901760, %v6913_v53 }
 0x429   :  { %6266 = vmatmul.mubr.f32.vlgmr.msra.gmra.mrb[0].mxu1 %v18875_v59 }
 0x42a   :  { %6275 = vmatpush1.msra.mxu1 %v5883_v61  ;;  %6338 = vmatprep.mubr.f32.mxu1 %v17961_v0  ;;  %v7315_v61 = vpop.permute.xlu0 %7314 }
 0x42b   :  { %6354 = vmatprep.subr.mxu1 %v6353_v20  ;;  %v7317_v4 = vsel %vm2954_vm10, %v7313_v37, %v7315_v61 }
 0x42c   :  { %v7321_v15 = vsel %vm18072_vm3, %v7317_v4, 0.0 }
 0x42d   :  { %v7327_v63 = vand.u32 4294901760, %v7321_v15 }
 0x42e   :  { %v7799_v32 = vpop.permute.xlu0 %7798 }
 0x42f   :  { %v7406_v12 = vsub.f32 %v7321_v15, %v7327_v63  ;;  %v7803_v17 = vsel %vm3441_vm11, %v7799_v32, %v7801_v27  ;;  %v13121_v15 = vpop.permute.xlu1 %13120 }
 0x430   :  { %v19008_v34 = vand.u32 4294901760, %v7803_v17 }
 0x431   :  { %6340 = vmatmul.mubr.f32.vlgmr.msra.gmra.mrb[0].mxu1 %v18875_v59 }
 0x432   :  { %6356 = vmatpush1.msra.mxu1 %v6355_v22  ;;  %6419 = vmatprep.mubr.f32.mxu1 %v17961_v0  ;;  %v7888_v39 = vsub.f32 %v7803_v17, %v19008_v34 }
 0x433   :  { %6436 = vmatprep.subr.mxu1 %v6435_v28  ;;  %v8281_v56 = vpop.permute.xlu1 %8280 }
 0x439   :  { %6425 = vmatmul.mubr.f32.vlgmr.msra.gmra.mrb[0].mxu1 %v18928_v43 }
 0x43a   :  { %6442 = vmatpush1.msra.mxu1 %v6441_v29  ;;  %6505 = vmatprep.mubr.f32.mxu1 %v17961_v0 }
 0x43b   :  { %6515 = vmatprep.subr.mxu1 %v6432_v16  ;;  %v7407_v16 = vand.u32 4294901760, %v7406_v12 }
 0x441   :  { %6507 = vmatmul.mubr.f32.vlgmr.msra.gmra.mrb[0].mxu1 %v18912_v21 }
 0x442   :  { %6518 = vmatpush1.msra.mxu1 %v6438_v36  ;;  %6581 = vmatprep.mubr.f32.mxu1 %v17961_v0  ;;  %v7408_v36 = vsub.f32 %v7406_v12, %v7407_v16 }
 0x443   :  { %6591 = vmatprep.subr.mxu1 %v6353_v20 }
 0x444   :  { %v7409_v28 = vand.u32 4294901760, %v7408_v36 }
 0x449   :  { %6584 = vmatmul.mubr.f32.vlgmr.msra.gmra.mrb[0].mxu1 %v18917_v1 }
 0x44a   :  { %6593 = vmatpush1.msra.mxu1 %v6355_v22  ;;  %6656 = vmatprep.mubr.f32.mxu1 %v17961_v0 }
 0x44b   :  { %6669 = vmatprep.subr.mxu1 %v6433_v60  ;;  %v7412_v60 = vsub.f32 %v7320_v8, %v7329_v49 }
 0x451   :  { %6660 = vmatmul.mubr.f32.vlgmr.msra.gmra.mrb[0].mxu1 %v18922_v23 }
 0x452   :  { %6673 = vmatpush1.msra.mxu1 %v6439_v2  ;;  %6736 = vmatprep.mubr.f32.mxu1 %v17961_v0  ;;  %v7413_v2 = vand.u32 4294901760, %v7412_v60 }
 0x453   :  { %6745 = vmatprep.subr.mxu1 %v6353_v20  ;;  %v18982_v20 = vand.u32 4294901760, %v7325_v10 }
 0x454   :  { %v7414_v24 = vsub.f32 %v7412_v60, %v7413_v2 }
 0x456   :  { %v7415_v54 = vand.u32 4294901760, %v7414_v24 }
 0x459   :  { %6738 = vmatmul.mubr.f32.vlgmr.msra.gmra.mrb[0].mxu1 %v18912_v21 }
 0x45a   :  { %6747 = vmatpush1.msra.mxu1 %v6355_v22  ;;  %6810 = vmatprep.mubr.f32.mxu1 %v17961_v0  ;;  %v18986_v22 = vsub.f32 %v7325_v10, %v18982_v20 }
 0x45b   :  { %6844 = vmatprep.subr.mxu1 %v6843_v30 }
 0x45c   :  { %v18990_v25 = vand.u32 4294901760, %v18986_v22 }
 0x45e   :  { %v7397_v42 = vsub.f32 %v18986_v22, %v18990_v25 }
 0x460   :  { %v18996_v29 = vand.u32 4294901760, %v7397_v42 }
 0x461   :  { %6812 = vmatmul.mubr.f32.vlgmr.msra.gmra.mrb[0].mxu1 %v18912_v21 }
 0x462   :  { %6846 = vmatpush1.msra.mxu1 %v6845_v47  ;;  %6909 = vmatprep.mubr.f32.mxu1 %v17961_v0 }
 0x463   :  { %6926 = vmatprep.subr.mxu1 %v6925_v45 }
 0x469   :  { %6915 = vmatmul.mubr.f32.vlgmr.msra.gmra.mrb[0].mxu1 %v18962_v33 }
 0x46a   :  { %6932 = vmatpush1.msra.mxu1 %v6931_v7  ;;  %6995 = vmatprep.mubr.f32.mxu1 %v17961_v0 }
 0x46b   :  { %7005 = vmatprep.subr.mxu1 %v6922_v6 }
 0x471   :  { %6997 = vmatmul.mubr.f32.vlgmr.msra.gmra.mrb[0].mxu1 %v18948_v52 }
 0x472   :  { %7008 = vmatpush1.msra.mxu1 %v6928_v19  ;;  %7071 = vmatprep.mubr.f32.mxu1 %v17961_v0  ;;  %v19021_v19 = vsub.f32 %v7807_v18, %v19015_v11 }
 0x473   :  { %7081 = vmatprep.subr.mxu1 %v6843_v30 }
 0x474   :  { %v19027_v45 = vand.u32 4294901760, %v19021_v19 }
 0x476   :  { %v7879_v7 = vsub.f32 %v19021_v19, %v19027_v45 }
 0x478   :  { %v19034_v61 = vand.u32 4294901760, %v7879_v7  ;;  %v17511_v7 = vld [vmem:[%s19358_s3 + $0x8] sm:$0xff] }
 0x479   :  { %7074 = vmatmul.mubr.f32.vlgmr.msra.gmra.mrb[0].mxu1 %v18952_v14 }
 0x47a   :  { %7083 = vmatpush1.msra.mxu1 %v6845_v47  ;;  %7146 = vmatprep.mubr.f32.mxu1 %v17961_v0 }
 0x47b   :  { %7159 = vmatprep.subr.mxu1 %v6923_v48  ;;  %v7889_v48 = vand.u32 4294901760, %v7888_v39 }
 0x481   :  { %7150 = vmatmul.mubr.f32.vlgmr.msra.gmra.mrb[0].mxu1 %v18956_v50 }
 0x482   :  { %7163 = vmatpush1.msra.mxu1 %v6929_v40  ;;  %7226 = vmatprep.mubr.f32.mxu1 %v17961_v0  ;;  %v7890_v40 = vsub.f32 %v7888_v39, %v7889_v48 }
 0x483   :  { %7235 = vmatprep.subr.mxu1 %v6843_v30  ;;  %v7797_v30 = vpop.permute.xlu0 %7796 }
 0x484   :  { %v7802_v6 = vsel %vm3441_vm11, %v7797_v30, %v7799_v32  ;;  %v7891_v57 = vand.u32 4294901760, %v7890_v40 }
 0x487   :  { %v8279_v55 = vpop.permute.xlu0 %8278 }
 0x488   :  { %v8283_v46 = vsel %vm3922_vm12, %v8279_v55, %v8281_v56 }
 0x489   :  { %7228 = vmatmul.mubr.f32.vlgmr.msra.gmra.mrb[0].mxu1 %v18948_v52 }
 0x48a   :  { %7237 = vmatpush1.msra.mxu1 %v6845_v47  ;;  %7300 = vmatprep.mubr.f32.mxu1 %v17961_v0  ;;  %v19017_v47 = vand.u32 4294901760, %v7802_v6 }
 0x48b   :  { %7328 = vmatprep.subr.mxu1 %v7327_v63  ;;  %v8277_v36 = vpop.permute.xlu0 %8276 }
 0x48c   :  { %v7894_v41 = vsub.f32 %v7802_v6, %v19017_v47  ;;  %v8282_v42 = vsel %vm3922_vm12, %v8277_v36, %v8279_v55 }
 0x48e   :  { %v7895_v53 = vand.u32 4294901760, %v7894_v41 }
 0x490   :  { %v7896_v37 = vsub.f32 %v7894_v41, %v7895_v53 }
 0x491   :  { %7302 = vmatmul.mubr.f32.vlgmr.msra.gmra.mrb[0].mxu1 %v18948_v52 }
 0x492   :  { %7330 = vmatpush1.msra.mxu1 %v7329_v49  ;;  %7393 = vmatprep.mubr.f32.mxu1 %v17961_v0  ;;  %v7897_v4 = vand.u32 4294901760, %v7896_v37  ;;  %v13160_v37 = vsel %vm74_vm0, %v17511_v7, 0 }
 0x493   :  { %7410 = vmatprep.subr.mxu1 %v7409_v28 }
 0x499   :  { %7399 = vmatmul.mubr.f32.vlgmr.msra.gmra.mrb[0].mxu1 %v18996_v29 }
 0x49a   :  { %7416 = vmatpush1.msra.mxu1 %v7415_v54  ;;  %7479 = vmatprep.mubr.f32.mxu1 %v17961_v0  ;;  %v8286_v54 = vsel %vm18137_vm7, %v8282_v42, 0.0 }
 0x49b   :  { %7489 = vmatprep.subr.mxu1 %v7406_v12  ;;  %v8295_v17 = vand.u32 4294901760, %v8286_v54 }
 0x49d   :  { %v8378_v30 = vsub.f32 %v8286_v54, %v8295_v17 }
 0x49f   :  { %v8379_v6 = vand.u32 4294901760, %v8378_v30 }
 0x4a1   :  { %7481 = vmatmul.mubr.f32.vlgmr.msra.gmra.mrb[0].mxu1 %v18982_v20 }
 0x4a2   :  { %7492 = vmatpush1.msra.mxu1 %v7412_v60  ;;  %7555 = vmatprep.mubr.f32.mxu1 %v17961_v0 }
 0x4a3   :  { %7565 = vmatprep.subr.mxu1 %v7327_v63 }
 0x4a9   :  { %7558 = vmatmul.mubr.f32.vlgmr.msra.gmra.mrb[0].mxu1 %v18986_v22 }
 0x4aa   :  { %7567 = vmatpush1.msra.mxu1 %v7329_v49  ;;  %7630 = vmatprep.mubr.f32.mxu1 %v17961_v0 }
 0x4ab   :  { %7643 = vmatprep.subr.mxu1 %v7407_v16  ;;  %v8287_v16 = vsel %vm18126_vm6, %v8283_v46, 0.0 }
 0x4ac   :  { %v19058_v28 = vand.u32 4294901760, %v8287_v16 }
 0x4ae   :  { %v8372_v27 = vsub.f32 %v8287_v16, %v19058_v28 }
 0x4b0   :  { %v8373_v35 = vand.u32 4294901760, %v8372_v27 }
 0x4b1   :  { %7634 = vmatmul.mubr.f32.vlgmr.msra.gmra.mrb[0].mxu1 %v18990_v25 }
 0x4b2   :  { %7647 = vmatpush1.msra.mxu1 %v7413_v2  ;;  %7710 = vmatprep.mubr.f32.mxu1 %v17961_v0  ;;  %v17500_v2 = vld [vmem:[%s19358_s3 + $0x40] sm:$0xff]  ;;  %v8374_v18 = vsub.f32 %v8372_v27, %v8373_v35 }
 0x4b3   :  { %7719 = vmatprep.subr.mxu1 %v7327_v63  ;;  %v8291_v24 = vsel %vm74_vm0, %v17500_v2, 0 }
 0x4b4   :  { %v19072_v32 = vand.u32 4294901760, %v8291_v24 }
 0x4b9   :  { %7712 = vmatmul.mubr.f32.vlgmr.msra.gmra.mrb[0].mxu1 %v18982_v20 }
 0x4ba   :  { %7721 = vmatpush1.msra.mxu1 %v7329_v49  ;;  %7784 = vmatprep.mubr.f32.mxu1 %v17961_v0 }
 0x4bb   :  { %7810 = vmatprep.subr.mxu1 %v19008_v34 }
 0x4c1   :  { %7786 = vmatmul.mubr.f32.vlgmr.msra.gmra.mrb[0].mxu1 %v18982_v20 }
 0x4c2   :  { %7812 = vmatpush1.msra.mxu1 %v19017_v47  ;;  %7875 = vmatprep.mubr.f32.mxu1 %v17961_v0 }
 0x4c3   :  { %7892 = vmatprep.subr.mxu1 %v7891_v57  ;;  %v8760_v57 = vld [vmem:[%s19359_s4] sm:$0xff] }
 0x4c9   :  { %7881 = vmatmul.mubr.f32.vlgmr.msra.gmra.mrb[0].mxu1 %v19034_v61 }
 0x4ca   :  { %7898 = vmatpush1.msra.mxu1 %v7897_v4  ;;  %7961 = vmatprep.mubr.f32.mxu1 %v17961_v0  ;;  %v19151_v4 = vand.u32 4294901760, %v13160_v37 }
 0x4cb   :  { %7971 = vmatprep.subr.mxu1 %v7888_v39 }
 0x4d1   :  { %7963 = vmatmul.mubr.f32.vlgmr.msra.gmra.mrb[0].mxu1 %v19015_v11 }
 0x4d2   :  { %7974 = vmatpush1.msra.mxu1 %v7894_v41  ;;  %8037 = vmatprep.mubr.f32.mxu1 %v17961_v0  ;;  %v8380_v41 = vsub.f32 %v8378_v30, %v8379_v6 }
 0x4d3   :  { %8047 = vmatprep.subr.mxu1 %v19008_v34 }
 0x4d9   :  { %8040 = vmatmul.mubr.f32.vlgmr.msra.gmra.mrb[0].mxu1 %v19021_v19 }
 0x4da   :  { %8049 = vmatpush1.msra.mxu1 %v19017_v47  ;;  %v13110_v63 = vpop.f32.mrb[2].mxu0  ;;  %8112 = vmatprep.mubr.f32.mxu1 %v17961_v0 }
 0x4db   :  { %8125 = vmatprep.subr.mxu1 %v7889_v48  ;;  %v13123_v10 = vadd.f32 %v13121_v15, %v13110_v63  ;;  %v13112_v12 = vpop.f32.mrb[3].mxu0 }
 0x4dc   :  { %v13124_v8 = vadd.f32 %v13121_v15, %v13112_v12  ;;  %v13230_v15 = vsub.f32 %v13160_v37, %v19151_v4 }
 0x4dd   :  { %v19045_v49 = vmax.f32 %v13123_v10, 0.0 }
 0x4de   :  { %v19049_v60 = vmax.f32 %v13124_v8, 0.0  ;;  %v13231_v56 = vand.u32 4294901760, %v13230_v15 }
 0x4df   :  { %13151 = vrot.lane.b32.xlu1 %v19045_v49, %s17962_s18 }
 0x4e0   :  { %13153 = vrot.lane.b32.xlu0 %v19049_v60, %s17962_s18  ;;  %v13232_v46 = vsub.f32 %v13230_v15, %v13231_v56 }
 0x4e1   :  { %8116 = vmatmul.mubr.f32.vlgmr.msra.gmra.mrb[0].mxu1 %v19027_v45 }
 0x4e2   :  { %8129 = vmatpush1.msra.mxu1 %v7895_v53  ;;  %8192 = vmatprep.mubr.f32.mxu1 %v17961_v0  ;;  %v8381_v53 = vand.u32 4294901760, %v8380_v41  ;;  %v13233_v2 = vand.u32 4294901760, %v13232_v46  ;;  %v13147_v46 = vld [vmem:[%s19358_s3] sm:$0xff] }
 0x4e3   :  { %8201 = vmatprep.subr.mxu1 %v19008_v34  ;;  %13149 = vrot.lane.b32.xlu1 %v17961_v0, %s17962_s18  ;;  %v19080_v34 = vsub.f32 %v8291_v24, %v19072_v32 }
 0x4e4   :  { %13137 = vrot.lane.b32.xlu0 %v19045_v49, %s17963_s23 }
 0x4e5   :  { %v19090_v39 = vand.u32 4294901760, %v19080_v34 }
 0x4e7   :  { %13139 = vrot.lane.b32.xlu1 %v19049_v60, %s17963_s23  ;;  %v8363_v48 = vsub.f32 %v19080_v34, %v19090_v39 }
 0x4e8   :  { %13135 = vrot.lane.b32.xlu0 %v17961_v0, %s17963_s23 }
 0x4e9   :  { %8194 = vmatmul.mubr.f32.vlgmr.msra.gmra.mrb[0].mxu1 %v19015_v11  ;;  %v19104_v40 = vand.u32 4294901760, %v8363_v48 }
 0x4ea   :  { %8203 = vmatpush1.msra.mxu1 %v19017_v47  ;;  %8266 = vmatprep.mubr.f32.mxu1 %v17961_v0  ;;  %v8375_v47 = vand.u32 4294901760, %v8374_v18 }
 0x4eb   :  { %8294 = vmatprep.subr.mxu1 %v19058_v28  ;;  %14097 = vrot.lane.b32.xlu1 %v19045_v49, %s17964_s24 }
 0x4ec   :  { %14099 = vrot.lane.b32.xlu0 %v19049_v60, %s17964_s24 }
 0x4ef   :  { %14095 = vrot.lane.b32.xlu1 %v17961_v0, %s17964_s24 }
 0x4f0   :  { %14580 = vrot.lane.b32.xlu0 %v19045_v49, %s17965_s25 }
 0x4f1   :  { %8268 = vmatmul.mubr.f32.vlgmr.msra.gmra.mrb[0].mxu1 %v19015_v11 }
 0x4f2   :  { %8296 = vmatpush1.msra.mxu1 %v8295_v17  ;;  %8359 = vmatprep.mubr.f32.mxu1 %v17961_v0 }
 0x4f3   :  { %8376 = vmatprep.subr.mxu1 %v8375_v47  ;;  %14582 = vrot.lane.b32.xlu1 %v19049_v60, %s17965_s25 }
 0x4f4   :  { %14578 = vrot.lane.b32.xlu0 %v17961_v0, %s17965_s25 }
 0x4f7   :  { %15540 = vrot.lane.b32.xlu1 %v19049_v60, %s17966_s28 }
 0x4f8   :  { %15542 = vrot.lane.b32.xlu0 %v17961_v0, %s17966_s28 }
 0x4f9   :  { %8365 = vmatmul.mubr.f32.vlgmr.msra.gmra.mrb[0].mxu1 %v19104_v40 }
 0x4fa   :  { %8382 = vmatpush1.msra.mxu1 %v8381_v53  ;;  %8445 = vmatprep.mubr.f32.mxu1 %v17961_v0 }
 0x4fb   :  { %8455 = vmatprep.subr.mxu1 %v8372_v27  ;;  %15538 = vrot.lane.b32.xlu1 %v19045_v49, %s17966_s28 }
 0x4fc   :  { %16023 = vrot.lane.b32.xlu0 %v19049_v60, %s17967_s6 }
 0x4ff   :  { %16025 = vrot.lane.b32.xlu1 %v17961_v0, %s17967_s6 }
 0x500   :  { %16021 = vrot.lane.b32.xlu0 %v19045_v49, %s17967_s6 }
 0x501   :  { %8447 = vmatmul.mubr.f32.vlgmr.msra.gmra.mrb[0].mxu1 %v19072_v32 }
 0x502   :  { %8458 = vmatpush1.msra.mxu1 %v8378_v30  ;;  %8521 = vmatprep.mubr.f32.mxu1 %v17961_v0 }
 0x503   :  { %8531 = vmatprep.subr.mxu1 %v19058_v28  ;;  %16507 = vrot.lane.b32.xlu1 %v19049_v60, %s17968_s9 }
 0x504   :  { %16509 = vrot.lane.b32.xlu0 %v17961_v0, %s17968_s9 }
 0x507   :  { %16505 = vrot.lane.b32.xlu1 %v19045_v49, %s17968_s9 }
 0x508   :  { %16987 = vrot.lane.b32.xlu0 %v19049_v60, %s17969_s12 }
 0x509   :  { %8524 = vmatmul.mubr.f32.vlgmr.msra.gmra.mrb[0].mxu1 %v19080_v34 }
 0x50a   :  { %8533 = vmatpush1.msra.mxu1 %v8295_v17  ;;  %8596 = vmatprep.mubr.f32.mxu1 %v17961_v0 }
 0x50b   :  { %8609 = vmatprep.subr.mxu1 %v8373_v35  ;;  %16989 = vrot.lane.b32.xlu1 %v17961_v0, %s17969_s12 }
 0x50c   :  { %16985 = vrot.lane.b32.xlu0 %v19045_v49, %s17969_s12 }
 0x50f   :  { %8763 = vperm.xlu1 %17956, %v8760_v57  }
 0x510   :  { %17471 = vperm.xlu0 %17955, %v8760_v57  }
 0x511   :  { %8600 = vmatmul.mubr.f32.vlgmr.msra.gmra.mrb[0].mxu1 %v19090_v39 }
 0x512   :  { %8613 = vmatpush1.msra.mxu1 %v8379_v6  ;;  %8676 = vmatprep.mubr.f32.mxu1 %v17961_v0 }
 0x513   :  { %8685 = vmatprep.subr.mxu1 %v19058_v28 }
 0x519   :  { %8678 = vmatmul.mubr.f32.vlgmr.msra.gmra.mrb[0].mxu1 %v19072_v32 }
 0x51a   :  { %8687 = vmatpush1.msra.mxu1 %v8295_v17  ;;  %8750 = vmatprep.mubr.f32.mxu1 %v17961_v0 }
 0x521   :  { %8752 = vmatmul.mubr.f32.vlgmr.msra.gmra.mrb[0].mxu1 %v19072_v32 }
 0x522   :  { %13228 = vmatprep.mubr.f32.mxu1 %v17961_v0 }
 0x551   :  { %v13152_v55 = vpop.permute.xlu1 %13151 }
 0x552   :  { %v13154_v63 = vpop.permute.xlu0 %13153 }
 0x553   :  { %v13156_v10 = vsel %vm69_vm1, %v13152_v55, %v13154_v63 }
 0x554   :  { %v13162_v12 = vand.u32 4294901760, %v13156_v10 }
 0x555   :  { %v13150_v8 = vpop.permute.xlu1 %13149 }
 0x556   :  { %v13241_v16 = vsub.f32 %v13156_v10, %v13162_v12  ;;  %v13155_v36 = vsel %vm69_vm1, %v13150_v8, %v13152_v55  ;;  %13163 = vmatprep.subr.mxu1 %v13162_v12  ;;  %v13138_v53 = vpop.permute.xlu0 %13137 }
 0x557   :  { %v13164_v28 = vand.u32 4294901760, %v13155_v36 }
 0x558   :  { %v13242_v42 = vand.u32 4294901760, %v13241_v16 }
 0x559   :  { %v13247_v24 = vsub.f32 %v13155_v36, %v13164_v28  ;;  %v13140_v54 = vpop.permute.xlu1 %13139  ;;  %13165 = vmatpush1.msra.mxu1 %v13164_v28 }
 0x55a   :  { %13234 = vmatmul.mubr.f32.vlgmr.msra.gmra.mrb[2].mxu1 %v13233_v2  ;;  %v13243_v27 = vsub.f32 %v13241_v16, %v13242_v42  ;;  %v13142_v57 = vsel %vm53_vm2, %v13138_v53, %v13140_v54  ;;  %v13136_v63 = vpop.permute.xlu0 %13135 }
 0x55b   :  { %v13248_v17 = vand.u32 4294901760, %v13247_v24  ;;  %13314 = vmatprep.mubr.f32.mxu1 %v17961_v0  ;;  %v13146_v55 = vsel %vm18072_vm3, %v13142_v57, 0.0  ;;  %v13141_v8 = vsel %vm53_vm2, %v13136_v63, %v13138_v53 }
 0x55c   :  { %v13244_v35 = vand.u32 4294901760, %v13243_v27  ;;  %v13630_v10 = vand.u32 4294901760, %v13146_v55 }
 0x55d   :  { %v13249_v30 = vsub.f32 %v13247_v24, %v13248_v17  ;;  %v19157_v18 = vpop.permute.xlu1 %14097 }
 0x55e   :  { %13245 = vmatprep.subr.mxu1 %v13244_v35  ;;  %v13709_v2 = vsub.f32 %v13146_v55, %v13630_v10 }
 0x55f   :  { %v13250_v6 = vand.u32 4294901760, %v13249_v30 }
 0x561   :  { %v19159_v47 = vpop.permute.xlu1 %14095  ;;  %13251 = vmatpush1.msra.mxu1 %v13250_v6 }
 0x562   :  { %13316 = vmatmul.mubr.f32.vlgmr.msra.gmra.mrb[2].mxu1 %v19151_v4  ;;  %13324 = vmatprep.subr.mxu1 %v13241_v16  ;;  %v13628_v16 = vsel %vm74_vm0, %v13147_v46, 0 }
 0x563   :  { %13327 = vmatpush1.msra.mxu1 %v13247_v24  ;;  %13390 = vmatprep.mubr.f32.mxu1 %v17961_v0  ;;  %v13697_v24 = vand.u32 4294901760, %v13628_v16 }
 0x564   :  { %13400 = vmatprep.subr.mxu1 %v13162_v12 }
 0x565   :  { %v19163_v48 = vpop.permute.xlu1 %14582  ;;  %v13698_v35 = vsub.f32 %v13628_v16, %v13697_v24 }
 0x567   :  { %v13699_v6 = vand.u32 4294901760, %v13698_v35 }
 0x569   :  { %v19165_v41 = vpop.permute.xlu1 %15540 }
 0x56a   :  { %13393 = vmatmul.mubr.f32.vlgmr.msra.gmra.mrb[2].mxu1 %v13230_v15 }
 0x56b   :  { %13402 = vmatpush1.msra.mxu1 %v13164_v28  ;;  %13465 = vmatprep.mubr.f32.mxu1 %v17961_v0 }
 0x56c   :  { %13478 = vmatprep.subr.mxu1 %v13242_v42  ;;  %v13145_v42 = vsel %vm18086_vm4, %v13141_v8, 0.0 }
 0x56d   :  { %v15539_v7 = vpop.permute.xlu1 %15538  ;;  %v13632_v54 = vand.u32 4294901760, %v13145_v42 }
 0x56e   :  { %v19171_v37 = vsel %vm2469_vm9, %v15539_v7, %v19165_v41  ;;  %v13700_v7 = vsub.f32 %v13698_v35, %v13699_v6 }
 0x570   :  { %v13701_v63 = vand.u32 4294901760, %v13700_v7 }
 0x571   :  { %v19178_v15 = vpop.permute.xlu1 %16025 }
 0x572   :  { %13469 = vmatmul.mubr.f32.vlgmr.msra.gmra.mrb[2].mxu1 %v13231_v56 }
 0x573   :  { %13482 = vmatpush1.msra.mxu1 %v13248_v17  ;;  %13545 = vmatprep.mubr.f32.mxu1 %v17961_v0  ;;  %v13710_v17 = vand.u32 4294901760, %v13709_v2 }
 0x574   :  { %13554 = vmatprep.subr.mxu1 %v13162_v12  ;;  %v13715_v12 = vsub.f32 %v13145_v42, %v13632_v54 }
 0x575   :  { %v19183_v36 = vpop.permute.xlu1 %16507  ;;  %v13711_v30 = vsub.f32 %v13709_v2, %v13710_v17 }
 0x576   :  { %v13716_v53 = vand.u32 4294901760, %v13715_v12 }
 0x577   :  { %v13712_v57 = vand.u32 4294901760, %v13711_v30 }
 0x578   :  { %v13717_v55 = vsub.f32 %v13715_v12, %v13716_v53 }
 0x579   :  { %v16506_v27 = vpop.permute.xlu1 %16505 }
 0x57a   :  { %v19189_v56 = vsel %vm3441_vm11, %v16506_v27, %v19183_v36  ;;  %13547 = vmatmul.mubr.f32.vlgmr.msra.gmra.mrb[2].mxu1 %v19151_v4  ;;  %v13718_v46 = vand.u32 4294901760, %v13717_v55 }
 0x57b   :  { %13556 = vmatpush1.msra.mxu1 %v13164_v28  ;;  %13619 = vmatprep.mubr.f32.mxu1 %v17961_v0 }
 0x57c   :  { %13631 = vmatprep.subr.mxu1 %v13630_v10 }
 0x582   :  { %13621 = vmatmul.mubr.f32.vlgmr.msra.gmra.mrb[2].mxu1 %v19151_v4  ;;  %v14100_v4 = vpop.permute.xlu0 %14099 }
 0x583   :  { %13633 = vmatpush1.msra.mxu1 %v13632_v54  ;;  %13696 = vmatprep.mubr.f32.mxu1 %v17961_v0  ;;  %v14102_v28 = vsel %vm1021_vm5, %v19157_v18, %v14100_v4 }
 0x584   :  { %13713 = vmatprep.subr.mxu1 %v13712_v57  ;;  %v14106_v8 = vsel %vm18126_vm6, %v14102_v28, 0.0 }
 0x585   :  { %v14111_v16 = vand.u32 4294901760, %v14106_v8 }
 0x587   :  { %v14190_v42 = vsub.f32 %v14106_v8, %v14111_v16 }
 0x58a   :  { %13702 = vmatmul.mubr.f32.vlgmr.msra.gmra.mrb[2].mxu1 %v13701_v63 }
 0x58b   :  { %13719 = vmatpush1.msra.mxu1 %v13718_v46  ;;  %13782 = vmatprep.mubr.f32.mxu1 %v17961_v0 }
 0x58c   :  { %13792 = vmatprep.subr.mxu1 %v13709_v2  ;;  %v14101_v2 = vsel %vm1021_vm5, %v19159_v47, %v19157_v18 }
 0x58d   :  { %v14105_v27 = vsel %vm18137_vm7, %v14101_v2, 0.0  ;;  %v19231_v2 = vpop.permute.xlu1 %16989 }
 0x592   :  { %13784 = vmatmul.mubr.f32.vlgmr.msra.gmra.mrb[2].mxu1 %v13697_v24 }
 0x593   :  { %13795 = vmatpush1.msra.mxu1 %v13715_v12  ;;  %13858 = vmatprep.mubr.f32.mxu1 %v17961_v0 }
 0x594   :  { %13868 = vmatprep.subr.mxu1 %v13630_v10 }
 0x59a   :  { %13861 = vmatmul.mubr.f32.vlgmr.msra.gmra.mrb[2].mxu1 %v13698_v35  ;;  %v14113_v35 = vand.u32 4294901760, %v14105_v27 }
 0x59b   :  { %13870 = vmatpush1.msra.mxu1 %v13632_v54  ;;  %13933 = vmatprep.mubr.f32.mxu1 %v17961_v0 }
 0x59c   :  { %13946 = vmatprep.subr.mxu1 %v13710_v17  ;;  %v14191_v17 = vand.u32 4294901760, %v14190_v42  ;;  %v14196_v12 = vsub.f32 %v14105_v27, %v14113_v35 }
 0x59e   :  { %v14192_v30 = vsub.f32 %v14190_v42, %v14191_v17 }
 0x5a0   :  { %v14193_v18 = vand.u32 4294901760, %v14192_v30  ;;  %v17958_v30 = vld [vmem:[%s19355_s0 + $0x8] sm:$0xff] }
 0x5a2   :  { %13937 = vmatmul.mubr.f32.vlgmr.msra.gmra.mrb[2].mxu1 %v13699_v6  ;;  %v14197_v6 = vand.u32 4294901760, %v14196_v12 }
 0x5a3   :  { %13950 = vmatpush1.msra.mxu1 %v13716_v53  ;;  %14013 = vmatprep.mubr.f32.mxu1 %v17961_v0 }
 0x5a4   :  { %14022 = vmatprep.subr.mxu1 %v13630_v10  ;;  %v14198_v47 = vsub.f32 %v14196_v12, %v14197_v6 }
 0x5a6   :  { %v14199_v10 = vand.u32 4294901760, %v14198_v47 }
 0x5aa   :  { %14015 = vmatmul.mubr.f32.vlgmr.msra.gmra.mrb[2].mxu1 %v13697_v24 }
 0x5ab   :  { %14024 = vmatpush1.msra.mxu1 %v13632_v54  ;;  %14087 = vmatprep.mubr.f32.mxu1 %v17961_v0 }
 0x5ac   :  { %14112 = vmatprep.subr.mxu1 %v14111_v16 }
 0x5b2   :  { %14089 = vmatmul.mubr.f32.vlgmr.msra.gmra.mrb[2].mxu1 %v13697_v24  ;;  %v14581_v24 = vpop.permute.xlu0 %14580 }
 0x5b3   :  { %14114 = vmatpush1.msra.mxu1 %v14113_v35  ;;  %14177 = vmatprep.mubr.f32.mxu1 %v17961_v0  ;;  %v14585_v54 = vsel %vm1506_vm8, %v14581_v24, %v19163_v48 }
 0x5b4   :  { %14194 = vmatprep.subr.mxu1 %v14193_v18  ;;  %v15065_v18 = vand.u32 4294901760, %v19049_v60 }
 0x5b6   :  { %v14579_v53 = vpop.permute.xlu0 %14578  ;;  %v15144_v47 = vsub.f32 %v19049_v60, %v15065_v18 }
 0x5b7   :  { %v14584_v7 = vsel %vm1506_vm8, %v14579_v53, %v14581_v24 }
 0x5b8   :  { %v14588_v55 = vsel %vm18086_vm4, %v14584_v7, 0.0  ;;  %v15145_v24 = vand.u32 4294901760, %v15144_v47 }
 0x5b9   :  { %v14596_v63 = vand.u32 4294901760, %v14588_v55 }
 0x5ba   :  { %14183 = vmatmul.mubr.f32.vlgmr.msra.gmra.mrb[2].mxu1 %v18836_v51  ;;  %v14589_v51 = vsel %vm18072_vm3, %v14585_v54, 0.0 }
 0x5bb   :  { %14200 = vmatpush1.msra.mxu1 %v14199_v10  ;;  %14263 = vmatprep.mubr.f32.mxu1 %v17961_v0  ;;  %v14594_v57 = vand.u32 4294901760, %v14589_v51  ;;  %v14679_v46 = vsub.f32 %v14588_v55, %v14596_v63  ;;  %v15067_v10 = vand.u32 4294901760, %v19045_v49 }
 0x5bc   :  { %14273 = vmatprep.subr.mxu1 %v14190_v42 }
 0x5bd   :  { %v14680_v4 = vand.u32 4294901760, %v14679_v46 }
 0x5bf   :  { %v14681_v8 = vsub.f32 %v14679_v46, %v14680_v4 }
 0x5c2   :  { %14265 = vmatmul.mubr.f32.vlgmr.msra.gmra.mrb[2].mxu1 %v18778_v13 }
 0x5c3   :  { %14276 = vmatpush1.msra.mxu1 %v14196_v12  ;;  %14339 = vmatprep.mubr.f32.mxu1 %v17961_v0 }
 0x5c4   :  { %14349 = vmatprep.subr.mxu1 %v14111_v16 }
 0x5ca   :  { %14342 = vmatmul.mubr.f32.vlgmr.msra.gmra.mrb[2].mxu1 %v18799_v44  ;;  %v14673_v44 = vsub.f32 %v14589_v51, %v14594_v57 }
 0x5cb   :  { %14351 = vmatpush1.msra.mxu1 %v14113_v35  ;;  %14414 = vmatprep.mubr.f32.mxu1 %v17961_v0 }
 0x5cc   :  { %14427 = vmatprep.subr.mxu1 %v14191_v17  ;;  %v14674_v48 = vand.u32 4294901760, %v14673_v44 }
 0x5d2   :  { %14418 = vmatmul.mubr.f32.vlgmr.msra.gmra.mrb[2].mxu1 %v18813_v26  ;;  %v14675_v26 = vsub.f32 %v14673_v44, %v14674_v48 }
 0x5d3   :  { %14431 = vmatpush1.msra.mxu1 %v14197_v6  ;;  %14494 = vmatprep.mubr.f32.mxu1 %v17961_v0 }
 0x5d4   :  { %14503 = vmatprep.subr.mxu1 %v14111_v16  ;;  %v14676_v28 = vand.u32 4294901760, %v14675_v26  ;;  %v14682_v16 = vand.u32 4294901760, %v14681_v8 }
 0x5da   :  { %14496 = vmatmul.mubr.f32.vlgmr.msra.gmra.mrb[2].mxu1 %v18778_v13 }
 0x5db   :  { %14505 = vmatpush1.msra.mxu1 %v14113_v35  ;;  %14568 = vmatprep.mubr.f32.mxu1 %v17961_v0 }
 0x5dc   :  { %14595 = vmatprep.subr.mxu1 %v14594_v57 }
 0x5e2   :  { %14570 = vmatmul.mubr.f32.vlgmr.msra.gmra.mrb[2].mxu1 %v18778_v13  ;;  %v8764_v13 = vpop.permute.xlu1 %8763 }
 0x5e3   :  { %14597 = vmatpush1.msra.mxu1 %v14596_v63  ;;  %14660 = vmatprep.mubr.f32.mxu1 %v17961_v0 }
 0x5e4   :  { %14677 = vmatprep.subr.mxu1 %v14676_v28 }
 0x5ea   :  { %14666 = vmatmul.mubr.f32.vlgmr.msra.gmra.mrb[2].mxu1 %v18895_v62  ;;  %v17957_v62 = vld [vmem:[%s19355_s0] sm:$0xff] }
 0x5eb   :  { %14683 = vmatpush1.msra.mxu1 %v14682_v16  ;;  %14746 = vmatprep.mubr.f32.mxu1 %v17961_v0 }
 0x5ec   :  { %14756 = vmatprep.subr.mxu1 %v14673_v44 }
 0x5f2   :  { %14748 = vmatmul.mubr.f32.vlgmr.msra.gmra.mrb[2].mxu1 %v18875_v59 }
 0x5f3   :  { %14759 = vmatpush1.msra.mxu1 %v14679_v46  ;;  %14822 = vmatprep.mubr.f32.mxu1 %v17961_v0 }
 0x5f4   :  { %14832 = vmatprep.subr.mxu1 %v14594_v57  ;;  %v8753_v42 = vpop.f32.mrb[0].mxu1 }
 0x5f5   :  { %v8766_v27 = vadd.f32 %v8764_v13, %v8753_v42  ;;  %v8755_v35 = vpop.f32.mrb[1].mxu1 }
 0x5f6   :  { %v8767_v17 = vadd.f32 %v8764_v13, %v8755_v35 }
 0x5f7   :  { %v8768_v12 = vadd.f32 %v17957_v62, %v8766_v27 }
 0x5f8   :  { %v8769_v6 = vadd.f32 %v17958_v30, %v8767_v17 }
 0x5f9   :  { %8770 = vst [vmem:[%s19360_s5] sm:$0xff] %v8768_v12  ;;  %v16520_v12 = vand.u32 4294901760, %v19189_v56 }
 0x5fa   :  { %8771 = vst [vmem:[%s19360_s5 + $0x8] sm:$0xff] %v8769_v6  ;;  %14825 = vmatmul.mubr.f32.vlgmr.msra.gmra.mrb[2].mxu1 %v18881_v5  ;;  %v15150_v5 = vsub.f32 %v19045_v49, %v15067_v10 }
 0x5fb   :  { %14834 = vmatpush1.msra.mxu1 %v14596_v63  ;;  %14897 = vmatprep.mubr.f32.mxu1 %v17961_v0  ;;  %v16603_v30 = vsub.f32 %v19189_v56, %v16520_v12 }
 0x5fc   :  { %14910 = vmatprep.subr.mxu1 %v14674_v48  ;;  %v15151_v54 = vand.u32 4294901760, %v15150_v5 }
 0x5fd   :  { %v16604_v6 = vand.u32 4294901760, %v16603_v30 }
 0x5fe   :  { %v15152_v60 = vsub.f32 %v15150_v5, %v15151_v54 }
 0x600   :  { %v15153_v53 = vand.u32 4294901760, %v15152_v60 }
 0x602   :  { %14901 = vmatmul.mubr.f32.vlgmr.msra.gmra.mrb[2].mxu1 %v18886_v9  ;;  %v15146_v9 = vsub.f32 %v15144_v47, %v15145_v24 }
 0x603   :  { %14914 = vmatpush1.msra.mxu1 %v14680_v4  ;;  %14977 = vmatprep.mubr.f32.mxu1 %v17961_v0 }
 0x604   :  { %14986 = vmatprep.subr.mxu1 %v14594_v57  ;;  %v15147_v51 = vand.u32 4294901760, %v15146_v9 }
 0x60a   :  { %14979 = vmatmul.mubr.f32.vlgmr.msra.gmra.mrb[2].mxu1 %v18875_v59 }
 0x60b   :  { %14988 = vmatpush1.msra.mxu1 %v14596_v63  ;;  %15051 = vmatprep.mubr.f32.mxu1 %v17961_v0 }
 0x60c   :  { %15066 = vmatprep.subr.mxu1 %v15065_v18 }
 0x612   :  { %15053 = vmatmul.mubr.f32.vlgmr.msra.gmra.mrb[2].mxu1 %v18875_v59  ;;  %v15543_v59 = vpop.permute.xlu0 %15542 }
 0x613   :  { %15068 = vmatpush1.msra.mxu1 %v15067_v10  ;;  %15131 = vmatprep.mubr.f32.mxu1 %v17961_v0  ;;  %v15545_v49 = vsel %vm2469_vm9, %v19165_v41, %v15543_v59 }
 0x614   :  { %15148 = vmatprep.subr.mxu1 %v15147_v51 }
 0x61a   :  { %15137 = vmatmul.mubr.f32.vlgmr.msra.gmra.mrb[2].mxu1 %v18928_v43  ;;  %v15549_v43 = vsel %vm18126_vm6, %v15545_v49, 0.0 }
 0x61b   :  { %15154 = vmatpush1.msra.mxu1 %v15153_v53  ;;  %15217 = vmatprep.mubr.f32.mxu1 %v17961_v0  ;;  %v15554_v57 = vand.u32 4294901760, %v15549_v43 }
 0x61c   :  { %15227 = vmatprep.subr.mxu1 %v15144_v47 }
 0x61d   :  { %v15633_v7 = vsub.f32 %v15549_v43, %v15554_v57 }
 0x61f   :  { %v15634_v41 = vand.u32 4294901760, %v15633_v7 }
 0x621   :  { %v15635_v63 = vsub.f32 %v15633_v7, %v15634_v41 }
 0x622   :  { %15219 = vmatmul.mubr.f32.vlgmr.msra.gmra.mrb[2].mxu1 %v18912_v21 }
 0x623   :  { %15230 = vmatpush1.msra.mxu1 %v15150_v5  ;;  %15293 = vmatprep.mubr.f32.mxu1 %v17961_v0  ;;  %v15636_v48 = vand.u32 4294901760, %v15635_v63 }
 0x624   :  { %15303 = vmatprep.subr.mxu1 %v15065_v18 }
 0x62a   :  { %15296 = vmatmul.mubr.f32.vlgmr.msra.gmra.mrb[2].mxu1 %v18917_v1  ;;  %v15548_v1 = vsel %vm18137_vm7, %v19171_v37, 0.0 }
 0x62b   :  { %15305 = vmatpush1.msra.mxu1 %v15067_v10  ;;  %15368 = vmatprep.mubr.f32.mxu1 %v17961_v0  ;;  %v15556_v44 = vand.u32 4294901760, %v15548_v1 }
 0x62c   :  { %15381 = vmatprep.subr.mxu1 %v15145_v24 }
 0x62d   :  { %v15639_v55 = vsub.f32 %v15548_v1, %v15556_v44 }
 0x632   :  { %15372 = vmatmul.mubr.f32.vlgmr.msra.gmra.mrb[2].mxu1 %v18922_v23  ;;  %v15640_v23 = vand.u32 4294901760, %v15639_v55 }
 0x633   :  { %15385 = vmatpush1.msra.mxu1 %v15151_v54  ;;  %15448 = vmatprep.mubr.f32.mxu1 %v17961_v0 }
 0x634   :  { %15457 = vmatprep.subr.mxu1 %v15065_v18  ;;  %v15641_v46 = vsub.f32 %v15639_v55, %v15640_v23  ;;  %v16605_v18 = vsub.f32 %v16603_v30, %v16604_v6 }
 0x636   :  { %v15642_v37 = vand.u32 4294901760, %v15641_v46  ;;  %v16606_v47 = vand.u32 4294901760, %v16605_v18 }
 0x63a   :  { %15450 = vmatmul.mubr.f32.vlgmr.msra.gmra.mrb[2].mxu1 %v18912_v21 }
 0x63b   :  { %15459 = vmatpush1.msra.mxu1 %v15067_v10  ;;  %15522 = vmatprep.mubr.f32.mxu1 %v17961_v0 }
 0x63c   :  { %15555 = vmatprep.subr.mxu1 %v15554_v57 }
 0x642   :  { %15524 = vmatmul.mubr.f32.vlgmr.msra.gmra.mrb[2].mxu1 %v18912_v21  ;;  %v16024_v21 = vpop.permute.xlu0 %16023 }
 0x643   :  { %15557 = vmatpush1.msra.mxu1 %v15556_v44  ;;  %15620 = vmatprep.mubr.f32.mxu1 %v17961_v0  ;;  %v16028_v26 = vsel %vm2954_vm10, %v16024_v21, %v19178_v15 }
 0x644   :  { %15637 = vmatprep.subr.mxu1 %v15636_v48 }
 0x646   :  { %v16022_v4 = vpop.permute.xlu0 %16021 }
 0x647   :  { %v16027_v8 = vsel %vm2954_vm10, %v16022_v4, %v16024_v21 }
 0x648   :  { %v16031_v16 = vsel %vm18086_vm4, %v16027_v8, 0.0 }
 0x649   :  { %v16039_v13 = vand.u32 4294901760, %v16031_v16 }
 0x64a   :  { %15626 = vmatmul.mubr.f32.vlgmr.msra.gmra.mrb[2].mxu1 %v18962_v33  ;;  %v16032_v33 = vsel %vm18072_vm3, %v16028_v26, 0.0 }
 0x64b   :  { %15643 = vmatpush1.msra.mxu1 %v15642_v37  ;;  %15706 = vmatprep.mubr.f32.mxu1 %v17961_v0  ;;  %v16037_v28 = vand.u32 4294901760, %v16032_v33  ;;  %v16122_v31 = vsub.f32 %v16031_v16, %v16039_v13 }
 0x64c   :  { %15716 = vmatprep.subr.mxu1 %v15633_v7 }
 0x64d   :  { %v16123_v42 = vand.u32 4294901760, %v16122_v31 }
 0x64f   :  { %v16124_v38 = vsub.f32 %v16122_v31, %v16123_v42 }
 0x651   :  { %v16125_v35 = vand.u32 4294901760, %v16124_v38 }
 0x652   :  { %15708 = vmatmul.mubr.f32.vlgmr.msra.gmra.mrb[2].mxu1 %v18948_v52 }
 0x653   :  { %15719 = vmatpush1.msra.mxu1 %v15639_v55  ;;  %15782 = vmatprep.mubr.f32.mxu1 %v17961_v0 }
 0x654   :  { %15792 = vmatprep.subr.mxu1 %v15554_v57 }
 0x65a   :  { %15785 = vmatmul.mubr.f32.vlgmr.msra.gmra.mrb[2].mxu1 %v18952_v14  ;;  %v16116_v14 = vsub.f32 %v16032_v33, %v16037_v28 }
 0x65b   :  { %15794 = vmatpush1.msra.mxu1 %v15556_v44  ;;  %15857 = vmatprep.mubr.f32.mxu1 %v17961_v0 }
 0x65c   :  { %15870 = vmatprep.subr.mxu1 %v15634_v41  ;;  %v16117_v15 = vand.u32 4294901760, %v16116_v14 }
 0x662   :  { %15861 = vmatmul.mubr.f32.vlgmr.msra.gmra.mrb[2].mxu1 %v18956_v50  ;;  %v16118_v50 = vsub.f32 %v16116_v14, %v16117_v15 }
 0x663   :  { %15874 = vmatpush1.msra.mxu1 %v15640_v23  ;;  %15937 = vmatprep.mubr.f32.mxu1 %v17961_v0 }
 0x664   :  { %15946 = vmatprep.subr.mxu1 %v15554_v57  ;;  %v16119_v27 = vand.u32 4294901760, %v16118_v50  ;;  %v17960_v57 = vld [vmem:[%s19355_s0 + $0x18] sm:$0xff] }
 0x66a   :  { %15939 = vmatmul.mubr.f32.vlgmr.msra.gmra.mrb[2].mxu1 %v18948_v52 }
 0x66b   :  { %15948 = vmatpush1.msra.mxu1 %v15556_v44  ;;  %16011 = vmatprep.mubr.f32.mxu1 %v17961_v0 }
 0x66c   :  { %16038 = vmatprep.subr.mxu1 %v16037_v28 }
 0x672   :  { %16013 = vmatmul.mubr.f32.vlgmr.msra.gmra.mrb[2].mxu1 %v18948_v52  ;;  %v16510_v52 = vpop.permute.xlu0 %16509 }
 0x673   :  { %16040 = vmatpush1.msra.mxu1 %v16039_v13  ;;  %16103 = vmatprep.mubr.f32.mxu1 %v17961_v0 }
 0x674   :  { %16120 = vmatprep.subr.mxu1 %v16119_v27 }
 0x67a   :  { %16109 = vmatmul.mubr.f32.vlgmr.msra.gmra.mrb[2].mxu1 %v18996_v29  ;;  %v16512_v29 = vsel %vm3441_vm11, %v19183_v36, %v16510_v52 }
 0x67b   :  { %16126 = vmatpush1.msra.mxu1 %v16125_v35  ;;  %16189 = vmatprep.mubr.f32.mxu1 %v17961_v0  ;;  %v16518_v17 = vand.u32 4294901760, %v16512_v29 }
 0x67c   :  { %16199 = vmatprep.subr.mxu1 %v16116_v14 }
 0x67d   :  { %v16597_v62 = vsub.f32 %v16512_v29, %v16518_v17 }
 0x682   :  { %16191 = vmatmul.mubr.f32.vlgmr.msra.gmra.mrb[2].mxu1 %v18982_v20 }
 0x683   :  { %16202 = vmatpush1.msra.mxu1 %v16122_v31  ;;  %16265 = vmatprep.mubr.f32.mxu1 %v17961_v0 }
 0x684   :  { %16275 = vmatprep.subr.mxu1 %v16037_v28 }
 0x68a   :  { %16268 = vmatmul.mubr.f32.vlgmr.msra.gmra.mrb[2].mxu1 %v18986_v22  ;;  %v16598_v22 = vand.u32 4294901760, %v16597_v62 }
 0x68b   :  { %16277 = vmatpush1.msra.mxu1 %v16039_v13  ;;  %16340 = vmatprep.mubr.f32.mxu1 %v17961_v0 }
 0x68c   :  { %16353 = vmatprep.subr.mxu1 %v16117_v15  ;;  %v16599_v36 = vsub.f32 %v16597_v62, %v16598_v22 }
 0x692   :  { %16344 = vmatmul.mubr.f32.vlgmr.msra.gmra.mrb[2].mxu1 %v18990_v25  ;;  %v16600_v25 = vand.u32 4294901760, %v16599_v36 }
 0x693   :  { %16357 = vmatpush1.msra.mxu1 %v16123_v42  ;;  %16420 = vmatprep.mubr.f32.mxu1 %v17961_v0 }
 0x694   :  { %16429 = vmatprep.subr.mxu1 %v16037_v28 }
 0x69a   :  { %16422 = vmatmul.mubr.f32.vlgmr.msra.gmra.mrb[2].mxu1 %v18982_v20 }
 0x69b   :  { %16431 = vmatpush1.msra.mxu1 %v16039_v13  ;;  %16494 = vmatprep.mubr.f32.mxu1 %v17961_v0 }
 0x69c   :  { %16519 = vmatprep.subr.mxu1 %v16518_v17 }
 0x6a2   :  { %16496 = vmatmul.mubr.f32.vlgmr.msra.gmra.mrb[2].mxu1 %v18982_v20  ;;  %v16988_v20 = vpop.permute.xlu0 %16987 }
 0x6a3   :  { %16521 = vmatpush1.msra.mxu1 %v16520_v12  ;;  %16584 = vmatprep.mubr.f32.mxu1 %v17961_v0  ;;  %v16992_v56 = vsel %vm3922_vm12, %v16988_v20, %v19231_v2 }
 0x6a4   :  { %16601 = vmatprep.subr.mxu1 %v16600_v25 }
 0x6a6   :  { %v16986_v10 = vpop.permute.xlu0 %16985 }
 0x6a7   :  { %v16991_v5 = vsel %vm3922_vm12, %v16986_v10, %v16988_v20 }
 0x6a8   :  { %v16995_v9 = vsel %vm18137_vm7, %v16991_v5, 0.0 }
 0x6a9   :  { %v17003_v54 = vand.u32 4294901760, %v16995_v9 }
 0x6aa   :  { %16590 = vmatmul.mubr.f32.vlgmr.msra.gmra.mrb[2].mxu1 %v19034_v61  ;;  %v16996_v61 = vsel %vm18126_vm6, %v16992_v56, 0.0 }
 0x6ab   :  { %16607 = vmatpush1.msra.mxu1 %v16606_v47  ;;  %16670 = vmatprep.mubr.f32.mxu1 %v17961_v0  ;;  %v17001_v24 = vand.u32 4294901760, %v16996_v61  ;;  %v17086_v58 = vsub.f32 %v16995_v9, %v17003_v54 }
 0x6ac   :  { %16680 = vmatprep.subr.mxu1 %v16597_v62 }
 0x6ad   :  { %v17087_v51 = vand.u32 4294901760, %v17086_v58 }
 0x6af   :  { %v17088_v3 = vsub.f32 %v17086_v58, %v17087_v51 }
 0x6b1   :  { %v17089_v53 = vand.u32 4294901760, %v17088_v3 }
 0x6b2   :  { %16672 = vmatmul.mubr.f32.vlgmr.msra.gmra.mrb[2].mxu1 %v19015_v11 }
 0x6b3   :  { %16683 = vmatpush1.msra.mxu1 %v16603_v30  ;;  %16746 = vmatprep.mubr.f32.mxu1 %v17961_v0 }
 0x6b4   :  { %16756 = vmatprep.subr.mxu1 %v16518_v17 }
 0x6ba   :  { %16749 = vmatmul.mubr.f32.vlgmr.msra.gmra.mrb[2].mxu1 %v19021_v19  ;;  %v17080_v19 = vsub.f32 %v16996_v61, %v17001_v24 }
 0x6bb   :  { %16758 = vmatpush1.msra.mxu1 %v16520_v12  ;;  %16821 = vmatprep.mubr.f32.mxu1 %v17961_v0 }
 0x6bc   :  { %16834 = vmatprep.subr.mxu1 %v16598_v22  ;;  %v17081_v2 = vand.u32 4294901760, %v17080_v19 }
 0x6c2   :  { %16825 = vmatmul.mubr.f32.vlgmr.msra.gmra.mrb[2].mxu1 %v19027_v45  ;;  %v17082_v45 = vsub.f32 %v17080_v19, %v17081_v2 }
 0x6c3   :  { %16838 = vmatpush1.msra.mxu1 %v16604_v6  ;;  %16901 = vmatprep.mubr.f32.mxu1 %v17961_v0 }
 0x6c4   :  { %16910 = vmatprep.subr.mxu1 %v16518_v17  ;;  %v17083_v60 = vand.u32 4294901760, %v17082_v45 }
 0x6ca   :  { %16903 = vmatmul.mubr.f32.vlgmr.msra.gmra.mrb[2].mxu1 %v19015_v11 }
 0x6cb   :  { %16912 = vmatpush1.msra.mxu1 %v16520_v12  ;;  %16975 = vmatprep.mubr.f32.mxu1 %v17961_v0 }
 0x6cc   :  { %17002 = vmatprep.subr.mxu1 %v17001_v24 }
 0x6d2   :  { %16977 = vmatmul.mubr.f32.vlgmr.msra.gmra.mrb[2].mxu1 %v19015_v11  ;;  %v17472_v11 = vpop.permute.xlu0 %17471 }
 0x6d3   :  { %17004 = vmatpush1.msra.mxu1 %v17003_v54  ;;  %17067 = vmatprep.mubr.f32.mxu1 %v17961_v0 }
 0x6d4   :  { %17084 = vmatprep.subr.mxu1 %v17083_v60 }
 0x6da   :  { %17073 = vmatmul.mubr.f32.vlgmr.msra.gmra.mrb[2].mxu1 %v19104_v40 }
 0x6db   :  { %17090 = vmatpush1.msra.mxu1 %v17089_v53  ;;  %17153 = vmatprep.mubr.f32.mxu1 %v17961_v0 }
 0x6dc   :  { %17163 = vmatprep.subr.mxu1 %v17080_v19 }
 0x6e2   :  { %17155 = vmatmul.mubr.f32.vlgmr.msra.gmra.mrb[2].mxu1 %v19072_v32 }
 0x6e3   :  { %17166 = vmatpush1.msra.mxu1 %v17086_v58  ;;  %17229 = vmatprep.mubr.f32.mxu1 %v17961_v0 }
 0x6e4   :  { %17239 = vmatprep.subr.mxu1 %v17001_v24 }
 0x6ea   :  { %17232 = vmatmul.mubr.f32.vlgmr.msra.gmra.mrb[2].mxu1 %v19080_v34 }
 0x6eb   :  { %17241 = vmatpush1.msra.mxu1 %v17003_v54  ;;  %17304 = vmatprep.mubr.f32.mxu1 %v17961_v0 }
 0x6ec   :  { %17317 = vmatprep.subr.mxu1 %v17081_v2 }
 0x6f2   :  { %17308 = vmatmul.mubr.f32.vlgmr.msra.gmra.mrb[2].mxu1 %v19090_v39  ;;  %v17959_v39 = vld [vmem:[%s19355_s0 + $0x10] sm:$0xff] }
 0x6f3   :  { %17321 = vmatpush1.msra.mxu1 %v17087_v51  ;;  %17384 = vmatprep.mubr.f32.mxu1 %v17961_v0 }
 0x6f4   :  { %17393 = vmatprep.subr.mxu1 %v17001_v24 }
 0x6fa   :  { %17386 = vmatmul.mubr.f32.vlgmr.msra.gmra.mrb[2].mxu1 %v19072_v32 }
 0x6fb   :  { %17395 = vmatpush1.msra.mxu1 %v17003_v54  ;;  %17458 = vmatprep.mubr.f32.mxu1 %v17961_v0 }
 0x702   :  { %17460 = vmatmul.mubr.f32.vlgmr.msra.gmra.mrb[2].mxu1 %v19072_v32 }
 0x7d5   :  { %v17461_v40 = vpop.f32.mrb[2].mxu1 }
 0x7d6   :  { %v17474_v34 = vadd.f32 %v17472_v11, %v17461_v40  ;;  %v17463_v59 = vpop.f32.mrb[3].mxu1 }
 0x7d7   :  { %v17475_v49 = vadd.f32 %v17472_v11, %v17463_v59 }
 0x7d8   :  { %v17476_v43 = vadd.f32 %v17959_v39, %v17474_v34 }
 0x7d9   :  { %v17477_v7 = vadd.f32 %v17960_v57, %v17475_v49 }
 0x7da   :  { %17519 = vst [vmem:[%s19360_s5 + $0x10] sm:$0xff] %v17476_v43 }
 0x7db   :  { %17520 = vst [vmem:[%s19360_s5 + $0x18] sm:$0xff] %v17477_v7 }

</bundles_post_ra>
